<compile_context>
chip_gen: v5e
topology: v5e:2x2
jax: 0.10.0
libtpu: 0.0.40
codegen_flags: <defaults>
</compile_context>

<pallas_src>
import functools

import jax
import jax.numpy as jnp
from jax import lax
from jax.experimental import pallas as pl
from jax.experimental.pallas import tpu as pltpu

_INV_SQRT2 = 0.7071067811865475
_MXU_DTYPE = jnp.bfloat16          # MXU operand dtype (f32 accumulation).
                                   # Set to jnp.float32 for exact-f32 math.
_VMEM_LIMIT = 32 * 1024 * 1024     # safe on v5e/v6e (128 MiB) and v7x (64 MiB)


def _gelu(x):
    # exact (erf) GELU — matches nn.GELU() default
    return 0.5 * x * (1.0 + lax.erf(x * _INV_SQRT2))


def _apply_act(x, act):
    if act == "relu":
        return jnp.maximum(x, 0.0)
    if act == "gelu":
        return _gelu(x)
    if act == "sigmoid":
        return jax.nn.sigmoid(x)
    if act == "tanh":
        return jnp.tanh(x)
    return x


def _round_up(x, m):
    return -(-x // m) * m


def _pick_tile(m, target=1024, align=16):
    """Large M tiles; >=2 grid steps when possible (v7x: 2 TensorCores)."""
    ma = _round_up(m, align)
    if ma <= 256:
        return ma
    if ma <= 2 * target:
        return _round_up(-(-ma // 2), align)
    return target


# ------------------ Pallas kernel: matmul + fused epilogue ------------------ #

def _mm_kernel(*refs, act, has_res):
    if has_res:
        x_ref, w_ref, b_ref, r_ref, o_ref = refs
    else:
        x_ref, w_ref, b_ref, o_ref = refs
    acc = jnp.dot(x_ref[...], w_ref[...], preferred_element_type=jnp.float32)
    acc = acc + b_ref[...]
    acc = _apply_act(acc, act)
    if has_res:
        acc = acc + r_ref[...]          # fused residual add (RIR skip)
    o_ref[...] = acc.astype(o_ref.dtype)


def matmul_bias_act(x, w, b, act="none", residual=None):
    """(M,K)@(K,N) + b with fused activation and optional fused residual add.

    x / w should already be in the MXU operand dtype (bf16); bias, residual
    and output stay f32.  Tiled over M only; weights stay resident in VMEM.
    """
    M, K = x.shape
    Kw, N = w.shape
    assert K == Kw
    has_res = residual is not None

    tm = _pick_tile(M)
    Mp = _round_up(M, tm)
    if Mp != M:
        x = jnp.pad(x, ((0, Mp - M), (0, 0)))
        if has_res:
            residual = jnp.pad(residual, ((0, Mp - M), (0, 0)))
    grid = (Mp // tm,)

    in_specs = [
        pl.BlockSpec((tm, K), lambda i: (i, 0)),
        pl.BlockSpec((K, N), lambda i: (0, 0)),
        pl.BlockSpec((1, N), lambda i: (0, 0)),
    ]
    args = [x, w, b.reshape(1, N)]
    if has_res:
        in_specs.append(pl.BlockSpec((tm, N), lambda i: (i, 0)))
        args.append(residual)

    flops = 2 * Mp * K * N
    transcend = Mp * N if act in ("gelu", "sigmoid", "tanh") else 0
    bytes_accessed = (Mp * K * x.dtype.itemsize + K * N * w.dtype.itemsize
                      + 4 * N + 4 * Mp * N + (4 * Mp * N if has_res else 0))

    out = pl.pallas_call(
        functools.partial(_mm_kernel, act=act, has_res=has_res),
        out_shape=jax.ShapeDtypeStruct((Mp, N), jnp.float32),
        grid=grid,
        in_specs=in_specs,
        out_specs=pl.BlockSpec((tm, N), lambda i: (i, 0)),
        compiler_params=pltpu.CompilerParams(
            dimension_semantics=("parallel",),
            vmem_limit_bytes=_VMEM_LIMIT),
        cost_estimate=pl.CostEstimate(
            flops=flops, transcendentals=transcend,
            bytes_accessed=bytes_accessed),
    )(*args)
    return out if Mp == M else out[:M]


# ------------------ Pallas kernel: fully fused SAB block -------------------- #

def _sab_kernel(x_ref, w3_ref, b3_ref, w1t_ref, b1_ref, w2_ref, b2_ref,
                wr_ref, br_ref, o_ref):
    x = x_ref[...]                                      # (tm, C) f32
    w3 = w3_ref[...].astype(_MXU_DTYPE)                 # (C, C) resident
    b3 = b3_ref[...]                                    # (1, C)

    # main path: conv3 -> gelu -> conv3 (same weights/bias), on the MXU
    h = jnp.dot(x.astype(_MXU_DTYPE), w3, preferred_element_type=jnp.float32)
    h = _gelu(h + b3)
    out = jnp.dot(h.astype(_MXU_DTYPE), w3, preferred_element_type=jnp.float32)
    out = out + b3

    # attention path: 64->4 (gelu) -> 4->1 (sigmoid) -> 1->64.  K/N of 4 and 1
    # would waste the MXU and force 1/4-lane masked stores, so compute them as
    # VPU broadcast-multiplies + XLU lane reductions; everything stays in vregs.
    w1t = w1t_ref[...]                                  # (C/16, C)
    b1 = b1_ref[...]                                    # (1, C/16)
    w2 = w2_ref[...]                                    # (1, C/16)
    s = b2_ref[...]                                     # (1, 1), broadcasts up
    for j in range(w1t.shape[0]):
        aj = jnp.sum(x * w1t[j:j + 1, :], axis=-1, keepdims=True)   # (tm, 1)
        aj = _gelu(aj + b1[:, j:j + 1])
        s = s + aj * w2[:, j:j + 1]
    s = jax.nn.sigmoid(s)                               # (tm, 1)
    att = s * wr_ref[...] + br_ref[...]                 # restore 1->C, (tm, C)

    o_ref[...] = (att * out).astype(o_ref.dtype)        # fused gating mul


def sab_forward(x_nhwc, p):
    n, h, w, c = x_nhwc.shape
    M = n * h * w
    x2 = x_nhwc.reshape(M, c)
    tm = _pick_tile(M)
    Mp = _round_up(M, tm)
    if Mp != M:
        x2 = jnp.pad(x2, ((0, Mp - M), (0, 0)))
    grid = (Mp // tm,)
    cr = p["w1t"].shape[0]

    tile = lambda i: (i, 0)
    const = lambda i: (0, 0)
    in_specs = [
        pl.BlockSpec((tm, c), tile),     # x
        pl.BlockSpec((c, c), const),     # w3
        pl.BlockSpec((1, c), const),     # b3
        pl.BlockSpec((cr, c), const),    # w1 (transposed)
        pl.BlockSpec((1, cr), const),    # b1
        pl.BlockSpec((1, cr), const),    # w2 row
        pl.BlockSpec((1, 1), const),     # b2
        pl.BlockSpec((1, c), const),     # restore weight row
        pl.BlockSpec((1, c), const),     # restore bias
    ]

    flops = 4 * Mp * c * c + 2 * Mp * c * cr
    transcend = Mp * (c + cr + 1)
    bytes_accessed = 4 * (2 * Mp * c + c * c + cr * c + 4 * c + 2 * cr + 1)

    y = pl.pallas_call(
        _sab_kernel,
        out_shape=jax.ShapeDtypeStruct((Mp, c), jnp.float32),
        grid=grid,
        in_specs=in_specs,
        out_specs=pl.BlockSpec((tm, c), tile),
        compiler_params=pltpu.CompilerParams(
            dimension_semantics=("parallel",),
            vmem_limit_bytes=_VMEM_LIMIT),
        cost_estimate=pl.CostEstimate(
            flops=flops, transcendentals=transcend,
            bytes_accessed=bytes_accessed),
    )(x2, p["w3"], p["b3"], p["w1t"], p["b1"], p["w2"], p["b2"],
      p["wr"], p["br"])
    if Mp != M:
        y = y[:M]
    return y.reshape(n, h, w, c)


# -------------------------------- conv glue --------------------------------- #

def im2col(x, k, stride, pad):
    """(N,H,W,C) -> ((N*Ho*Wo), k*k*C) bf16 patches (order kh, kw, Cin)."""
    xp = jnp.pad(x.astype(_MXU_DTYPE),
                 ((0, 0), (pad, pad), (pad, pad), (0, 0)))
    n, hp, wp, c = xp.shape
    ho = (hp - k) // stride + 1
    wo = (wp - k) // stride + 1
    patches = []
    for dh in range(k):
        for dw in range(k):
            patches.append(
                xp[:, dh:dh + stride * ho:stride, dw:dw + stride * wo:stride, :])
    cols = jnp.concatenate(patches, axis=-1)
    return cols.reshape(n * ho * wo, k * k * c), (n, ho, wo)


def conv3x3(x_nhwc, w, b, stride=1, act="none", residual=None):
    cols, (n, ho, wo) = im2col(x_nhwc, 3, stride, 1)
    r2 = None
    if residual is not None:
        r2 = residual.reshape(n * ho * wo, residual.shape[-1])
    y = matmul_bias_act(cols, w.astype(_MXU_DTYPE), b, act=act, residual=r2)
    return y.reshape(n, ho, wo, w.shape[1])


def bilinear_up2(x):
    """nn.Upsample(scale_factor=2, mode='bilinear', align_corners=False),
    expressed as clamped shifted slices + interleave (no gather)."""
    def up_axis(v, axis):
        L = v.shape[axis]
        prev = jnp.concatenate(
            [lax.slice_in_dim(v, 0, 1, axis=axis),
             lax.slice_in_dim(v, 0, L - 1, axis=axis)], axis=axis)  # v[k-1] clamp
        nxt = jnp.concatenate(
            [lax.slice_in_dim(v, 1, L, axis=axis),
             lax.slice_in_dim(v, L - 1, L, axis=axis)], axis=axis)  # v[k+1] clamp
        even = 0.75 * v + 0.25 * prev        # output index 2k
        odd = 0.75 * v + 0.25 * nxt          # output index 2k+1
        st = jnp.stack([even, odd], axis=axis + 1)
        shape = v.shape[:axis] + (2 * L,) + v.shape[axis + 1:]
        return st.reshape(shape)
    return up_axis(up_axis(x, 1), 2)


# -------------------------------- parameters -------------------------------- #

def init_params(key, in_ch=3, inner=64, block_count=1, sab_per_rir=3):
    keys = iter(jax.random.split(key, 256))

    def conv_w(cin, cout, k):
        # stored as (k*k*cin, cout), (kh, kw, cin) major->minor
        return jax.random.normal(next(keys), (k * k * cin, cout),
                                 jnp.float32) * 0.05

    def rnd(shape, scale):
        return jax.random.normal(next(keys), shape, jnp.float32) * scale

    p = {
        "d1_w": conv_w(in_ch, inner, 3), "d1_b": rnd((inner,), 0.01),
        "d2_w": conv_w(inner, inner, 3), "d2_b": rnd((inner,), 0.01),
        "rir": [],
    }
    cr = inner // 16
    for _ in range(block_count):
        rir = {"sab": []}
        for _ in range(sab_per_rir):
            rir["sab"].append({
                "w3": rnd((inner, inner), 0.05), "b3": rnd((1, inner), 0.01),
                "w1t": rnd((cr, inner), 0.05),   "b1": rnd((1, cr), 0.01),
                "w2": rnd((1, cr), 0.05),        "b2": rnd((1, 1), 0.01),
                "wr": rnd((1, inner), 0.05),     "br": rnd((1, inner), 0.01),
            })
        rir["cb_w"], rir["cb_b"] = conv_w(inner, inner, 3), rnd((inner,), 0.01)
        p["rir"].append(rir)
    p["u1_w"], p["u1_b"] = conv_w(inner, inner, 3), rnd((inner,), 0.01)
    p["u2_w"], p["u2_b"] = conv_w(inner, inner, 3), rnd((inner,), 0.01)
    p["r_w"], p["r_b"] = conv_w(inner, in_ch, 3), rnd((in_ch,), 0.01)
    return p


# ------------------------------- model forward ------------------------------ #

def rir_forward(x_nhwc, p):
    residual = x_nhwc
    x = x_nhwc
    for sab in p["sab"]:
        x = sab_forward(x, sab)
    # conv_block1 with the RIR residual add fused into the matmul epilogue
    return conv3x3(x, p["cb_w"], p["cb_b"], stride=1, act="none",
                   residual=residual)


def teacher_forward(params, hazy_image_nchw):
    x = jnp.transpose(hazy_image_nchw, (0, 2, 3, 1))      # NCHW -> NHWC
    # downsample: conv3x3 s2 + relu, conv3x3 s2 + relu
    x = conv3x3(x, params["d1_w"], params["d1_b"], stride=2, act="relu")
    x = conv3x3(x, params["d2_w"], params["d2_b"], stride=2, act="relu")
    # residual-in-residual blocks (3 fused SABs + conv_block1 + fused skip)
    for rir in params["rir"]:
        x = rir_forward(x, rir)
    # upsample: conv+relu, bilinear x2, conv+relu, bilinear x2
    x = conv3x3(x, params["u1_w"], params["u1_b"], stride=1, act="relu")
    x = bilinear_up2(x)
    x = conv3x3(x, params["u2_w"], params["u2_b"], stride=1, act="relu")
    x = bilinear_up2(x)
    # reconstruction: conv3x3 + tanh
    x = conv3x3(x, params["r_w"], params["r_b"], stride=1, act="tanh")
    return jnp.transpose(x, (0, 3, 1, 2))                 # NHWC -> NCHW


if __name__ == "__main__":
    key = jax.random.PRNGKey(0)
    pkey, xkey = jax.random.split(key)
    params = init_params(pkey, in_ch=3, inner=64, block_count=1)
    hazy = jax.random.normal(xkey, (2, 3, 16, 16), jnp.float32)

    fwd = jax.jit(teacher_forward)
    out = fwd(params, hazy)
    jax.block_until_ready(out)

    assert out.shape == (2, 3, 16, 16), out.shape
    assert bool(jnp.all(jnp.isfinite(out)))
    print("KERNEL_OK")
</pallas_src>

<mosaic_0001>
module attributes {stable_mosaic.version = 11 : i64} {
  func.func @_mm_kernel(%arg0: i32, %arg1: memref<128x27xbf16, #tpu.memory_space<vmem>>, %arg2: memref<27x64xbf16, #tpu.memory_space<vmem>>, %arg3: memref<1x64xf32, #tpu.memory_space<vmem>>, %arg4: memref<128x64xf32, #tpu.memory_space<vmem>>) attributes {dimension_semantics = [#tpu.dimension_semantics<parallel>], iteration_bounds = array<i64: 1>, scalar_prefetch = 0 : i64, scratch_operands = 0 : i64, tpu.core_type = #tpu.core_type<tc>, window_params = [{transform_indices = @transform_0, window_bounds = array<i64: 128, 27>}, {pipeline_mode = #tpu.pipeline_mode<synchronous>, transform_indices = @transform_1, window_bounds = array<i64: 27, 64>}, {pipeline_mode = #tpu.pipeline_mode<synchronous>, transform_indices = @transform_2, window_bounds = array<i64: 1, 64>}, {transform_indices = @transform_3, window_bounds = array<i64: 128, 64>}]} {
    %c0 = arith.constant 0 : index
    %c0_0 = arith.constant 0 : index
    %0 = vector.load %arg1[%c0, %c0_0] : memref<128x27xbf16, #tpu.memory_space<vmem>>, vector<128x27xbf16>
    %c0_1 = arith.constant 0 : index
    %c0_2 = arith.constant 0 : index
    %1 = vector.load %arg2[%c0_1, %c0_2] : memref<27x64xbf16, #tpu.memory_space<vmem>>, vector<27x64xbf16>
    %cst = arith.constant dense<0.000000e+00> : vector<128x64xf32>
    %2 = tpu.matmul %0, %1, %cst {dimension_numbers = #tpu.dot_dimension_numbers<[1], [0], [0], [1], [0, 0, 1, 1], [], []>} : vector<128x27xbf16>, vector<27x64xbf16>, vector<128x64xf32> -> vector<128x64xf32>
    %c0_3 = arith.constant 0 : index
    %c0_4 = arith.constant 0 : index
    %3 = vector.load %arg3[%c0_3, %c0_4] : memref<1x64xf32, #tpu.memory_space<vmem>>, vector<1x64xf32>
    %4 = vector.broadcast %3 : vector<1x64xf32> to vector<128x64xf32>
    %5 = arith.addf %2, %4 : vector<128x64xf32>
    %cst_5 = arith.constant 0.000000e+00 : f32
    %6 = vector.broadcast %cst_5 : f32 to vector<128x64xf32>
    %7 = arith.maximumf %5, %6 : vector<128x64xf32>
    %c0_6 = arith.constant 0 : index
    %c0_7 = arith.constant 0 : index
    %8 = vector.load %arg4[%c0_6, %c0_7] : memref<128x64xf32, #tpu.memory_space<vmem>>, vector<128x64xf32>
    tpu.vector_store %arg4[%c0_6, %c0_7], %7 {strides = array<i32>} : memref<128x64xf32, #tpu.memory_space<vmem>>, vector<128x64xf32>,
    return
  }
  func.func @transform_0(%arg0: i32) -> (i32, i32) {
    %c0_i32 = arith.constant 0 : i32
    %c0_i32_0 = arith.constant 0 : i32
    return %arg0, %c0_i32 : i32, i32
  }
  func.func @transform_1(%arg0: i32) -> (i32, i32) {
    %c0_i32 = arith.constant 0 : i32
    %c0_i32_0 = arith.constant 0 : i32
    %c0_i32_1 = arith.constant 0 : i32
    return %c0_i32, %c0_i32_0 : i32, i32
  }
  func.func @transform_2(%arg0: i32) -> (i32, i32) {
    %c0_i32 = arith.constant 0 : i32
    %c0_i32_0 = arith.constant 0 : i32
    %c0_i32_1 = arith.constant 0 : i32
    return %c0_i32, %c0_i32_0 : i32, i32
  }
  func.func @transform_3(%arg0: i32) -> (i32, i32) {
    %c0_i32 = arith.constant 0 : i32
    %c0_i32_0 = arith.constant 0 : i32
    return %arg0, %c0_i32 : i32, i32
  }
}

module attributes {stable_mosaic.version = 11 : i64} {
  func.func @_sab_kernel(%arg0: i32, %arg1: memref<32x64xf32, #tpu.memory_space<vmem>>, %arg2: memref<64x64xf32, #tpu.memory_space<vmem>>, %arg3: memref<1x64xf32, #tpu.memory_space<vmem>>, %arg4: memref<4x64xf32, #tpu.memory_space<vmem>>, %arg5: memref<1x4xf32, #tpu.memory_space<vmem>>, %arg6: memref<1x4xf32, #tpu.memory_space<vmem>>, %arg7: memref<1x1xf32, #tpu.memory_space<vmem>>, %arg8: memref<1x64xf32, #tpu.memory_space<vmem>>, %arg9: memref<1x64xf32, #tpu.memory_space<vmem>>, %arg10: memref<32x64xf32, #tpu.memory_space<vmem>>) attributes {dimension_semantics = [#tpu.dimension_semantics<parallel>], iteration_bounds = array<i64: 1>, scalar_prefetch = 0 : i64, scratch_operands = 0 : i64, tpu.core_type = #tpu.core_type<tc>, window_params = [{transform_indices = @transform_0, window_bounds = array<i64: 32, 64>}, {pipeline_mode = #tpu.pipeline_mode<synchronous>, transform_indices = @transform_1, window_bounds = array<i64: 64, 64>}, {pipeline_mode = #tpu.pipeline_mode<synchronous>, transform_indices = @transform_2, window_bounds = array<i64: 1, 64>}, {pipeline_mode = #tpu.pipeline_mode<synchronous>, transform_indices = @transform_3, window_bounds = array<i64: 4, 64>}, {pipeline_mode = #tpu.pipeline_mode<synchronous>, transform_indices = @transform_4, window_bounds = array<i64: 1, 4>}, {pipeline_mode = #tpu.pipeline_mode<synchronous>, transform_indices = @transform_5, window_bounds = array<i64: 1, 4>}, {pipeline_mode = #tpu.pipeline_mode<synchronous>, transform_indices = @transform_6, window_bounds = array<i64: 1, 1>}, {pipeline_mode = #tpu.pipeline_mode<synchronous>, transform_indices = @transform_7, window_bounds = array<i64: 1, 64>}, {pipeline_mode = #tpu.pipeline_mode<synchronous>, transform_indices = @transform_8, window_bounds = array<i64: 1, 64>}, {transform_indices = @transform_9, window_bounds = array<i64: 32, 64>}]} {
    %c0 = arith.constant 0 : index
    %c0_0 = arith.constant 0 : index
    %0 = vector.load %arg1[%c0, %c0_0] : memref<32x64xf32, #tpu.memory_space<vmem>>, vector<32x64xf32>
    %c0_1 = arith.constant 0 : index
    %c0_2 = arith.constant 0 : index
    %1 = vector.load %arg2[%c0_1, %c0_2] : memref<64x64xf32, #tpu.memory_space<vmem>>, vector<64x64xf32>
    %2 = arith.truncf %1 : vector<64x64xf32> to vector<64x64xbf16>
    %c0_3 = arith.constant 0 : index
    %c0_4 = arith.constant 0 : index
    %3 = vector.load %arg3[%c0_3, %c0_4] : memref<1x64xf32, #tpu.memory_space<vmem>>, vector<1x64xf32>
    %4 = arith.truncf %0 : vector<32x64xf32> to vector<32x64xbf16>
    %cst = arith.constant dense<0.000000e+00> : vector<32x64xf32>
    %5 = tpu.matmul %4, %2, %cst {dimension_numbers = #tpu.dot_dimension_numbers<[1], [0], [0], [1], [0, 0, 1, 1], [], []>} : vector<32x64xbf16>, vector<64x64xbf16>, vector<32x64xf32> -> vector<32x64xf32>
    %6 = vector.broadcast %3 : vector<1x64xf32> to vector<32x64xf32>
    %7 = arith.addf %5, %6 : vector<32x64xf32>
    %cst_5 = arith.constant 5.000000e-01 : f32
    %8 = vector.broadcast %cst_5 : f32 to vector<32x64xf32>
    %9 = arith.mulf %8, %7 : vector<32x64xf32>
    %cst_6 = arith.constant 0.707106769 : f32
    %10 = vector.broadcast %cst_6 : f32 to vector<32x64xf32>
    %11 = arith.mulf %7, %10 : vector<32x64xf32>
    %12 = math.erf %11 : vector<32x64xf32>
    %cst_7 = arith.constant 1.000000e+00 : f32
    %13 = vector.broadcast %cst_7 : f32 to vector<32x64xf32>
    %14 = arith.addf %13, %12 : vector<32x64xf32>
    %15 = arith.mulf %9, %14 : vector<32x64xf32>
    %16 = arith.truncf %15 : vector<32x64xf32> to vector<32x64xbf16>
    %cst_8 = arith.constant dense<0.000000e+00> : vector<32x64xf32>
    %17 = tpu.matmul %16, %2, %cst_8 {dimension_numbers = #tpu.dot_dimension_numbers<[1], [0], [0], [1], [0, 0, 1, 1], [], []>} : vector<32x64xbf16>, vector<64x64xbf16>, vector<32x64xf32> -> vector<32x64xf32>
    %18 = vector.broadcast %3 : vector<1x64xf32> to vector<32x64xf32>
    %19 = arith.addf %17, %18 : vector<32x64xf32>
    %c0_9 = arith.constant 0 : index
    %c0_10 = arith.constant 0 : index
    %20 = vector.load %arg4[%c0_9, %c0_10] : memref<4x64xf32, #tpu.memory_space<vmem>>, vector<4x64xf32>
    %c0_11 = arith.constant 0 : index
    %c0_12 = arith.constant 0 : index
    %21 = vector.load %arg5[%c0_11, %c0_12] : memref<1x4xf32, #tpu.memory_space<vmem>>, vector<1x4xf32>
    %c0_13 = arith.constant 0 : index
    %c0_14 = arith.constant 0 : index
    %22 = vector.load %arg6[%c0_13, %c0_14] : memref<1x4xf32, #tpu.memory_space<vmem>>, vector<1x4xf32>
    %c0_15 = arith.constant 0 : index
    %c0_16 = arith.constant 0 : index
    %23 = vector.load %arg7[%c0_15, %c0_16] : memref<1x1xf32, #tpu.memory_space<vmem>>, vector<1x1xf32>
    %24 = vector.extract_strided_slice %20 {offsets = [0, 0], sizes = [1, 64], strides = [1, 1]} : vector<4x64xf32> to vector<1x64xf32>
    %25 = vector.broadcast %24 : vector<1x64xf32> to vector<32x64xf32>
    %26 = arith.mulf %0, %25 : vector<32x64xf32>
    %cst_17 = arith.constant dense<0.000000e+00> : vector<32xf32>
    %27 = vector.multi_reduction <add>, %26, %cst_17 [1] : vector<32x64xf32> to vector<32xf32>
    %28 = vector.shape_cast %27 : vector<32xf32> to vector<32x1xf32>
    %29 = vector.extract_strided_slice %21 {offsets = [0, 0], sizes = [1, 1], strides = [1, 1]} : vector<1x4xf32> to vector<1x1xf32>
    %30 = vector.broadcast %29 : vector<1x1xf32> to vector<32x1xf32>
    %31 = arith.addf %28, %30 : vector<32x1xf32>
    %cst_18 = arith.constant 5.000000e-01 : f32
    %32 = vector.broadcast %cst_18 : f32 to vector<32x1xf32>
    %33 = arith.mulf %32, %31 : vector<32x1xf32>
    %cst_19 = arith.constant 0.707106769 : f32
    %34 = vector.broadcast %cst_19 : f32 to vector<32x1xf32>
    %35 = arith.mulf %31, %34 : vector<32x1xf32>
    %36 = math.erf %35 : vector<32x1xf32>
    %cst_20 = arith.constant 1.000000e+00 : f32
    %37 = vector.broadcast %cst_20 : f32 to vector<32x1xf32>
    %38 = arith.addf %37, %36 : vector<32x1xf32>
    %39 = arith.mulf %33, %38 : vector<32x1xf32>
    %40 = vector.extract_strided_slice %22 {offsets = [0, 0], sizes = [1, 1], strides = [1, 1]} : vector<1x4xf32> to vector<1x1xf32>
    %41 = vector.broadcast %40 : vector<1x1xf32> to vector<32x1xf32>
    %42 = arith.mulf %39, %41 : vector<32x1xf32>
    %43 = vector.broadcast %23 : vector<1x1xf32> to vector<32x1xf32>
    %44 = arith.addf %43, %42 : vector<32x1xf32>
    %45 = vector.extract_strided_slice %20 {offsets = [1, 0], sizes = [1, 64], strides = [1, 1]} : vector<4x64xf32> to vector<1x64xf32>
    %46 = vector.broadcast %45 : vector<1x64xf32> to vector<32x64xf32>
    %47 = arith.mulf %0, %46 : vector<32x64xf32>
    %cst_21 = arith.constant dense<0.000000e+00> : vector<32xf32>
    %48 = vector.multi_reduction <add>, %47, %cst_21 [1] : vector<32x64xf32> to vector<32xf32>
    %49 = vector.shape_cast %48 : vector<32xf32> to vector<32x1xf32>
    %50 = vector.extract_strided_slice %21 {offsets = [0, 1], sizes = [1, 1], strides = [1, 1]} : vector<1x4xf32> to vector<1x1xf32>
    %51 = vector.broadcast %50 : vector<1x1xf32> to vector<32x1xf32>
    %52 = arith.addf %49, %51 : vector<32x1xf32>
    %cst_22 = arith.constant 5.000000e-01 : f32
    %53 = vector.broadcast %cst_22 : f32 to vector<32x1xf32>
    %54 = arith.mulf %53, %52 : vector<32x1xf32>
    %cst_23 = arith.constant 0.707106769 : f32
    %55 = vector.broadcast %cst_23 : f32 to vector<32x1xf32>
    %56 = arith.mulf %52, %55 : vector<32x1xf32>
    %57 = math.erf %56 : vector<32x1xf32>
    %cst_24 = arith.constant 1.000000e+00 : f32
    %58 = vector.broadcast %cst_24 : f32 to vector<32x1xf32>
    %59 = arith.addf %58, %57 : vector<32x1xf32>
    %60 = arith.mulf %54, %59 : vector<32x1xf32>
    %61 = vector.extract_strided_slice %22 {offsets = [0, 1], sizes = [1, 1], strides = [1, 1]} : vector<1x4xf32> to vector<1x1xf32>
    %62 = vector.broadcast %61 : vector<1x1xf32> to vector<32x1xf32>
    %63 = arith.mulf %60, %62 : vector<32x1xf32>
    %64 = arith.addf %44, %63 : vector<32x1xf32>
    %65 = vector.extract_strided_slice %20 {offsets = [2, 0], sizes = [1, 64], strides = [1, 1]} : vector<4x64xf32> to vector<1x64xf32>
    %66 = vector.broadcast %65 : vector<1x64xf32> to vector<32x64xf32>
    %67 = arith.mulf %0, %66 : vector<32x64xf32>
    %cst_25 = arith.constant dense<0.000000e+00> : vector<32xf32>
    %68 = vector.multi_reduction <add>, %67, %cst_25 [1] : vector<32x64xf32> to vector<32xf32>
    %69 = vector.shape_cast %68 : vector<32xf32> to vector<32x1xf32>
    %70 = vector.extract_strided_slice %21 {offsets = [0, 2], sizes = [1, 1], strides = [1, 1]} : vector<1x4xf32> to vector<1x1xf32>
    %71 = vector.broadcast %70 : vector<1x1xf32> to vector<32x1xf32>
    %72 = arith.addf %69, %71 : vector<32x1xf32>
    %cst_26 = arith.constant 5.000000e-01 : f32
    %73 = vector.broadcast %cst_26 : f32 to vector<32x1xf32>
    %74 = arith.mulf %73, %72 : vector<32x1xf32>
    %cst_27 = arith.constant 0.707106769 : f32
    %75 = vector.broadcast %cst_27 : f32 to vector<32x1xf32>
    %76 = arith.mulf %72, %75 : vector<32x1xf32>
    %77 = math.erf %76 : vector<32x1xf32>
    %cst_28 = arith.constant 1.000000e+00 : f32
    %78 = vector.broadcast %cst_28 : f32 to vector<32x1xf32>
    %79 = arith.addf %78, %77 : vector<32x1xf32>
    %80 = arith.mulf %74, %79 : vector<32x1xf32>
    %81 = vector.extract_strided_slice %22 {offsets = [0, 2], sizes = [1, 1], strides = [1, 1]} : vector<1x4xf32> to vector<1x1xf32>
    %82 = vector.broadcast %81 : vector<1x1xf32> to vector<32x1xf32>
    %83 = arith.mulf %80, %82 : vector<32x1xf32>
    %84 = arith.addf %64, %83 : vector<32x1xf32>
    %85 = vector.extract_strided_slice %20 {offsets = [3, 0], sizes = [1, 64], strides = [1, 1]} : vector<4x64xf32> to vector<1x64xf32>
    %86 = vector.broadcast %85 : vector<1x64xf32> to vector<32x64xf32>
    %87 = arith.mulf %0, %86 : vector<32x64xf32>
    %cst_29 = arith.constant dense<0.000000e+00> : vector<32xf32>
    %88 = vector.multi_reduction <add>, %87, %cst_29 [1] : vector<32x64xf32> to vector<32xf32>
    %89 = vector.shape_cast %88 : vector<32xf32> to vector<32x1xf32>
    %90 = vector.extract_strided_slice %21 {offsets = [0, 3], sizes = [1, 1], strides = [1, 1]} : vector<1x4xf32> to vector<1x1xf32>
    %91 = vector.broadcast %90 : vector<1x1xf32> to vector<32x1xf32>
    %92 = arith.addf %89, %91 : vector<32x1xf32>
    %cst_30 = arith.constant 5.000000e-01 : f32
    %93 = vector.broadcast %cst_30 : f32 to vector<32x1xf32>
    %94 = arith.mulf %93, %92 : vector<32x1xf32>
    %cst_31 = arith.constant 0.707106769 : f32
    %95 = vector.broadcast %cst_31 : f32 to vector<32x1xf32>
    %96 = arith.mulf %92, %95 : vector<32x1xf32>
    %97 = math.erf %96 : vector<32x1xf32>
    %cst_32 = arith.constant 1.000000e+00 : f32
    %98 = vector.broadcast %cst_32 : f32 to vector<32x1xf32>
    %99 = arith.addf %98, %97 : vector<32x1xf32>
    %100 = arith.mulf %94, %99 : vector<32x1xf32>
    %101 = vector.extract_strided_slice %22 {offsets = [0, 3], sizes = [1, 1], strides = [1, 1]} : vector<1x4xf32> to vector<1x1xf32>
    %102 = vector.broadcast %101 : vector<1x1xf32> to vector<32x1xf32>
    %103 = arith.mulf %100, %102 : vector<32x1xf32>
    %104 = arith.addf %84, %103 : vector<32x1xf32>
    %105 = arith.negf %104 : vector<32x1xf32>
    %106 = math.exp %105 : vector<32x1xf32>
    %cst_33 = arith.constant 1.000000e+00 : f32
    %107 = vector.broadcast %cst_33 : f32 to vector<32x1xf32>
    %108 = arith.addf %107, %106 : vector<32x1xf32>
    %109 = arith.divf %107, %108 : vector<32x1xf32>
    %c0_34 = arith.constant 0 : index
    %c0_35 = arith.constant 0 : index
    %110 = vector.load %arg8[%c0_34, %c0_35] : memref<1x64xf32, #tpu.memory_space<vmem>>, vector<1x64xf32>
    %111 = vector.broadcast %109 : vector<32x1xf32> to vector<32x64xf32>
    %112 = vector.broadcast %110 : vector<1x64xf32> to vector<32x64xf32>
    %113 = arith.mulf %111, %112 : vector<32x64xf32>
    %c0_36 = arith.constant 0 : index
    %c0_37 = arith.constant 0 : index
    %114 = vector.load %arg9[%c0_36, %c0_37] : memref<1x64xf32, #tpu.memory_space<vmem>>, vector<1x64xf32>
    %115 = vector.broadcast %114 : vector<1x64xf32> to vector<32x64xf32>
    %116 = arith.addf %113, %115 : vector<32x64xf32>
    %117 = arith.mulf %116, %19 : vector<32x64xf32>
    %c0_38 = arith.constant 0 : index
    %c0_39 = arith.constant 0 : index
    %118 = vector.load %arg10[%c0_38, %c0_39] : memref<32x64xf32, #tpu.memory_space<vmem>>, vector<32x64xf32>
    tpu.vector_store %arg10[%c0_38, %c0_39], %117 {strides = array<i32>} : memref<32x64xf32, #tpu.memory_space<vmem>>, vector<32x64xf32>,
    return
  }
  func.func @transform_0(%arg0: i32) -> (i32, i32) {
    %c0_i32 = arith.constant 0 : i32
    %c0_i32_0 = arith.constant 0 : i32
    return %arg0, %c0_i32 : i32, i32
  }
  func.func @transform_1(%arg0: i32) -> (i32, i32) {
    %c0_i32 = arith.constant 0 : i32
    %c0_i32_0 = arith.constant 0 : i32
    %c0_i32_1 = arith.constant 0 : i32
    return %c0_i32, %c0_i32_0 : i32, i32
  }
  func.func @transform_2(%arg0: i32) -> (i32, i32) {
    %c0_i32 = arith.constant 0 : i32
    %c0_i32_0 = arith.constant 0 : i32
    %c0_i32_1 = arith.constant 0 : i32
    return %c0_i32, %c0_i32_0 : i32, i32
  }
  func.func @transform_3(%arg0: i32) -> (i32, i32) {
    %c0_i32 = arith.constant 0 : i32
    %c0_i32_0 = arith.constant 0 : i32
    %c0_i32_1 = arith.constant 0 : i32
    return %c0_i32, %c0_i32_0 : i32, i32
  }
  func.func @transform_4(%arg0: i32) -> (i32, i32) {
    %c0_i32 = arith.constant 0 : i32
    %c0_i32_0 = arith.constant 0 : i32
    %c0_i32_1 = arith.constant 0 : i32
    return %c0_i32, %c0_i32_0 : i32, i32
  }
  func.func @transform_5(%arg0: i32) -> (i32, i32) {
    %c0_i32 = arith.constant 0 : i32
    %c0_i32_0 = arith.constant 0 : i32
    %c0_i32_1 = arith.constant 0 : i32
    return %c0_i32, %c0_i32_0 : i32, i32
  }
  func.func @transform_6(%arg0: i32) -> (i32, i32) {
    %c0_i32 = arith.constant 0 : i32
    %c0_i32_0 = arith.constant 0 : i32
    %c0_i32_1 = arith.constant 0 : i32
    return %c0_i32, %c0_i32_0 : i32, i32
  }
  func.func @transform_7(%arg0: i32) -> (i32, i32) {
    %c0_i32 = arith.constant 0 : i32
    %c0_i32_0 = arith.constant 0 : i32
    %c0_i32_1 = arith.constant 0 : i32
    return %c0_i32, %c0_i32_0 : i32, i32
  }
  func.func @transform_8(%arg0: i32) -> (i32, i32) {
    %c0_i32 = arith.constant 0 : i32
    %c0_i32_0 = arith.constant 0 : i32
    %c0_i32_1 = arith.constant 0 : i32
    return %c0_i32, %c0_i32_0 : i32, i32
  }
  func.func @transform_9(%arg0: i32) -> (i32, i32) {
    %c0_i32 = arith.constant 0 : i32
    %c0_i32_0 = arith.constant 0 : i32
    return %arg0, %c0_i32 : i32, i32
  }
}

module attributes {stable_mosaic.version = 11 : i64} {
  func.func @_mm_kernel(%arg0: i32, %arg1: memref<32x576xbf16, #tpu.memory_space<vmem>>, %arg2: memref<576x64xbf16, #tpu.memory_space<vmem>>, %arg3: memref<1x64xf32, #tpu.memory_space<vmem>>, %arg4: memref<32x64xf32, #tpu.memory_space<vmem>>) attributes {dimension_semantics = [#tpu.dimension_semantics<parallel>], iteration_bounds = array<i64: 1>, scalar_prefetch = 0 : i64, scratch_operands = 0 : i64, tpu.core_type = #tpu.core_type<tc>, window_params = [{transform_indices = @transform_0, window_bounds = array<i64: 32, 576>}, {pipeline_mode = #tpu.pipeline_mode<synchronous>, transform_indices = @transform_1, window_bounds = array<i64: 576, 64>}, {pipeline_mode = #tpu.pipeline_mode<synchronous>, transform_indices = @transform_2, window_bounds = array<i64: 1, 64>}, {transform_indices = @transform_3, window_bounds = array<i64: 32, 64>}]} {
    %c0 = arith.constant 0 : index
    %c0_0 = arith.constant 0 : index
    %0 = vector.load %arg1[%c0, %c0_0] : memref<32x576xbf16, #tpu.memory_space<vmem>>, vector<32x576xbf16>
    %c0_1 = arith.constant 0 : index
    %c0_2 = arith.constant 0 : index
    %1 = vector.load %arg2[%c0_1, %c0_2] : memref<576x64xbf16, #tpu.memory_space<vmem>>, vector<576x64xbf16>
    %cst = arith.constant dense<0.000000e+00> : vector<32x64xf32>
    %2 = tpu.matmul %0, %1, %cst {dimension_numbers = #tpu.dot_dimension_numbers<[1], [0], [0], [1], [0, 0, 1, 1], [], []>} : vector<32x576xbf16>, vector<576x64xbf16>, vector<32x64xf32> -> vector<32x64xf32>
    %c0_3 = arith.constant 0 : index
    %c0_4 = arith.constant 0 : index
    %3 = vector.load %arg3[%c0_3, %c0_4] : memref<1x64xf32, #tpu.memory_space<vmem>>, vector<1x64xf32>
    %4 = vector.broadcast %3 : vector<1x64xf32> to vector<32x64xf32>
    %5 = arith.addf %2, %4 : vector<32x64xf32>
    %cst_5 = arith.constant 0.000000e+00 : f32
    %6 = vector.broadcast %cst_5 : f32 to vector<32x64xf32>
    %7 = arith.maximumf %5, %6 : vector<32x64xf32>
    %c0_6 = arith.constant 0 : index
    %c0_7 = arith.constant 0 : index
    %8 = vector.load %arg4[%c0_6, %c0_7] : memref<32x64xf32, #tpu.memory_space<vmem>>, vector<32x64xf32>
    tpu.vector_store %arg4[%c0_6, %c0_7], %7 {strides = array<i32>} : memref<32x64xf32, #tpu.memory_space<vmem>>, vector<32x64xf32>,
    return
  }
  func.func @transform_0(%arg0: i32) -> (i32, i32) {
    %c0_i32 = arith.constant 0 : i32
    %c0_i32_0 = arith.constant 0 : i32
    return %arg0, %c0_i32 : i32, i32
  }
  func.func @transform_1(%arg0: i32) -> (i32, i32) {
    %c0_i32 = arith.constant 0 : i32
    %c0_i32_0 = arith.constant 0 : i32
    %c0_i32_1 = arith.constant 0 : i32
    return %c0_i32, %c0_i32_0 : i32, i32
  }
  func.func @transform_2(%arg0: i32) -> (i32, i32) {
    %c0_i32 = arith.constant 0 : i32
    %c0_i32_0 = arith.constant 0 : i32
    %c0_i32_1 = arith.constant 0 : i32
    return %c0_i32, %c0_i32_0 : i32, i32
  }
  func.func @transform_3(%arg0: i32) -> (i32, i32) {
    %c0_i32 = arith.constant 0 : i32
    %c0_i32_0 = arith.constant 0 : i32
    return %arg0, %c0_i32 : i32, i32
  }
}

module attributes {stable_mosaic.version = 11 : i64} {
  func.func @_mm_kernel(%arg0: i32, %arg1: memref<32x576xbf16, #tpu.memory_space<vmem>>, %arg2: memref<576x64xbf16, #tpu.memory_space<vmem>>, %arg3: memref<1x64xf32, #tpu.memory_space<vmem>>, %arg4: memref<32x64xf32, #tpu.memory_space<vmem>>, %arg5: memref<32x64xf32, #tpu.memory_space<vmem>>) attributes {dimension_semantics = [#tpu.dimension_semantics<parallel>], iteration_bounds = array<i64: 1>, scalar_prefetch = 0 : i64, scratch_operands = 0 : i64, tpu.core_type = #tpu.core_type<tc>, window_params = [{transform_indices = @transform_0, window_bounds = array<i64: 32, 576>}, {pipeline_mode = #tpu.pipeline_mode<synchronous>, transform_indices = @transform_1, window_bounds = array<i64: 576, 64>}, {pipeline_mode = #tpu.pipeline_mode<synchronous>, transform_indices = @transform_2, window_bounds = array<i64: 1, 64>}, {transform_indices = @transform_3, window_bounds = array<i64: 32, 64>}, {transform_indices = @transform_4, window_bounds = array<i64: 32, 64>}]} {
    %c0 = arith.constant 0 : index
    %c0_0 = arith.constant 0 : index
    %0 = vector.load %arg1[%c0, %c0_0] : memref<32x576xbf16, #tpu.memory_space<vmem>>, vector<32x576xbf16>
    %c0_1 = arith.constant 0 : index
    %c0_2 = arith.constant 0 : index
    %1 = vector.load %arg2[%c0_1, %c0_2] : memref<576x64xbf16, #tpu.memory_space<vmem>>, vector<576x64xbf16>
    %cst = arith.constant dense<0.000000e+00> : vector<32x64xf32>
    %2 = tpu.matmul %0, %1, %cst {dimension_numbers = #tpu.dot_dimension_numbers<[1], [0], [0], [1], [0, 0, 1, 1], [], []>} : vector<32x576xbf16>, vector<576x64xbf16>, vector<32x64xf32> -> vector<32x64xf32>
    %c0_3 = arith.constant 0 : index
    %c0_4 = arith.constant 0 : index
    %3 = vector.load %arg3[%c0_3, %c0_4] : memref<1x64xf32, #tpu.memory_space<vmem>>, vector<1x64xf32>
    %4 = vector.broadcast %3 : vector<1x64xf32> to vector<32x64xf32>
    %5 = arith.addf %2, %4 : vector<32x64xf32>
    %c0_5 = arith.constant 0 : index
    %c0_6 = arith.constant 0 : index
    %6 = vector.load %arg4[%c0_5, %c0_6] : memref<32x64xf32, #tpu.memory_space<vmem>>, vector<32x64xf32>
    %7 = arith.addf %5, %6 : vector<32x64xf32>
    %c0_7 = arith.constant 0 : index
    %c0_8 = arith.constant 0 : index
    %8 = vector.load %arg5[%c0_7, %c0_8] : memref<32x64xf32, #tpu.memory_space<vmem>>, vector<32x64xf32>
    tpu.vector_store %arg5[%c0_7, %c0_8], %7 {strides = array<i32>} : memref<32x64xf32, #tpu.memory_space<vmem>>, vector<32x64xf32>,
    return
  }
  func.func @transform_0(%arg0: i32) -> (i32, i32) {
    %c0_i32 = arith.constant 0 : i32
    %c0_i32_0 = arith.constant 0 : i32
    return %arg0, %c0_i32 : i32, i32
  }
  func.func @transform_1(%arg0: i32) -> (i32, i32) {
    %c0_i32 = arith.constant 0 : i32
    %c0_i32_0 = arith.constant 0 : i32
    %c0_i32_1 = arith.constant 0 : i32
    return %c0_i32, %c0_i32_0 : i32, i32
  }
  func.func @transform_2(%arg0: i32) -> (i32, i32) {
    %c0_i32 = arith.constant 0 : i32
    %c0_i32_0 = arith.constant 0 : i32
    %c0_i32_1 = arith.constant 0 : i32
    return %c0_i32, %c0_i32_0 : i32, i32
  }
  func.func @transform_3(%arg0: i32) -> (i32, i32) {
    %c0_i32 = arith.constant 0 : i32
    %c0_i32_0 = arith.constant 0 : i32
    return %arg0, %c0_i32 : i32, i32
  }
  func.func @transform_4(%arg0: i32) -> (i32, i32) {
    %c0_i32 = arith.constant 0 : i32
    %c0_i32_0 = arith.constant 0 : i32
    return %arg0, %c0_i32 : i32, i32
  }
}

module attributes {stable_mosaic.version = 11 : i64} {
  func.func @_mm_kernel(%arg0: i32, %arg1: memref<128x576xbf16, #tpu.memory_space<vmem>>, %arg2: memref<576x64xbf16, #tpu.memory_space<vmem>>, %arg3: memref<1x64xf32, #tpu.memory_space<vmem>>, %arg4: memref<128x64xf32, #tpu.memory_space<vmem>>) attributes {dimension_semantics = [#tpu.dimension_semantics<parallel>], iteration_bounds = array<i64: 1>, scalar_prefetch = 0 : i64, scratch_operands = 0 : i64, tpu.core_type = #tpu.core_type<tc>, window_params = [{transform_indices = @transform_0, window_bounds = array<i64: 128, 576>}, {pipeline_mode = #tpu.pipeline_mode<synchronous>, transform_indices = @transform_1, window_bounds = array<i64: 576, 64>}, {pipeline_mode = #tpu.pipeline_mode<synchronous>, transform_indices = @transform_2, window_bounds = array<i64: 1, 64>}, {transform_indices = @transform_3, window_bounds = array<i64: 128, 64>}]} {
    %c0 = arith.constant 0 : index
    %c0_0 = arith.constant 0 : index
    %0 = vector.load %arg1[%c0, %c0_0] : memref<128x576xbf16, #tpu.memory_space<vmem>>, vector<128x576xbf16>
    %c0_1 = arith.constant 0 : index
    %c0_2 = arith.constant 0 : index
    %1 = vector.load %arg2[%c0_1, %c0_2] : memref<576x64xbf16, #tpu.memory_space<vmem>>, vector<576x64xbf16>
    %cst = arith.constant dense<0.000000e+00> : vector<128x64xf32>
    %2 = tpu.matmul %0, %1, %cst {dimension_numbers = #tpu.dot_dimension_numbers<[1], [0], [0], [1], [0, 0, 1, 1], [], []>} : vector<128x576xbf16>, vector<576x64xbf16>, vector<128x64xf32> -> vector<128x64xf32>
    %c0_3 = arith.constant 0 : index
    %c0_4 = arith.constant 0 : index
    %3 = vector.load %arg3[%c0_3, %c0_4] : memref<1x64xf32, #tpu.memory_space<vmem>>, vector<1x64xf32>
    %4 = vector.broadcast %3 : vector<1x64xf32> to vector<128x64xf32>
    %5 = arith.addf %2, %4 : vector<128x64xf32>
    %cst_5 = arith.constant 0.000000e+00 : f32
    %6 = vector.broadcast %cst_5 : f32 to vector<128x64xf32>
    %7 = arith.maximumf %5, %6 : vector<128x64xf32>
    %c0_6 = arith.constant 0 : index
    %c0_7 = arith.constant 0 : index
    %8 = vector.load %arg4[%c0_6, %c0_7] : memref<128x64xf32, #tpu.memory_space<vmem>>, vector<128x64xf32>
    tpu.vector_store %arg4[%c0_6, %c0_7], %7 {strides = array<i32>} : memref<128x64xf32, #tpu.memory_space<vmem>>, vector<128x64xf32>,
    return
  }
  func.func @transform_0(%arg0: i32) -> (i32, i32) {
    %c0_i32 = arith.constant 0 : i32
    %c0_i32_0 = arith.constant 0 : i32
    return %arg0, %c0_i32 : i32, i32
  }
  func.func @transform_1(%arg0: i32) -> (i32, i32) {
    %c0_i32 = arith.constant 0 : i32
    %c0_i32_0 = arith.constant 0 : i32
    %c0_i32_1 = arith.constant 0 : i32
    return %c0_i32, %c0_i32_0 : i32, i32
  }
  func.func @transform_2(%arg0: i32) -> (i32, i32) {
    %c0_i32 = arith.constant 0 : i32
    %c0_i32_0 = arith.constant 0 : i32
    %c0_i32_1 = arith.constant 0 : i32
    return %c0_i32, %c0_i32_0 : i32, i32
  }
  func.func @transform_3(%arg0: i32) -> (i32, i32) {
    %c0_i32 = arith.constant 0 : i32
    %c0_i32_0 = arith.constant 0 : i32
    return %arg0, %c0_i32 : i32, i32
  }
}

module attributes {stable_mosaic.version = 11 : i64} {
  func.func @_mm_kernel(%arg0: i32, %arg1: memref<256x576xbf16, #tpu.memory_space<vmem>>, %arg2: memref<576x3xbf16, #tpu.memory_space<vmem>>, %arg3: memref<1x3xf32, #tpu.memory_space<vmem>>, %arg4: memref<256x3xf32, #tpu.memory_space<vmem>>) attributes {dimension_semantics = [#tpu.dimension_semantics<parallel>], iteration_bounds = array<i64: 2>, scalar_prefetch = 0 : i64, scratch_operands = 0 : i64, tpu.core_type = #tpu.core_type<tc>, window_params = [{transform_indices = @transform_0, window_bounds = array<i64: 256, 576>}, {pipeline_mode = #tpu.pipeline_mode<synchronous>, transform_indices = @transform_1, window_bounds = array<i64: 576, 3>}, {pipeline_mode = #tpu.pipeline_mode<synchronous>, transform_indices = @transform_2, window_bounds = array<i64: 1, 3>}, {transform_indices = @transform_3, window_bounds = array<i64: 256, 3>}]} {
    %c0 = arith.constant 0 : index
    %c0_0 = arith.constant 0 : index
    %0 = vector.load %arg1[%c0, %c0_0] : memref<256x576xbf16, #tpu.memory_space<vmem>>, vector<256x576xbf16>
    %c0_1 = arith.constant 0 : index
    %c0_2 = arith.constant 0 : index
    %1 = vector.load %arg2[%c0_1, %c0_2] : memref<576x3xbf16, #tpu.memory_space<vmem>>, vector<576x3xbf16>
    %cst = arith.constant dense<0.000000e+00> : vector<256x3xf32>
    %2 = tpu.matmul %0, %1, %cst {dimension_numbers = #tpu.dot_dimension_numbers<[1], [0], [0], [1], [0, 0, 1, 1], [], []>} : vector<256x576xbf16>, vector<576x3xbf16>, vector<256x3xf32> -> vector<256x3xf32>
    %c0_3 = arith.constant 0 : index
    %c0_4 = arith.constant 0 : index
    %3 = vector.load %arg3[%c0_3, %c0_4] : memref<1x3xf32, #tpu.memory_space<vmem>>, vector<1x3xf32>
    %4 = vector.broadcast %3 : vector<1x3xf32> to vector<256x3xf32>
    %5 = arith.addf %2, %4 : vector<256x3xf32>
    %6 = math.tanh %5 : vector<256x3xf32>
    %c0_5 = arith.constant 0 : index
    %c0_6 = arith.constant 0 : index
    %7 = vector.load %arg4[%c0_5, %c0_6] : memref<256x3xf32, #tpu.memory_space<vmem>>, vector<256x3xf32>
    tpu.vector_store %arg4[%c0_5, %c0_6], %6 {strides = array<i32>} : memref<256x3xf32, #tpu.memory_space<vmem>>, vector<256x3xf32>,
    return
  }
  func.func @transform_0(%arg0: i32) -> (i32, i32) {
    %c0_i32 = arith.constant 0 : i32
    %c0_i32_0 = arith.constant 0 : i32
    return %arg0, %c0_i32 : i32, i32
  }
  func.func @transform_1(%arg0: i32) -> (i32, i32) {
    %c0_i32 = arith.constant 0 : i32
    %c0_i32_0 = arith.constant 0 : i32
    %c0_i32_1 = arith.constant 0 : i32
    return %c0_i32, %c0_i32_0 : i32, i32
  }
  func.func @transform_2(%arg0: i32) -> (i32, i32) {
    %c0_i32 = arith.constant 0 : i32
    %c0_i32_0 = arith.constant 0 : i32
    %c0_i32_1 = arith.constant 0 : i32
    return %c0_i32, %c0_i32_0 : i32, i32
  }
  func.func @transform_3(%arg0: i32) -> (i32, i32) {
    %c0_i32 = arith.constant 0 : i32
    %c0_i32_0 = arith.constant 0 : i32
    return %arg0, %c0_i32 : i32, i32
  }
}

</mosaic_0001>

<bundles_post_ra>
// kernel: teacher_forward.9
= control target key start
LH: loop header
LB: loop body
LE: loop exit
PB: predicated region body
PF: predicated region fallthrough
CT: control target
= control target key end

     0   :  { %vm115_vm0 = vcmask 1044480   ;;  %vm116_vm1 = vcmask 1045504   ;;  %v274_v2 = vmov 65535   ;;  %vm90_vm2 = vcmask 220160   ;;  %s403_s1 = inlined_call_operand.vmem [shape: bf16[27,64], index: 1, kind: input, shape index: {}]   ;;  %s404_s2 = inlined_call_operand.vmem [shape: f32[1,64], index: 2, kind: input, shape index: {}]   ;;  %s405_s0 = inlined_call_operand.vmem [shape: bf16[128,27], index: 0, kind: input, shape index: {}]   ;;  %s406_s3 = inlined_call_operand.vmem [shape: f32[128,64], index: 3, kind: output, shape index: {}]  }
   0x1   :  { %v246_v0 = vld [vmem:[%s403_s1 + $0x8] sm:$0xf]  ;;  %v265_v1 = vld [vmem:[%s403_s1 + $0x8] sm:$0x30]  ;;  %v117_v3 = vsel %vm115_vm0, 4294967295, %v274_v2  ;;  %v264_v7 = vld [vmem:[%s403_s1] sm:$0xff] }
   0x2   :  { %v247_v4 = vor.u32 %v265_v1, %v246_v0  ;;  %v118_v5 = vsel %vm116_vm1, %v117_v3, 0  ;;  %v256_v8 = vld [vmem:[%s405_s0] sm:$0xff]  ;;  %v258_v9 = vld [vmem:[%s405_s0 + $0x10] sm:$0xff]  ;;  %v257_v12 = vld [vmem:[%s405_s0 + $0x8] sm:$0xff]  ;;  %vm187_vm3 = vcmask 523264  }
   0x3   :  { %v260_v10 = vld [vmem:[%s405_s0 + $0x20] sm:$0xff]  ;;  %v262_v11 = vld [vmem:[%s405_s0 + $0x30] sm:$0xff]  ;;  %v259_v13 = vld [vmem:[%s405_s0 + $0x18] sm:$0xff] }
   0x4   :  { %v120_v6 = vand.u32 %v247_v4, %v118_v5  ;;  %v261_v14 = vld [vmem:[%s405_s0 + $0x28] sm:$0xff]  ;;  %v263_v15 = vld [vmem:[%s405_s0 + $0x38] sm:$0xff]  ;;  %v273_v16 = vld [vmem:[%s404_s2] ss:$0 sm:$0xff] }
   0x6   :  { %128 = vmatpush.bf16.msra.mxu0 %v120_v6  ;;  %266 = vmatpush.bf16.msra.mxu1 %v120_v6 }
   0x7   :  { %267 = vmatpush.bf16.msra.mxu2 %v120_v6  ;;  %268 = vmatpush.bf16.msra.mxu3 %v120_v6 }
   0xa   :  { %129 = vmatpush.bf16.msra.mxu0 %v264_v7  ;;  %269 = vmatpush.bf16.msra.mxu1 %v264_v7 }
   0xb   :  { %270 = vmatpush.bf16.msra.mxu2 %v264_v7  ;;  %271 = vmatpush.bf16.msra.mxu3 %v264_v7 }
   0xd   :  { %248 = vmatmul.msk.bf16.vlgmr.msra.gmra.mxu0 %vm90_vm2, %v256_v8  ;;  %250 = vmatmul.msk.bf16.vlgmr.msra.gmra.mxu1 %vm90_vm2, %v258_v9 }
   0xe   :  { %252 = vmatmul.msk.bf16.vlgmr.msra.gmra.mxu2 %vm90_vm2, %v260_v10  ;;  %254 = vmatmul.msk.bf16.vlgmr.msra.gmra.mxu3 %vm90_vm2, %v262_v11 }
  0x1d   :  { %249 = vmatmul.msk.bf16.gmra.mxu0 %vm90_vm2, %v257_v12  ;;  %251 = vmatmul.msk.bf16.gmra.mxu1 %vm90_vm2, %v259_v13 }
  0x1e   :  { %253 = vmatmul.msk.bf16.gmra.mxu2 %vm90_vm2, %v261_v14  ;;  %255 = vmatmul.msk.bf16.gmra.mxu3 %vm90_vm2, %v263_v15 }
  0x8a   :  { %v131_v17 = vpop.f32.mrf.mxu0  ;;  %v141_v18 = vpop.f32.mrf.mxu1 }
  0x8b   :  { %v132_v19 = vadd.f32 %v273_v16, %v131_v17  ;;  %v142_v20 = vadd.f32 %v273_v16, %v141_v18 }
  0x8d   :  { %v171_v21 = vmax.f32 %v132_v19, 0.0  ;;  %v175_v22 = vmax.f32 %v142_v20, 0.0 }
  0x8f   :  { %188 = vst.msk [vmem:[%s406_s3] sm:$0xff] %vm187_vm3, %v171_v21 }
  0x90   :  { %192 = vst.msk [vmem:[%s406_s3 + $0x20] sm:$0xff] %vm187_vm3, %v175_v22 }
  0x91   :  { %v151_v23 = vpop.f32.mrf.mxu2  ;;  %v161_v24 = vpop.f32.mrf.mxu3 }
  0x92   :  { %v152_v25 = vadd.f32 %v273_v16, %v151_v23  ;;  %v162_v26 = vadd.f32 %v273_v16, %v161_v24  ;;  %v133_v27 = vpop.f32.mrf.mxu0  ;;  %v143_v28 = vpop.f32.mrf.mxu1 }
  0x93   :  { %v134_v29 = vadd.f32 %v273_v16, %v133_v27  ;;  %v144_v30 = vadd.f32 %v273_v16, %v143_v28 }
  0x94   :  { %v179_v31 = vmax.f32 %v152_v25, 0.0  ;;  %v183_v32 = vmax.f32 %v162_v26, 0.0 }
  0x95   :  { %v172_v33 = vmax.f32 %v134_v29, 0.0  ;;  %v176_v34 = vmax.f32 %v144_v30, 0.0 }
  0x96   :  { %196 = vst.msk [vmem:[%s406_s3 + $0x40] sm:$0xff] %vm187_vm3, %v179_v31 }
  0x97   :  { %200 = vst.msk [vmem:[%s406_s3 + $0x60] sm:$0xff] %vm187_vm3, %v183_v32 }
  0x98   :  { %189 = vst.msk [vmem:[%s406_s3 + $0x8] sm:$0xff] %vm187_vm3, %v172_v33 }
  0x99   :  { %193 = vst.msk [vmem:[%s406_s3 + $0x28] sm:$0xff] %vm187_vm3, %v176_v34  ;;  %v153_v35 = vpop.f32.mrf.mxu2  ;;  %v163_v36 = vpop.f32.mrf.mxu3 }
  0x9a   :  { %v154_v37 = vadd.f32 %v273_v16, %v153_v35  ;;  %v164_v38 = vadd.f32 %v273_v16, %v163_v36  ;;  %v136_v39 = vpop.f32.mrf.mxu0  ;;  %v146_v40 = vpop.f32.mrf.mxu1 }
  0x9b   :  { %v137_v41 = vadd.f32 %v273_v16, %v136_v39  ;;  %v147_v42 = vadd.f32 %v273_v16, %v146_v40 }
  0x9c   :  { %v180_v43 = vmax.f32 %v154_v37, 0.0  ;;  %v184_v44 = vmax.f32 %v164_v38, 0.0 }
  0x9d   :  { %v173_v45 = vmax.f32 %v137_v41, 0.0  ;;  %v177_v46 = vmax.f32 %v147_v42, 0.0 }
  0x9e   :  { %197 = vst.msk [vmem:[%s406_s3 + $0x48] sm:$0xff] %vm187_vm3, %v180_v43 }
  0x9f   :  { %201 = vst.msk [vmem:[%s406_s3 + $0x68] sm:$0xff] %vm187_vm3, %v184_v44 }
  0xa0   :  { %190 = vst.msk [vmem:[%s406_s3 + $0x10] sm:$0xff] %vm187_vm3, %v173_v45 }
  0xa1   :  { %194 = vst.msk [vmem:[%s406_s3 + $0x30] sm:$0xff] %vm187_vm3, %v177_v46  ;;  %v156_v47 = vpop.f32.mrf.mxu2  ;;  %v166_v48 = vpop.f32.mrf.mxu3 }
  0xa2   :  { %v157_v49 = vadd.f32 %v273_v16, %v156_v47  ;;  %v167_v50 = vadd.f32 %v273_v16, %v166_v48  ;;  %v138_v51 = vpop.f32.mrf.mxu0  ;;  %v148_v52 = vpop.f32.mrf.mxu1 }
  0xa3   :  { %v139_v53 = vadd.f32 %v273_v16, %v138_v51  ;;  %v149_v54 = vadd.f32 %v273_v16, %v148_v52 }
  0xa4   :  { %v181_v55 = vmax.f32 %v157_v49, 0.0  ;;  %v185_v56 = vmax.f32 %v167_v50, 0.0 }
  0xa5   :  { %v174_v57 = vmax.f32 %v139_v53, 0.0  ;;  %v178_v58 = vmax.f32 %v149_v54, 0.0 }
  0xa6   :  { %198 = vst.msk [vmem:[%s406_s3 + $0x50] sm:$0xff] %vm187_vm3, %v181_v55 }
  0xa7   :  { %202 = vst.msk [vmem:[%s406_s3 + $0x70] sm:$0xff] %vm187_vm3, %v185_v56 }
  0xa8   :  { %191 = vst.msk [vmem:[%s406_s3 + $0x18] sm:$0xff] %vm187_vm3, %v174_v57 }
  0xa9   :  { %195 = vst.msk [vmem:[%s406_s3 + $0x38] sm:$0xff] %vm187_vm3, %v178_v58  ;;  %v158_v59 = vpop.f32.mrf.mxu2  ;;  %v168_v60 = vpop.f32.mrf.mxu3 }
  0xaa   :  { %v159_v61 = vadd.f32 %v273_v16, %v158_v59  ;;  %v169_v62 = vadd.f32 %v273_v16, %v168_v60 }
  0xac   :  { %v182_v63 = vmax.f32 %v159_v61, 0.0  ;;  %v186_v0 = vmax.f32 %v169_v62, 0.0 }
  0xae   :  { %199 = vst.msk [vmem:[%s406_s3 + $0x58] sm:$0xff] %vm187_vm3, %v182_v63 }
  0xaf   :  { %203 = vst.msk [vmem:[%s406_s3 + $0x78] sm:$0xff] %vm187_vm3, %v186_v0 }

// kernel: teacher_forward.11
= control target key start
LH: loop header
LB: loop body
LE: loop exit
PB: predicated region body
PF: predicated region fallthrough
CT: control target
= control target key end

     0   :  { %vm57_vm0 = vcmask 523264   ;;  %s1399_s15 = smov 127   ;;  %s1400_s16 = smov 126   ;;  %s2524_s0 = inlined_call_operand.vmem [shape: f32[32,64], index: 0, kind: input, shape index: {}]   ;;  %s2525_s3 = inlined_call_operand.vmem [shape: f32[4,64], index: 3, kind: input, shape index: {}]   ;;  %s2526_s1 = inlined_call_operand.vmem [shape: f32[64,64], index: 1, kind: input, shape index: {}]   ;;  %s2527_s4 = inlined_call_operand.vmem [shape: f32[1,4], index: 4, kind: input, shape index: {}]   ;;  %s2528_s5 = inlined_call_operand.vmem [shape: f32[1,4], index: 5, kind: input, shape index: {}]   ;;  %s2529_s2 = inlined_call_operand.vmem [shape: f32[1,64], index: 2, kind: input, shape index: {}]   ;;  %s2530_s6 = inlined_call_operand.<no memory space> [shape: f32[1,1], index: 6, kind: input, shape index: {}]   ;;  %s2531_s7 = inlined_call_operand.vmem [shape: f32[1,64], index: 7, kind: input, shape index: {}]   ;;  %s2532_s8 = inlined_call_operand.vmem [shape: f32[1,64], index: 8, kind: input, shape index: {}]   ;;  %s2533_s9 = inlined_call_operand.vmem [shape: f32[32,64], index: 9, kind: output, shape index: {}]  }
   0x1   :  { %v1456_v0 = vld [vmem:[%s2524_s0 + $0x10] sm:$0xff]  ;;  %v1461_v1 = vld [vmem:[%s2525_s3] sm:$0xf]  ;;  %v1476_v8 = vld [vmem:[%s2524_s0 + $0x18] sm:$0xff]  ;;  %s1401_s3 = smov 125  }
   0x2   :  { %v1466_v2 = vld [vmem:[%s2524_s0] sm:$0xff]  ;;  %v504_v3 = vperm.slane %v1461_v1, 1  ;;  %v725_v4 = vperm.slane %v1461_v1, 2  ;;  %v1481_v9 = vld [vmem:[%s2524_s0 + $0x8] sm:$0xff]  ;;  %v45_v13 = vld [vmem:[%s2526_s1 + $0x30] sm:$0xff]  ;;  %v946_v23 = vperm.slane %v1461_v1, 3  ;;  %v53_v38 = vpack.c.bf16 %v1476_v8, %v1456_v0 }
   0x3   :  { %v46_v14 = vld [vmem:[%s2526_s1 + $0x38] sm:$0xff]  ;;  %v43_v19 = vld [vmem:[%s2526_s1 + $0x20] sm:$0xff]  ;;  %v44_v20 = vld [vmem:[%s2526_s1 + $0x28] sm:$0xff]  ;;  %v52_v41 = vpack.c.bf16 %v1481_v9, %v1466_v2  ;;  %v290_v45 = vperm.slane %v1461_v1, 0 }
   0x4   :  { %v507_v5 = vmul.f32 %v504_v3, %v1456_v0  ;;  %v726_v6 = vmul.f32 %v725_v4, %v1466_v2  ;;  %v505_v7 = vmul.f32 %v504_v3, %v1466_v2  ;;  %v508_v15 = vmul.f32 %v504_v3, %v1476_v8  ;;  %v41_v26 = vld [vmem:[%s2526_s1 + $0x10] sm:$0xff]  ;;  %v42_v27 = vld [vmem:[%s2526_s1 + $0x18] sm:$0xff]  ;;  %v39_v32 = vld [vmem:[%s2526_s1] sm:$0xff] }
   0x5   :  { %v727_v16 = vmul.f32 %v725_v4, %v1481_v9  ;;  %v506_v17 = vmul.f32 %v504_v3, %v1481_v9  ;;  %v50_v18 = vpack.c.bf16 %v46_v14, %v45_v13  ;;  %v49_v24 = vpack.c.bf16 %v44_v20, %v43_v19  ;;  %v40_v33 = vld [vmem:[%s2526_s1 + $0x8] sm:$0xff]  ;;  %v1547_v55 = vld [vmem:[%s2527_s4] ss:$0 sm:$0xff] }
   0x6   :  { %v515_v10 = vsel %vm57_vm0, %v507_v5, 0.0  ;;  %v730_v11 = vsel %vm57_vm0, %v726_v6, 0.0  ;;  %v509_v12 = vsel %vm57_vm0, %v505_v7, 0.0  ;;  %v518_v21 = vsel %vm57_vm0, %v508_v15, 0.0 }
   0x7   :  { %516 = vadd.xlane.f32.xlu1 %v515_v10  ;;  %731 = vadd.xlane.f32.xlu2 %v730_v11  ;;  %v733_v22 = vsel %vm57_vm0, %v727_v16, 0.0  ;;  %v512_v25 = vsel %vm57_vm0, %v506_v17, 0.0  ;;  %v729_v28 = vmul.f32 %v725_v4, %v1476_v8  ;;  %v947_v29 = vmul.f32 %v946_v23, %v1466_v2 }
   0x8   :  { %510 = vadd.xlane.f32.xlu0 %v509_v12  ;;  %1319 = vmatpush.bf16.msra.mxu2 %v50_v18  ;;  %v48_v30 = vpack.c.bf16 %v42_v27, %v41_v26  ;;  %v728_v31 = vmul.f32 %v725_v4, %v1456_v0  ;;  %v47_v36 = vpack.c.bf16 %v40_v33, %v39_v32 }
   0x9   :  { %68 = vmatpush.bf16.msra.mxu0 %v50_v18  ;;  %1323 = vmatpush.bf16.msra.mxu3 %v50_v18  ;;  %v739_v34 = vsel %vm57_vm0, %v729_v28, 0.0  ;;  %v951_v35 = vsel %vm57_vm0, %v947_v29, 0.0  ;;  %v949_v39 = vmul.f32 %v946_v23, %v1456_v0  ;;  %v950_v40 = vmul.f32 %v946_v23, %v1476_v8 }
   0xa   :  { %271 = vmatpush.bf16.msra.mxu1 %v50_v18  ;;  %v736_v37 = vsel %vm57_vm0, %v728_v31, 0.0  ;;  %v948_v42 = vmul.f32 %v946_v23, %v1481_v9  ;;  %v292_v47 = vmul.f32 %v290_v45, %v1481_v9  ;;  %v293_v48 = vmul.f32 %v290_v45, %v1456_v0 }
   0xb   :  { %v957_v43 = vsel %vm57_vm0, %v949_v39, 0.0  ;;  %v960_v44 = vsel %vm57_vm0, %v950_v40, 0.0  ;;  %v291_v49 = vmul.f32 %v290_v45, %v1466_v2  ;;  %v294_v53 = vmul.f32 %v290_v45, %v1476_v8 }
   0xc   :  { %1320 = vmatpush.bf16.msra.mxu2 %v49_v24  ;;  %v954_v46 = vsel %vm57_vm0, %v948_v42, 0.0  ;;  %v298_v50 = vsel %vm57_vm0, %v292_v47, 0.0  ;;  %v301_v51 = vsel %vm57_vm0, %v293_v48, 0.0 }
   0xd   :  { %69 = vmatpush.bf16.msra.mxu0 %v49_v24  ;;  %1324 = vmatpush.bf16.msra.mxu3 %v49_v24  ;;  %v295_v52 = vsel %vm57_vm0, %v291_v49, 0.0  ;;  %v304_v54 = vsel %vm57_vm0, %v294_v53, 0.0 }
   0xe   :  { %272 = vmatpush.bf16.msra.mxu1 %v49_v24 }
   0xf   :  { %519 = vadd.xlane.f32.xlu1 %v518_v21  ;;  %734 = vadd.xlane.f32.xlu2 %v733_v22 }
  0x10   :  { %513 = vadd.xlane.f32.xlu0 %v512_v25  ;;  %1321 = vmatpush.bf16.msra.mxu2 %v48_v30 }
  0x11   :  { %70 = vmatpush.bf16.msra.mxu0 %v48_v30  ;;  %1325 = vmatpush.bf16.msra.mxu3 %v48_v30 }
  0x12   :  { %273 = vmatpush.bf16.msra.mxu1 %v48_v30 }
  0x14   :  { %1322 = vmatpush.bf16.msra.mxu2 %v47_v36 }
  0x15   :  { %71 = vmatpush.bf16.msra.mxu0 %v47_v36  ;;  %1326 = vmatpush.bf16.msra.mxu3 %v47_v36 }
  0x16   :  { %274 = vmatpush.bf16.msra.mxu1 %v47_v36 }
  0x17   :  { %740 = vadd.xlane.f32.xlu1 %v739_v34  ;;  %952 = vadd.xlane.f32.xlu2 %v951_v35 }
  0x18   :  { %737 = vadd.xlane.f32.xlu0 %v736_v37  ;;  %1292 = vmatmul.msk.bf16.vlgmr.msra.gmra.mxu2 %vm57_vm0, %v53_v38 }
  0x19   :  { %1291 = vmatmul.msk.bf16.vlgmr.msra.gmra.mxu0 %vm57_vm0, %v52_v41 }
  0x1f   :  { %958 = vadd.xlane.f32.xlu1 %v957_v43  ;;  %961 = vadd.xlane.f32.xlu2 %v960_v44 }
  0x20   :  { %955 = vadd.xlane.f32.xlu0 %v954_v46 }
  0x27   :  { %299 = vadd.xlane.f32.xlu1 %v298_v50  ;;  %302 = vadd.xlane.f32.xlu2 %v301_v51 }
  0x28   :  { %296 = vadd.xlane.f32.xlu0 %v295_v52 }
  0x30   :  { %305 = vadd.xlane.f32.xlu0 %v304_v54 }
  0x7a   :  { %v517_v56 = vpop.xlane.xlu1 %516  ;;  %v732_v57 = vpop.xlane.xlu2 %731 }
  0x7b   :  { %v1550_v58 = vadd.f32 %v1547_v55, %v517_v56  ;;  %v1553_v59 = vadd.f32 %v1547_v55, %v732_v57  ;;  %v511_v60 = vpop.xlane.xlu0 %510 }
  0x7c   :  { %v1556_v61 = vadd.f32 %v1547_v55, %v511_v60 }
  0x7d   :  { %v1559_v62 = vmul.f32 0.70710677, %v1550_v58  ;;  %v1562_v63 = vmul.f32 0.70710677, %v1553_v59 }
  0x7e   :  { %v1565_v0 = vmul.f32 0.70710677, %v1556_v61 }
  0x7f   :  { %v613_v1 = vmul.f32 %v1559_v62, %v1559_v62  ;;  %v754_v2 = vmul.f32 %v1562_v63, %v1562_v63 }
  0x80   :  { %v533_v3 = vmul.f32 %v1565_v0, %v1565_v0 }
  0x81   :  { %v1573_v4 = vmin.f32 %v613_v1, 16.0  ;;  %v1575_v5 = vmin.f32 %v754_v2, 16.0 }
  0x82   :  { %v1577_v6 = vmin.f32 %v533_v3, 16.0  ;;  %v520_v7 = vpop.xlane.xlu1 %519  ;;  %v735_v56 = vpop.xlane.xlu2 %734 }
  0x83   :  { %v615_v8 = vmul.f32 2.1237322e-06, %v1573_v4  ;;  %v626_v9 = vmul.f32 3.8918573e-05, %v1573_v4  ;;  %v756_v10 = vmul.f32 2.1237322e-06, %v1575_v5  ;;  %v1586_v14 = vadd.f32 %v1547_v55, %v520_v7 }
  0x84   :  { %v767_v11 = vmul.f32 3.8918573e-05, %v1575_v5  ;;  %v535_v12 = vmul.f32 2.1237322e-06, %v1577_v6  ;;  %v546_v13 = vmul.f32 3.8918573e-05, %v1577_v6 }
  0x85   :  { %v616_v15 = vadd.f32 0.00028619796, %v615_v8  ;;  %v627_v16 = vadd.f32 0.001143296, %v626_v9  ;;  %v757_v17 = vadd.f32 0.00028619796, %v756_v10 }
  0x86   :  { %v768_v18 = vadd.f32 0.001143296, %v767_v11  ;;  %v536_v19 = vadd.f32 0.00028619796, %v535_v12  ;;  %v547_v20 = vadd.f32 0.001143296, %v546_v13  ;;  %v514_v13 = vpop.xlane.xlu0 %513 }
  0x87   :  { %v617_v21 = vmul.f32 %v616_v15, %v1573_v4  ;;  %v628_v22 = vmul.f32 %v627_v16, %v1573_v4  ;;  %v758_v23 = vmul.f32 %v757_v17, %v1575_v5  ;;  %v1595_v27 = vmul.f32 0.70710677, %v1586_v14 }
  0x88   :  { %v769_v24 = vmul.f32 %v768_v18, %v1575_v5  ;;  %v537_v25 = vmul.f32 %v536_v19, %v1577_v6  ;;  %v548_v26 = vmul.f32 %v547_v20, %v1577_v6  ;;  %v743_v19 = vadd.f32 %v1547_v55, %v735_v56 }
  0x89   :  { %v618_v28 = vadd.f32 0.0036580483, %v617_v21  ;;  %v629_v29 = vadd.f32 0.014752088, %v628_v22  ;;  %v759_v30 = vadd.f32 0.0036580483, %v758_v23  ;;  %v653_v33 = vmul.f32 %v1595_v27, %v1595_v27 }
  0x8a   :  { %v770_v31 = vadd.f32 0.014752088, %v769_v24  ;;  %v549_v32 = vadd.f32 0.014752088, %v548_v26  ;;  %v538_v36 = vadd.f32 0.0036580483, %v537_v25  ;;  %v1630_v21 = vadd.f32 %v1547_v55, %v514_v13  ;;  %v741_v26 = vpop.xlane.xlu1 %740 }
  0x8b   :  { %v619_v34 = vmul.f32 %v618_v28, %v1573_v4  ;;  %v630_v35 = vmul.f32 %v629_v29, %v1573_v4  ;;  %v1603_v39 = vmin.f32 %v653_v33, 16.0  ;;  %v760_v41 = vmul.f32 %v759_v30, %v1575_v5 }
  0x8c   :  { %v771_v37 = vmul.f32 %v770_v31, %v1575_v5  ;;  %v550_v38 = vmul.f32 %v549_v32, %v1577_v6  ;;  %v539_v46 = vmul.f32 %v538_v36, %v1577_v6  ;;  %v1634_v22 = vmul.f32 0.5, %v1550_v58  ;;  %v953_v32 = vpop.xlane.xlu2 %952 }
  0x8d   :  { %v631_v40 = vadd.f32 0.112945676, %v630_v35  ;;  %v620_v44 = vadd.f32 0.05243302, %v619_v34  ;;  %v655_v47 = vmul.f32 2.1237322e-06, %v1603_v39 }
  0x8e   :  { %v772_v42 = vadd.f32 0.112945676, %v771_v37  ;;  %v551_v43 = vadd.f32 0.112945676, %v550_v38  ;;  %v666_v50 = vmul.f32 3.8918573e-05, %v1603_v39  ;;  %v1662_v38 = vadd.f32 %v1547_v55, %v741_v26 }
  0x8f   :  { %v632_v45 = vmul.f32 %v631_v40, %v1573_v4  ;;  %v761_v52 = vadd.f32 0.05243302, %v760_v41  ;;  %v621_v57 = vmul.f32 %v620_v44, %v1573_v4  ;;  %v540_v1 = vadd.f32 0.05243302, %v539_v46 }
  0x90   :  { %v773_v48 = vmul.f32 %v772_v42, %v1575_v5  ;;  %v552_v49 = vmul.f32 %v551_v43, %v1577_v6  ;;  %v656_v2 = vadd.f32 0.00028619796, %v655_v47  ;;  %v667_v8 = vadd.f32 0.001143296, %v666_v50 }
  0x91   :  { %v633_v51 = vadd.f32 0.4994258, %v632_v45  ;;  %v762_v10 = vmul.f32 %v761_v52, %v1575_v5  ;;  %v622_v15 = vadd.f32 0.18741608, %v621_v57  ;;  %v541_v16 = vmul.f32 %v540_v1, %v1577_v6 }
  0x92   :  { %v774_v53 = vadd.f32 0.4994258, %v773_v48  ;;  %v553_v54 = vadd.f32 0.4994258, %v552_v49  ;;  %v657_v17 = vmul.f32 %v656_v2, %v1603_v39  ;;  %v668_v18 = vmul.f32 %v667_v8, %v1603_v39 }
  0x93   :  { %v634_v60 = vmul.f32 %v633_v51, %v1573_v4  ;;  %v763_v20 = vadd.f32 0.18741608, %v762_v10  ;;  %v623_v23 = vmul.f32 %v622_v15, %v1573_v4  ;;  %v542_v24 = vadd.f32 0.18741608, %v541_v16 }
  0x94   :  { %v775_v3 = vmul.f32 %v774_v53, %v1575_v5  ;;  %v554_v7 = vmul.f32 %v553_v54, %v1577_v6  ;;  %v658_v25 = vadd.f32 0.0036580483, %v657_v17  ;;  %v1638_v28 = vmul.f32 0.5, %v1553_v59 }
  0x95   :  { %v1616_v9 = vadd.f32 1.0, %v634_v60  ;;  %v1641_v29 = vmul.f32 0.5, %v1556_v61  ;;  %v669_v30 = vadd.f32 0.014752088, %v668_v18  ;;  %v1643_v31 = vmul.f32 0.70710677, %v743_v19 }
  0x96   :  { %v1619_v11 = vadd.f32 1.0, %v775_v3  ;;  %v1621_v12 = vadd.f32 1.0, %v554_v7  ;;  %v764_v58 = vmul.f32 %v763_v20, %v1575_v5  ;;  %v659_v34 = vmul.f32 %v658_v25, %v1603_v39 }
  0x97   :  { %1340 = vrcp.f32 %v1616_v9  ;;  %v1649_v4 = vmul.f32 0.5, %v743_v19  ;;  %v1652_v35 = vmul.f32 0.70710677, %v1630_v21  ;;  %v670_v36 = vmul.f32 %v669_v30, %v1603_v39 }
  0x98   :  { %1342 = vrcp.f32 %v1619_v11  ;;  %v794_v37 = vmul.f32 %v1643_v31, %v1643_v31  ;;  %v624_v5 = vadd.f32 1.1283791, %v623_v23  ;;  %v543_v41 = vmul.f32 %v542_v24, %v1577_v6 }
  0x99   :  { %1344 = vrcp.f32 %v1621_v12  ;;  %v1668_v42 = vadd.f32 %v1547_v55, %v953_v32  ;;  %v671_v45 = vadd.f32 0.112945676, %v670_v36  ;;  %v573_v47 = vmul.f32 %v1652_v35, %v1652_v35 }
  0x9a   :  { %v1672_v46 = vmin.f32 %v794_v37, 16.0  ;;  %v765_v48 = vadd.f32 1.1283791, %v764_v58  ;;  %v660_v51 = vadd.f32 0.05243302, %v659_v34  ;;  %v625_v56 = vmul.f32 %v624_v5, %v1559_v62 }
  0x9b   :  { %v672_v52 = vmul.f32 %v671_v45, %v1603_v39  ;;  %vm641_vm1 = vweird.f32 %v1616_v9  ;;  %v645_v57 = vand.u32 2147483647, %v1616_v9  ;;  %v544_v60 = vadd.f32 1.1283791, %v543_v41 }
  0x9c   :  { %v796_v53 = vmul.f32 2.1237322e-06, %v1672_v46  ;;  %v807_v54 = vmul.f32 3.8918573e-05, %v1672_v46  ;;  %v1686_v7 = vmin.f32 %v573_v47, 16.0  ;;  %v647_v8 = vand.u32 2147483648, %v1616_v9 }
  0x9d   :  { %v1645_v33 = vpop.eup %1340  ;;  %v673_v2 = vadd.f32 0.4994258, %v672_v52  ;;  %v661_v62 = vmul.f32 %v660_v51, %v1603_v39  ;;  %vm1694_vm3 = vcmp.eq.f32.partialorder %v645_v57, 8.507059e+37  ;;  %v766_v19 = vmul.f32 %v765_v48, %v1562_v63 }
  0x9e   :  { %v1654_v59 = vpop.eup %1342  ;;  %v637_v61 = vmul.f32 %v1645_v33, %v1616_v9  ;;  %v808_v3 = vadd.f32 0.001143296, %v807_v54  ;;  %vm642_vm2 = vweird.f32 %v1645_v33  ;;  %v797_v13 = vadd.f32 0.00028619796, %v796_v53 }
  0x9f   :  { %v778_v40 = vmul.f32 %v1654_v59, %v1619_v11  ;;  %v1670_v43 = vpop.eup %1344  ;;  %v674_v16 = vmul.f32 %v673_v2, %v1603_v39  ;;  %vm782_vm4 = vweird.f32 %v1619_v11  ;;  %v788_v20 = vand.u32 2147483648, %v1619_v11  ;;  %vm1710_vm6 = vmor %vm641_vm1, %vm642_vm2 }
  0xa0   :  { %v638_v44 = vsub.f32 1.0, %v637_v61  ;;  %v557_v50 = vmul.f32 %v1670_v43, %v1621_v12  ;;  %v809_v17 = vmul.f32 %v808_v3, %v1672_v46  ;;  %vm783_vm5 = vweird.f32 %v1654_v59 }
  0xa1   :  { %v779_v49 = vsub.f32 1.0, %v778_v40  ;;  %v1703_v24 = vadd.f32 1.0, %v674_v16  ;;  %v575_v25 = vmul.f32 2.1237322e-06, %v1686_v7  ;;  %v786_v63 = vand.u32 2147483647, %v1619_v11  ;;  %vm1724_vm7 = vmor %vm782_vm4, %vm783_vm5 }
  0xa2   :  { %v639_v6 = vmul.f32 %v1645_v33, %v638_v44  ;;  %v558_v10 = vsub.f32 1.0, %v557_v50  ;;  %v798_v32 = vmul.f32 %v797_v13, %v1672_v46  ;;  %v810_v58 = vadd.f32 0.014752088, %v809_v17 }
  0xa3   :  { %v780_v1 = vmul.f32 %v1654_v59, %v779_v49  ;;  %v545_v61 = vmul.f32 %v544_v60, %v1565_v0  ;;  %v662_v36 = vadd.f32 0.18741608, %v661_v62  ;;  %1346 = vrcp.f32 %v1703_v24 }
  0xa4   :  { %v640_v15 = vadd.f32 %v1645_v33, %v639_v6  ;;  %v559_v30 = vmul.f32 %v1670_v43, %v558_v10  ;;  %v648_v9 = vor.u32 1.1754944e-38, %v647_v8  ;;  %v789_v5 = vor.u32 1.1754944e-38, %v788_v20 }
  0xa5   :  { %v781_v23 = vadd.f32 %v1654_v59, %v780_v1  ;;  %v565_v40 = vand.u32 2147483647, %v1621_v12  ;;  %v1730_v41 = vmul.f32 0.70710677, %v1662_v38  ;;  %v811_v44 = vmul.f32 %v810_v58, %v1672_v46 }
  0xa6   :  { %v644_v34 = vsel %vm1710_vm6, %v1645_v33, %v640_v15  ;;  %v567_v33 = vand.u32 2147483648, %v1621_v12  ;;  %v576_v45 = vadd.f32 0.00028619796, %v575_v25  ;;  %v560_v47 = vadd.f32 %v1670_v43, %v559_v30 }
  0xa7   :  { %v785_v0 = vsel %vm1724_vm7, %v1654_v59, %v781_v23  ;;  %v649_v11 = vsel %vm1694_vm3, %v648_v9, %v644_v34  ;;  %vm562_vm8 = vweird.f32 %v1670_v43  ;;  %v799_v48 = vadd.f32 0.0036580483, %v798_v32 }
  0xa8   :  { %vm787_vm9 = vcmp.eq.f32.partialorder %v786_v63, 8.507059e+37  ;;  %vm561_vm10 = vweird.f32 %v1621_v12  ;;  %v663_v49 = vmul.f32 %v662_v36, %v1603_v39  ;;  %v812_v50 = vadd.f32 0.112945676, %v811_v44 }
  0xa9   :  { %v790_v59 = vsel %vm787_vm9, %v789_v5, %v785_v0  ;;  %v577_v51 = vmul.f32 %v576_v45, %v1686_v7  ;;  %v586_v6 = vmul.f32 3.8918573e-05, %v1686_v7  ;;  %v874_v52 = vmul.f32 %v1730_v41, %v1730_v41  ;;  %v1747_v53 = vpop.eup %1346  ;;  %vm1749_vm11 = vmor %vm561_vm10, %vm562_vm8 }
  0xaa   :  { %v650_v54 = vmul.f32 %v649_v11, %v625_v56  ;;  %vm1753_vm12 = vcmp.eq.f32.partialorder %v565_v40, 8.507059e+37  ;;  %v813_v39 = vmul.f32 %v812_v50, %v1672_v46  ;;  %v1759_v60 = vmul.f32 0.5, %v1630_v21  ;;  %v738_v50 = vpop.xlane.xlu0 %737 }
  0xab   :  { %v564_v1 = vsel %vm1749_vm11, %v1670_v43, %v560_v47  ;;  %v568_v2 = vor.u32 1.1754944e-38, %v567_v33  ;;  %v800_v56 = vmul.f32 %v799_v48, %v1672_v46  ;;  %v587_v3 = vadd.f32 0.001143296, %v586_v6 }
  0xac   :  { %v791_v8 = vmul.f32 %v790_v59, %v766_v19  ;;  %v677_v10 = vmul.f32 %v1747_v53, %v1703_v24  ;;  %v814_v13 = vadd.f32 0.4994258, %v813_v39  ;;  %v1767_v15 = vmin.f32 %v874_v52, 16.0 }
  0xad   :  { %v664_v62 = vadd.f32 1.1283791, %v663_v49  ;;  %v578_v16 = vadd.f32 0.0036580483, %v577_v51  ;;  %v588_v21 = vmul.f32 %v587_v3, %v1686_v7  ;;  %v1771_v17 = vmul.f32 0.70710677, %v1668_v42 }
  0xae   :  { %v1305_v18 = vclamps-f32 %v650_v54, 1.0  ;;  %v569_v43 = vsel %vm1753_vm12, %v568_v2, %v564_v1  ;;  %v815_v20 = vmul.f32 %v814_v13, %v1672_v46  ;;  %v876_v19 = vmul.f32 2.1237322e-06, %v1767_v15 }
  0xaf   :  { %v801_v23 = vadd.f32 0.05243302, %v800_v56  ;;  %v589_v25 = vadd.f32 0.014752088, %v588_v21  ;;  %v887_v26 = vmul.f32 3.8918573e-05, %v1767_v15  ;;  %v975_v63 = vmul.f32 %v1771_v17, %v1771_v17 }
  0xb0   :  { %v1307_v30 = vclamps-f32 %v791_v8, 1.0  ;;  %v678_v32 = vsub.f32 1.0, %v677_v10  ;;  %v1780_v58 = vadd.f32 1.0, %v815_v20  ;;  %v877_v34 = vadd.f32 0.00028619796, %v876_v19 }
  0xb1   :  { %v570_v36 = vmul.f32 %v569_v43, %v545_v61  ;;  %v579_v9 = vmul.f32 %v578_v16, %v1686_v7  ;;  %v590_v37 = vmul.f32 %v589_v25, %v1686_v7  ;;  %v888_v5 = vadd.f32 0.001143296, %v887_v26 }
  0xb2   :  { %v1785_v40 = vmul.f32 %v664_v62, %v1595_v27  ;;  %1348 = vrcp.f32 %v1780_v58  ;;  %v1789_v0 = vmul.f32 0.5, %v1662_v38  ;;  %v1791_v33 = vmin.f32 %v975_v63, 16.0 }
  0xb3   :  { %v685_v44 = vand.u32 2147483647, %v1703_v24  ;;  %v687_v45 = vand.u32 2147483648, %v1703_v24  ;;  %v802_v61 = vmul.f32 %v801_v23, %v1672_v46  ;;  %v591_v11 = vadd.f32 0.112945676, %v590_v37 }
  0xb4   :  { %v695_v47 = vadd.f32 1.0, %v1305_v18  ;;  %v679_v48 = vmul.f32 %v1747_v53, %v678_v32  ;;  %v878_v27 = vmul.f32 %v877_v34, %v1767_v15  ;;  %v889_v49 = vmul.f32 %v888_v5, %v1767_v15 }
  0xb5   :  { %v914_v59 = vadd.f32 1.0, %v1307_v30  ;;  %v1303_v38 = vclamps-f32 %v570_v36, 1.0  ;;  %v580_v51 = vadd.f32 0.05243302, %v579_v9  ;;  %v592_v6 = vmul.f32 %v591_v11, %v1686_v7 }
  0xb6   :  { %vm681_vm13 = vweird.f32 %v1703_v24  ;;  %v879_v52 = vadd.f32 0.0036580483, %v878_v27  ;;  %v890_v54 = vadd.f32 0.014752088, %v889_v49  ;;  %v977_v57 = vmul.f32 2.1237322e-06, %v1791_v33 }
  0xb7   :  { %vm1802_vm14 = vcmp.eq.f32.partialorder %v685_v44, 8.507059e+37  ;;  %v803_v39 = vadd.f32 0.18741608, %v802_v61  ;;  %v593_v1 = vadd.f32 0.4994258, %v592_v6  ;;  %v1807_v2 = vadd.f32 %v1547_v55, %v738_v50 }
  0xb8   :  { %v1809_v56 = vpop.eup %1348  ;;  %v680_v3 = vadd.f32 %v1747_v53, %v679_v48  ;;  %vm682_vm15 = vweird.f32 %v1747_v53  ;;  %v891_v8 = vmul.f32 %v890_v54, %v1767_v15  ;;  %v988_v10 = vmul.f32 3.8918573e-05, %v1791_v33 }
  0xb9   :  { %v688_v13 = vor.u32 1.1754944e-38, %v687_v45  ;;  %v818_v62 = vmul.f32 %v1809_v56, %v1780_v58  ;;  %v581_v16 = vmul.f32 %v580_v51, %v1686_v7  ;;  %v880_v21 = vmul.f32 %v879_v52, %v1767_v15  ;;  %vm1822_vm1 = vmor %vm681_vm13, %vm682_vm15 }
  0xba   :  { %v693_v18 = vadd.f32 1.0, %v1303_v38  ;;  %v594_v43 = vmul.f32 %v593_v1, %v1686_v7  ;;  %v892_v20 = vadd.f32 0.112945676, %v891_v8  ;;  %v978_v19 = vadd.f32 0.00028619796, %v977_v57 }
  0xbb   :  { %v804_v25 = vmul.f32 %v803_v39, %v1672_v46  ;;  %v819_v26 = vsub.f32 1.0, %v818_v62  ;;  %v989_v63 = vadd.f32 0.001143296, %v988_v10  ;;  %v1828_v30 = vmul.f32 0.70710677, %v1807_v2 }
  0xbc   :  { %v1831_v32 = vmul.f32 %v695_v47, %v1634_v22  ;;  %v684_v34 = vsel %vm1822_vm1, %v1747_v53, %v680_v3  ;;  %v1836_v36 = vadd.f32 1.0, %v594_v43  ;;  %v893_v24 = vmul.f32 %v892_v20, %v1767_v15 }
  0xbd   :  { %v582_v9 = vadd.f32 0.18741608, %v581_v16  ;;  %v881_v37 = vadd.f32 0.05243302, %v880_v21  ;;  %v990_v46 = vmul.f32 %v989_v63, %v1791_v33  ;;  %v834_v5 = vmul.f32 %v1828_v30, %v1828_v30  ;;  %v962_v21 = vpop.xlane.xlu2 %961 }
  0xbe   :  { %v1843_v44 = vmul.f32 %v914_v59, %v1638_v28  ;;  %v820_v22 = vmul.f32 %v1809_v56, %v819_v26  ;;  %1350 = vrcp.f32 %v1836_v36  ;;  %v1848_v53 = vmul.f32 0.5, %v1668_v42 }
  0xbf   :  { %v1851_v45 = vmul.f32 %v693_v18, %v1641_v29  ;;  %v805_v61 = vadd.f32 1.1283791, %v804_v25  ;;  %v894_v11 = vadd.f32 0.4994258, %v893_v24  ;;  %v979_v47 = vmul.f32 %v978_v19, %v1791_v33 }
  0xc0   :  { %v689_v48 = vsel %vm1802_vm14, %v688_v13, %v684_v34  ;;  %v826_v28 = vand.u32 2147483647, %v1780_v58  ;;  %v991_v27 = vadd.f32 0.014752088, %v990_v46  ;;  %v1857_v49 = vmin.f32 %v834_v5, 16.0 }
  0xc1   :  { %vm823_vm2 = vweird.f32 %v1809_v56  ;;  %v583_v42 = vmul.f32 %v582_v9, %v1686_v7  ;;  %v882_v50 = vmul.f32 %v881_v37, %v1767_v15  ;;  %v895_v29 = vmul.f32 %v894_v11, %v1767_v15  ;;  %v959_v7 = vpop.xlane.xlu1 %958 }
  0xc2   :  { %v821_v59 = vadd.f32 %v1809_v56, %v820_v22  ;;  %v992_v38 = vmul.f32 %v991_v27, %v1791_v33  ;;  %v836_v51 = vmul.f32 2.1237322e-06, %v1857_v49  ;;  %v847_v6 = vmul.f32 3.8918573e-05, %v1857_v49 }
  0xc3   :  { %vm822_vm3 = vweird.f32 %v1780_v58  ;;  %v828_v52 = vand.u32 2147483648, %v1780_v58  ;;  %v1869_v54 = vadd.f32 1.0, %v895_v29  ;;  %v980_v57 = vadd.f32 0.0036580483, %v979_v47 }
  0xc4   :  { %v1871_v12 = vpop.eup %1350  ;;  %v1874_v39 = vmul.f32 %v689_v48, %v1785_v40  ;;  %v993_v1 = vadd.f32 0.112945676, %v992_v38  ;;  %v837_v3 = vadd.f32 0.00028619796, %v836_v51  ;;  %v848_v8 = vadd.f32 0.001143296, %v847_v6  ;;  %vm1879_vm4 = vmor %vm822_vm3, %vm823_vm2 }
  0xc5   :  { %v806_v10 = vmul.f32 %v805_v61, %v1643_v31  ;;  %v584_v58 = vadd.f32 1.1283791, %v583_v42  ;;  %v597_v62 = vmul.f32 %v1871_v12, %v1836_v36  ;;  %v883_v16 = vadd.f32 0.18741608, %v882_v50 }
  0xc6   :  { %v825_v40 = vsel %vm1879_vm4, %v1809_v56, %v821_v59  ;;  %vm827_vm5 = vcmp.eq.f32.partialorder %v826_v28, 8.507059e+37  ;;  %1352 = vrcp.f32 %v1869_v54  ;;  %v1890_v31 = vadd.f32 %v1547_v55, %v959_v7 }
  0xc7   :  { %v829_v18 = vor.u32 1.1754944e-38, %v828_v52  ;;  %v598_v43 = vsub.f32 1.0, %v597_v62  ;;  %v981_v20 = vmul.f32 %v980_v57, %v1791_v33  ;;  %v994_v19 = vmul.f32 %v993_v1, %v1791_v33 }
  0xc8   :  { %v1306_v23 = vclamps-f32 %v1874_v39, 1.0  ;;  %v838_v25 = vmul.f32 %v837_v3, %v1857_v49  ;;  %v849_v26 = vmul.f32 %v848_v8, %v1857_v49  ;;  %v1898_v56 = vadd.f32 %v1547_v55, %v962_v21 }
  0xc9   :  { %v830_v63 = vsel %vm827_vm5, %v829_v18, %v825_v40  ;;  %v1901_v34 = vmul.f32 %v584_v58, %v1652_v35  ;;  %v884_v24 = vmul.f32 %v883_v16, %v1767_v15  ;;  %v995_v9 = vadd.f32 0.4994258, %v994_v19 }
  0xca   :  { %v599_v37 = vmul.f32 %v1871_v12, %v598_v43  ;;  %v839_v46 = vadd.f32 0.0036580483, %v838_v25  ;;  %v850_v5 = vadd.f32 0.014752088, %v849_v26  ;;  %v1906_v22 = vmul.f32 0.70710677, %v1890_v31 }
  0xcb   :  { %v605_v61 = vand.u32 2147483647, %v1836_v36  ;;  %v607_v11 = vand.u32 2147483648, %v1836_v36  ;;  %v982_v47 = vadd.f32 0.05243302, %v981_v20  ;;  %v996_v48 = vmul.f32 %v995_v9, %v1791_v33 }
  0xcc   :  { %v1911_v28 = vpop.eup %1352  ;;  %v831_v35 = vmul.f32 %v830_v63, %v806_v10  ;;  %v851_v15 = vmul.f32 %v850_v5, %v1857_v49  ;;  %v1055_v27 = vmul.f32 %v1906_v22, %v1906_v22  ;;  %v1917_v42 = vmul.f32 0.70710677, %v1898_v56 }
  0xcd   :  { %vm601_vm6 = vweird.f32 %v1836_v36  ;;  %v885_v50 = vadd.f32 1.1283791, %v884_v24  ;;  %v898_v29 = vmul.f32 %v1911_v28, %v1869_v54  ;;  %v840_v59 = vmul.f32 %v839_v46, %v1857_v49  ;;  %v956_v46 = vpop.xlane.xlu0 %955 }
  0xce   :  { %v600_v38 = vadd.f32 %v1871_v12, %v599_v37  ;;  %vm602_vm7 = vweird.f32 %v1871_v12  ;;  %v1925_v51 = vadd.f32 1.0, %v996_v48  ;;  %v852_v6 = vadd.f32 0.112945676, %v851_v15 }
  0xcf   :  { %vm1927_vm8 = vcmp.eq.f32.partialorder %v605_v61, 8.507059e+37  ;;  %v899_v57 = vsub.f32 1.0, %v898_v29  ;;  %v983_v7 = vmul.f32 %v982_v47, %v1791_v33  ;;  %v1932_v1 = vmin.f32 %v1055_v27, 16.0  ;;  %vm1939_vm9 = vmor %vm601_vm6, %vm602_vm7 }
  0xd0   :  { %v1308_v3 = vclamps-f32 %v831_v35, 1.0  ;;  %v608_v8 = vor.u32 1.1754944e-38, %v607_v11  ;;  %1354 = vrcp.f32 %v1925_v51  ;;  %v1095_v10 = vmul.f32 %v1917_v42, %v1917_v42 }
  0xd1   :  { %v886_v58 = vmul.f32 %v885_v50, %v1730_v41  ;;  %v900_v62 = vmul.f32 %v1911_v28, %v899_v57  ;;  %v841_v16 = vadd.f32 0.05243302, %v840_v59  ;;  %v853_v21 = vmul.f32 %v852_v6, %v1857_v49 }
  0xd2   :  { %v604_v40 = vsel %vm1939_vm9, %v1871_v12, %v600_v38  ;;  %v906_v18 = vand.u32 2147483647, %v1869_v54  ;;  %v1057_v43 = vmul.f32 2.1237322e-06, %v1932_v1  ;;  %v1068_v36 = vmul.f32 3.8918573e-05, %v1932_v1 }
  0xd3   :  { %vm902_vm10 = vweird.f32 %v1869_v54  ;;  %v908_v20 = vand.u32 2147483648, %v1869_v54  ;;  %v984_v41 = vadd.f32 0.18741608, %v983_v7  ;;  %v854_v19 = vadd.f32 0.4994258, %v853_v21 }
  0xd4   :  { %vm903_vm11 = vweird.f32 %v1911_v28  ;;  %v1058_v25 = vadd.f32 0.00028619796, %v1057_v43  ;;  %v1069_v26 = vadd.f32 0.001143296, %v1068_v36  ;;  %v1955_v63 = vmin.f32 %v1095_v10, 16.0 }
  0xd5   :  { %v609_v12 = vsel %vm1927_vm8, %v608_v8, %v604_v40  ;;  %v901_v24 = vadd.f32 %v1911_v28, %v900_v62  ;;  %v842_v9 = vmul.f32 %v841_v16, %v1857_v49  ;;  %v855_v37 = vmul.f32 %v854_v19, %v1857_v49  ;;  %vm1978_vm13 = vmor %vm902_vm10, %vm903_vm11 }
  0xd6   :  { %v1355_v5 = vpop.eup %1354  ;;  %v1962_v61 = vadd.f32 1.0, %v1308_v3  ;;  %vm1964_vm12 = vcmp.eq.f32.partialorder %v906_v18, 8.507059e+37  ;;  %v1070_v47 = vmul.f32 %v1069_v26, %v1932_v1  ;;  %v1097_v48 = vmul.f32 2.1237322e-06, %v1955_v63 }
  0xd7   :  { %v909_v35 = vor.u32 1.1754944e-38, %v908_v20  ;;  %v985_v15 = vmul.f32 %v984_v41, %v1791_v33  ;;  %v999_v27 = vmul.f32 %v1355_v5, %v1925_v51  ;;  %v1059_v50 = vmul.f32 %v1058_v25, %v1932_v1 }
  0xd8   :  { %v610_v29 = vmul.f32 %v609_v12, %v1901_v34  ;;  %v1982_v38 = vadd.f32 1.0, %v855_v37  ;;  %v1071_v6 = vadd.f32 0.014752088, %v1070_v47  ;;  %v1985_v52 = vadd.f32 %v1547_v55, %v956_v46 }
  0xd9   :  { %v905_v33 = vsel %vm1978_vm13, %v1911_v28, %v901_v24  ;;  %v1000_v57 = vsub.f32 1.0, %v999_v27  ;;  %v843_v34 = vadd.f32 0.18741608, %v842_v9  ;;  %v1098_v7 = vadd.f32 0.00028619796, %v1097_v48 }
  0xda   :  { %vm1003_vm14 = vweird.f32 %v1925_v51  ;;  %v1007_v54 = vand.u32 2147483647, %v1925_v51  ;;  %v1009_v3 = vand.u32 2147483648, %v1925_v51  ;;  %1356 = vrcp.f32 %v1982_v38 }
  0xdb   :  { %v1001_v8 = vmul.f32 %v1355_v5, %v1000_v57  ;;  %vm1004_vm15 = vweird.f32 %v1355_v5  ;;  %v1060_v10 = vadd.f32 0.0036580483, %v1059_v50  ;;  %v1072_v55 = vmul.f32 %v1071_v6, %v1932_v1 }
  0xdc   :  { %v1304_v13 = vclamps-f32 %v610_v29, 1.0  ;;  %v910_v28 = vsel %vm1964_vm12, %v909_v35, %v905_v33  ;;  %v986_v62 = vadd.f32 1.1283791, %v985_v15  ;;  %v1108_v16 = vmul.f32 3.8918573e-05, %v1955_v63  ;;  %vm1005_vm1 = vmor %vm1003_vm14, %vm1004_vm15 }
  0xdd   :  { %v1002_v21 = vadd.f32 %v1355_v5, %v1001_v8  ;;  %v844_v40 = vmul.f32 %v843_v34, %v1857_v49  ;;  %v1073_v18 = vadd.f32 0.112945676, %v1072_v55  ;;  %v1099_v43 = vmul.f32 %v1098_v7, %v1955_v63  ;;  %v2010_v49 = vld [vmem:[%s2528_s5] ss:$0 sm:$0xff] }
  0xde   :  { %vm1008_vm2 = vcmp.eq.f32.partialorder %v1007_v54, 8.507059e+37  ;;  %v1010_v36 = vor.u32 1.1754944e-38, %v1009_v3  ;;  %v1109_v20 = vadd.f32 0.001143296, %v1108_v16  ;;  %v2003_v41 = vmul.f32 0.70710677, %v1985_v52 }
  0xdf   :  { %v911_v19 = vmul.f32 %v910_v28, %v886_v58  ;;  %v1006_v25 = vsel %vm1005_vm1, %v1355_v5, %v1002_v21  ;;  %v1061_v26 = vmul.f32 %v1060_v10, %v1932_v1  ;;  %v1074_v12 = vmul.f32 %v1073_v18, %v1932_v1 }
  0xe0   :  { %v1357_v24 = vpop.eup %1356  ;;  %v694_v51 = vadd.f32 1.0, %v1304_v13  ;;  %v987_v9 = vmul.f32 %v986_v62, %v1771_v17  ;;  %v1011_v37 = vsel %vm1008_vm2, %v1010_v36, %v1006_v25  ;;  %v1110_v46 = vmul.f32 %v1109_v20, %v1955_v63 }
  0xe1   :  { %v845_v11 = vadd.f32 1.1283791, %v844_v40  ;;  %v858_v58 = vmul.f32 %v1357_v24, %v1982_v38  ;;  %v1100_v5 = vadd.f32 0.0036580483, %v1099_v43  ;;  %v1015_v47 = vmul.f32 %v2003_v41, %v2003_v41 }
  0xe2   :  { %v1012_v48 = vmul.f32 %v1011_v37, %v987_v9  ;;  %v1075_v35 = vadd.f32 0.4994258, %v1074_v12  ;;  %v1111_v15 = vadd.f32 0.014752088, %v1110_v46  ;;  %v701_v27 = vmul.f32 %v2010_v49, %v1851_v45 }
  0xe3   :  { %v1310_v50 = vclamps-f32 %v911_v19, 1.0  ;;  %v859_v29 = vsub.f32 1.0, %v858_v58  ;;  %vm862_vm3 = vweird.f32 %v1982_v38  ;;  %v1062_v17 = vadd.f32 0.05243302, %v1061_v26 }
  0xe4   :  { %v868_v59 = vand.u32 2147483648, %v1982_v38  ;;  %v1076_v6 = vmul.f32 %v1075_v35, %v1932_v1  ;;  %v1112_v33 = vmul.f32 %v1111_v15, %v1955_v63  ;;  %709 = vrot.lane.b32.xlu1 %v701_v27, %s1399_s15  ;;  %v703_v57 = vmul.f32 %v2010_v49, %v1831_v32 }
  0xe5   :  { %v860_v34 = vmul.f32 %v1357_v24, %v859_v29  ;;  %vm863_vm4 = vweird.f32 %v1357_v24  ;;  %v866_v45 = vand.u32 2147483647, %v1982_v38  ;;  %v1101_v7 = vmul.f32 %v1100_v5, %v1955_v63 }
  0xe6   :  { %v1311_v54 = vclamps-f32 %v1012_v48, 1.0  ;;  %v2028_v3 = vadd.f32 1.0, %v1076_v6  ;;  %v1113_v8 = vadd.f32 0.112945676, %v1112_v33  ;;  %v2030_v10 = vmin.f32 %v1015_v47, 16.0  ;;  %713 = vrot.lane.b32.xlu0 %v703_v57, %s1399_s15  ;;  %vm864_vm5 = vmor %vm862_vm3, %vm863_vm4 }
  0xe7   :  { %v919_v55 = vmul.f32 %v1962_v61, %v1649_v4  ;;  %v917_v13 = vadd.f32 1.0, %v1310_v50  ;;  %v861_v28 = vadd.f32 %v1357_v24, %v860_v34  ;;  %v1063_v32 = vmul.f32 %v1062_v17, %v1932_v1 }
  0xe8   :  { %v698_v62 = vmul.f32 %v694_v51, %v1759_v60  ;;  %v846_v16 = vmul.f32 %v845_v11, %v1828_v30  ;;  %v869_v21 = vor.u32 1.1754944e-38, %v868_v59  ;;  %1358 = vrcp.f32 %v2028_v3 }
  0xe9   :  { %v865_v40 = vsel %vm864_vm5, %v1357_v24, %v861_v28  ;;  %vm867_vm6 = vcmp.eq.f32.partialorder %v866_v45, 8.507059e+37  ;;  %v1102_v18 = vadd.f32 0.05243302, %v1101_v7  ;;  %v1114_v43 = vmul.f32 %v1113_v8, %v1955_v63  ;;  %v78_v45 = vpop.f32.mrf.mxu2 }
  0xea   :  { %v1135_v4 = vadd.f32 1.0, %v1311_v54  ;;  %v870_v61 = vsel %vm867_vm6, %v869_v21, %v865_v40  ;;  %v1028_v36 = vmul.f32 3.8918573e-05, %v2030_v10  ;;  %v922_v60 = vmul.f32 %v2010_v49, %v1843_v44 }
  0xeb   :  { %v696_v30 = vadd.f32 1.0, %v1306_v23  ;;  %v921_v38 = vmul.f32 %v917_v13, %v1789_v0  ;;  %v1064_v20 = vadd.f32 0.18741608, %v1063_v32  ;;  %v1115_v19 = vadd.f32 0.4994258, %v1114_v43 }
  0xec   :  { %v871_v25 = vmul.f32 %v870_v61, %v846_v16  ;;  %v1029_v26 = vadd.f32 0.001143296, %v1028_v36  ;;  %930 = vrot.lane.b32.xlu1 %v922_v60, %s1400_s16  ;;  %v702_v12 = vmul.f32 %v2010_v49, %v698_v62  ;;  %v923_v24 = vmul.f32 %v2010_v49, %v919_v55 }
  0xed   :  { %v1116_v51 = vmul.f32 %v1115_v19, %v1955_v63  ;;  %v528_v44 = vmul.f32 0.5, %v1586_v14  ;;  %v1139_v39 = vmul.f32 %v1135_v4, %v1848_v53  ;;  %v1103_v0 = vmul.f32 %v1102_v18, %v1955_v63 }
  0xee   :  { %v1359_v9 = vpop.eup %1358  ;;  %v1030_v23 = vmul.f32 %v1029_v26, %v2030_v10  ;;  %711 = vrot.lane.b32.xlu2 %v702_v12, %s1399_s15  ;;  %932 = vrot.lane.b32.xlu0 %v923_v24, %s1400_s16  ;;  %v1065_v37 = vmul.f32 %v1064_v20, %v1932_v1  ;;  %v1309_v5 = vclamps-f32 %v871_v25, 1.0  ;;  %v925_v14 = vmul.f32 %v2010_v49, %v921_v38 }
  0xef   :  { %v1079_v46 = vmul.f32 %v1359_v9, %v2028_v3  ;;  %v2060_v11 = vadd.f32 1.0, %v1116_v51  ;;  %v700_v58 = vmul.f32 %v696_v30, %v528_v44  ;;  %v1017_v48 = vmul.f32 2.1237322e-06, %v2030_v10 }
  0xf0   :  { %v1031_v47 = vadd.f32 0.014752088, %v1030_v23  ;;  %v1089_v35 = vand.u32 2147483648, %v2028_v3  ;;  %v1104_v15 = vadd.f32 0.18741608, %v1103_v0  ;;  %v1143_v1 = vmul.f32 %v2010_v49, %v1139_v39 }
  0xf1   :  { %v1080_v53 = vsub.f32 1.0, %v1079_v46  ;;  %1360 = vrcp.f32 %v2060_v11  ;;  %v1066_v50 = vadd.f32 1.1283791, %v1065_v37  ;;  %vm1084_vm7 = vweird.f32 %v1359_v9  ;;  %v80_v24 = vpop.f32.mrf.mxu2 }
  0xf2   :  { %v1032_v27 = vmul.f32 %v1031_v47, %v2030_v10  ;;  %v1087_v17 = vand.u32 2147483647, %v2028_v3  ;;  %v916_v59 = vadd.f32 1.0, %v1309_v5  ;;  %v704_v33 = vmul.f32 %v2010_v49, %v700_v58 }
  0xf3   :  { %v1081_v29 = vmul.f32 %v1359_v9, %v1080_v53  ;;  %v748_v57 = vmul.f32 0.5, %v1807_v2  ;;  %vm1083_vm8 = vweird.f32 %v2028_v3  ;;  %v1090_v7 = vor.u32 1.1754944e-38, %v1089_v35  ;;  %v2080_v2 = vld [vmem:[%s2529_s2] ss:$0 sm:$0xff] }
  0xf4   :  { %v1033_v6 = vadd.f32 0.112945676, %v1032_v27  ;;  %936 = vrot.lane.b32.xlu1 %v925_v14, %s1400_s16  ;;  %vm1085_vm9 = vmor %vm1083_vm8, %vm1084_vm7  ;;  %v1105_v54 = vmul.f32 %v1104_v15, %v1955_v63  ;;  %v1018_v8 = vadd.f32 0.00028619796, %v1017_v48  ;;  %v1067_v3 = vmul.f32 %v1066_v50, %v1906_v22  ;;  %v300_v48 = vpop.xlane.xlu1 %299 }
  0xf5   :  { %v1082_v34 = vadd.f32 %v1359_v9, %v1081_v29  ;;  %vm1088_vm10 = vcmp.eq.f32.partialorder %v1087_v17, 8.507059e+37  ;;  %v920_v32 = vmul.f32 %v916_v59, %v748_v57  ;;  %v2085_v40 = vadd.f32 %v2080_v2, %v78_v45 }
  0xf6   :  { %v1034_v55 = vmul.f32 %v1033_v6, %v2030_v10  ;;  %715 = vrot.lane.b32.xlu2 %v704_v33, %s1399_s15  ;;  %1151 = vrot.lane.b32.xlu0 %v1143_v1, %s1401_s3  ;;  %v1106_v18 = vadd.f32 1.1283791, %v1105_v54  ;;  %vm1123_vm11 = vweird.f32 %v2060_v11  ;;  %v1019_v4 = vmul.f32 %v1018_v8, %v2030_v10  ;;  %v2131_v6 = vld [vmem:[%s2527_s4] ss:$0 sm:$0xff]  ;;  %v303_v8 = vpop.xlane.xlu2 %302 }
  0xf7   :  { %v1361_v13 = vpop.eup %1360  ;;  %v1086_v28 = vsel %vm1085_vm9, %v1359_v9, %v1082_v34  ;;  %v1129_v22 = vand.u32 2147483648, %v2060_v11  ;;  %v2092_v60 = vmul.f32 0.70710677, %v2085_v40  ;;  %v1127_v38 = vand.u32 2147483647, %v2060_v11 }
  0xf8   :  { %v1091_v63 = vsel %vm1088_vm10, %v1090_v7, %v1086_v28  ;;  %v1119_v62 = vmul.f32 %v1361_v13, %v2060_v11  ;;  %v1035_v21 = vadd.f32 0.4994258, %v1034_v55  ;;  %vm1124_vm12 = vweird.f32 %v1361_v13  ;;  %v73_v11 = vpop.f32.mrf.mxu0 }
  0xf9   :  { %v1092_v16 = vmul.f32 %v1091_v63, %v1067_v3  ;;  %v924_v20 = vmul.f32 %v2010_v49, %v920_v32  ;;  %v969_v19 = vmul.f32 0.5, %v1890_v31  ;;  %v171_v12 = vmul.f32 %v2092_v60, %v2092_v60  ;;  %vm1125_vm13 = vmor %vm1123_vm11, %vm1124_vm12 }
  0xfa   :  { %v1120_v43 = vsub.f32 1.0, %v1119_v62  ;;  %v1036_v36 = vmul.f32 %v1035_v21, %v2030_v10  ;;  %v1020_v9 = vadd.f32 0.0036580483, %v1019_v4  ;;  %v2103_v44 = vadd.f32 %v2080_v2, %v80_v24 }
  0xfb   :  { %v1313_v61 = vclamps-f32 %v1092_v16, 1.0  ;;  %v1107_v0 = vmul.f32 %v1106_v18, %v1917_v42  ;;  %v1130_v31 = vor.u32 1.1754944e-38, %v1129_v22  ;;  %vm1128_vm14 = vcmp.eq.f32.partialorder %v1127_v38, 8.507059e+37 }
  0xfc   :  { %v1121_v30 = vmul.f32 %v1361_v13, %v1120_v43  ;;  %v2097_v26 = vadd.f32 1.0, %v1036_v36  ;;  %v2109_v37 = vmin.f32 %v171_v12, 16.0  ;;  %v2112_v46 = vmul.f32 0.70710677, %v2103_v44 }
  0xfd   :  { %v1137_v25 = vadd.f32 1.0, %v1313_v61  ;;  %v1021_v14 = vmul.f32 %v1020_v9, %v2030_v10  ;;  %v2121_v27 = vadd.f32 %v2080_v2, %v73_v11  ;;  %v970_v29 = vmul.f32 0.5, %v1898_v56 }
  0xfe   :  { %v1122_v51 = vadd.f32 %v1361_v13, %v1121_v30  ;;  %934 = vrot.lane.b32.xlu2 %v924_v20, %s1400_s16  ;;  %1362 = vrcp.f32 %v2097_v26  ;;  %v184_v42 = vmul.f32 3.8918573e-05, %v2109_v37  ;;  %v211_v53 = vmul.f32 %v2112_v46, %v2112_v46 }
  0xff   :  { %v1141_v39 = vmul.f32 %v1137_v25, %v969_v19  ;;  %v1022_v59 = vadd.f32 0.05243302, %v1021_v14  ;;  %v2134_v33 = vadd.f32 %v2131_v6, %v300_v48  ;;  %v2138_v34 = vmul.f32 0.70710677, %v2121_v27 }
 0x100   :  { %v1126_v23 = vsel %vm1125_vm13, %v1361_v13, %v1122_v51  ;;  %v185_v15 = vadd.f32 0.001143296, %v184_v42  ;;  %v2125_v50 = vmin.f32 %v211_v53, 16.0  ;;  %v173_v54 = vmul.f32 2.1237322e-06, %v2109_v37 }
 0x101   :  { %v1131_v58 = vsel %vm1128_vm14, %v1130_v31, %v1126_v23  ;;  %v1145_v5 = vmul.f32 %v2010_v49, %v1141_v39  ;;  %v91_v13 = vmul.f32 %v2138_v34, %v2138_v34  ;;  %v1023_v28 = vmul.f32 %v1022_v59, %v2030_v10 }
 0x102   :  { %v1132_v47 = vmul.f32 %v1131_v58, %v1107_v0  ;;  %v186_v57 = vmul.f32 %v185_v15, %v2109_v37  ;;  %v224_v45 = vmul.f32 3.8918573e-05, %v2125_v50  ;;  %v2149_v63 = vmul.f32 0.70710677, %v2134_v33 }
 0x103   :  { %1155 = vrot.lane.b32.xlu1 %v1145_v5, %s1401_s3  ;;  %v2152_v16 = vmin.f32 %v91_v13, 16.0  ;;  %v2156_v18 = vadd.f32 %v2131_v6, %v303_v8  ;;  %v174_v4 = vadd.f32 0.00028619796, %v173_v54  ;;  %v1024_v30 = vadd.f32 0.18741608, %v1023_v28 }
 0x104   :  { %v1314_v35 = vclamps-f32 %v1132_v47, 1.0  ;;  %v2123_v1 = vpop.eup %1362  ;;  %v187_v55 = vadd.f32 0.014752088, %v186_v57  ;;  %v225_v3 = vadd.f32 0.001143296, %v224_v45  ;;  %v362_v38 = vmul.f32 %v2149_v63, %v2149_v63 }
 0x105   :  { %v1039_v56 = vmul.f32 %v2123_v1, %v2097_v26  ;;  %v104_v22 = vmul.f32 3.8918573e-05, %v2152_v16  ;;  %v2165_v12 = vmul.f32 0.70710677, %v2156_v18  ;;  %v175_v51 = vmul.f32 %v174_v4, %v2109_v37 }
 0x106   :  { %v1138_v17 = vadd.f32 1.0, %v1314_v35  ;;  %v188_v62 = vmul.f32 %v187_v55, %v2109_v37  ;;  %v226_v21 = vmul.f32 %v225_v3, %v2125_v50  ;;  %v1025_v31 = vmul.f32 %v1024_v30, %v2030_v10 }
 0x107   :  { %v1040_v43 = vsub.f32 1.0, %v1039_v56  ;;  %v105_v19 = vadd.f32 0.001143296, %v104_v22  ;;  %vm1043_vm15 = vweird.f32 %v2097_v26  ;;  %v1047_v23 = vand.u32 2147483647, %v2097_v26 }
 0x108   :  { %v1142_v7 = vmul.f32 %v1138_v17, %v970_v29  ;;  %v189_v61 = vadd.f32 0.112945676, %v188_v62  ;;  %v227_v36 = vadd.f32 0.014752088, %v226_v21  ;;  %v2173_v58 = vmin.f32 %v362_v38, 16.0 }
 0x109   :  { %v1041_v24 = vmul.f32 %v2123_v1, %v1040_v43  ;;  %v106_v39 = vmul.f32 %v105_v19, %v2152_v16  ;;  %v402_v42 = vmul.f32 %v2165_v12, %v2165_v12  ;;  %vm1044_vm1 = vweird.f32 %v2123_v1 }
 0x10a   :  { %v1146_v32 = vmul.f32 %v2010_v49, %v1142_v7  ;;  %v190_v20 = vmul.f32 %v189_v61, %v2109_v37  ;;  %v228_v25 = vmul.f32 %v227_v36, %v2125_v50  ;;  %v1049_v10 = vand.u32 2147483648, %v2097_v26  ;;  %vm1045_vm2 = vmor %vm1043_vm15, %vm1044_vm1 }
 0x10b   :  { %v107_v47 = vadd.f32 0.014752088, %v106_v39  ;;  %v1042_v11 = vadd.f32 %v2123_v1, %v1041_v24  ;;  %v93_v53 = vmul.f32 2.1237322e-06, %v2152_v16  ;;  %v176_v48 = vadd.f32 0.0036580483, %v175_v51 }
 0x10c   :  { %1157 = vrot.lane.b32.xlu0 %v1146_v32, %s1401_s3  ;;  %v191_v9 = vadd.f32 0.4994258, %v190_v20  ;;  %v229_v0 = vadd.f32 0.112945676, %v228_v25  ;;  %v213_v15 = vmul.f32 2.1237322e-06, %v2125_v50 }
 0x10d   :  { %v108_v35 = vmul.f32 %v107_v47, %v2152_v16  ;;  %v375_v59 = vmul.f32 3.8918573e-05, %v2173_v58  ;;  %v1026_v57 = vadd.f32 1.1283791, %v1025_v31  ;;  %v2190_v45 = vmin.f32 %v402_v42, 16.0 }
 0x10e   :  { %v192_v5 = vmul.f32 %v191_v9, %v2109_v37  ;;  %v230_v14 = vmul.f32 %v229_v0, %v2125_v50  ;;  %v1046_v7 = vsel %vm1045_vm2, %v2123_v1, %v1042_v11  ;;  %v94_v56 = vadd.f32 0.00028619796, %v93_v53 }
 0x10f   :  { %v214_v54 = vadd.f32 0.00028619796, %v213_v15  ;;  %vm1048_vm3 = vcmp.eq.f32.partialorder %v1047_v23, 8.507059e+37  ;;  %v1050_v55 = vor.u32 1.1754944e-38, %v1049_v10  ;;  %v177_v13 = vmul.f32 %v176_v48, %v2109_v37 }
 0x110   :  { %v231_v29 = vadd.f32 0.4994258, %v230_v14  ;;  %v2185_v17 = vadd.f32 1.0, %v192_v5  ;;  %v109_v3 = vadd.f32 0.112945676, %v108_v35  ;;  %v1027_v1 = vmul.f32 %v1026_v57, %v2003_v41 }
 0x111   :  { %v215_v28 = vmul.f32 %v214_v54, %v2125_v50  ;;  %v376_v26 = vadd.f32 0.001143296, %v375_v59  ;;  %v1051_v62 = vsel %vm1048_vm3, %v1050_v55, %v1046_v7  ;;  %v415_v21 = vmul.f32 3.8918573e-05, %v2190_v45  ;;  %v297_v55 = vpop.xlane.xlu0 %296 }
 0x112   :  { %v232_v8 = vmul.f32 %v231_v29, %v2125_v50  ;;  %1364 = vrcp.f32 %v2185_v17  ;;  %v95_v43 = vmul.f32 %v94_v56, %v2152_v16  ;;  %v110_v61 = vmul.f32 %v109_v3, %v2152_v16 }
 0x113   :  { %v216_v4 = vadd.f32 0.0036580483, %v215_v28  ;;  %v1052_v22 = vmul.f32 %v1051_v62, %v1027_v1  ;;  %v178_v36 = vadd.f32 0.05243302, %v177_v13  ;;  %v377_v30 = vmul.f32 %v376_v26, %v2173_v58 }
 0x114   :  { %v2197_v32 = vadd.f32 1.0, %v232_v8  ;;  %v416_v20 = vadd.f32 0.001143296, %v415_v21  ;;  %v96_v25 = vadd.f32 0.0036580483, %v95_v43  ;;  %v968_v29 = vmul.f32 0.5, %v1985_v52  ;;  %v75_v21 = vpop.f32.mrf.mxu0 }
 0x115   :  { %v217_v38 = vmul.f32 %v216_v4, %v2125_v50  ;;  %v111_v24 = vadd.f32 0.4994258, %v110_v61  ;;  %v1312_v9 = vclamps-f32 %v1052_v22, 1.0  ;;  %v179_v39 = vmul.f32 %v178_v36, %v2109_v37 }
 0x116   :  { %1366 = vrcp.f32 %v2197_v32  ;;  %v378_v0 = vadd.f32 0.014752088, %v377_v30  ;;  %v417_v5 = vmul.f32 %v416_v20, %v2190_v45  ;;  %v97_v47 = vmul.f32 %v96_v25, %v2152_v16 }
 0x117   :  { %v218_v51 = vadd.f32 0.05243302, %v217_v38  ;;  %v112_v14 = vmul.f32 %v111_v24, %v2152_v16  ;;  %v1136_v11 = vadd.f32 1.0, %v1312_v9  ;;  %v180_v10 = vadd.f32 0.18741608, %v179_v39 }
 0x118   :  { %v2206_v19 = vpop.eup %1364  ;;  %v379_v53 = vmul.f32 %v378_v0, %v2173_v58  ;;  %v418_v15 = vadd.f32 0.014752088, %v417_v5  ;;  %v98_v59 = vadd.f32 0.05243302, %v97_v47  ;;  %vm199_vm4 = vweird.f32 %v2185_v17 }
 0x119   :  { %v195_v31 = vmul.f32 %v2206_v19, %v2185_v17  ;;  %v219_v42 = vmul.f32 %v218_v51, %v2125_v50  ;;  %v2221_v57 = vadd.f32 1.0, %v112_v14  ;;  %v1140_v56 = vmul.f32 %v1136_v11, %v968_v29 }
 0x11a   :  { %v181_v54 = vmul.f32 %v180_v10, %v2109_v37  ;;  %v380_v8 = vadd.f32 0.112945676, %v379_v53  ;;  %v419_v28 = vmul.f32 %v418_v15, %v2190_v45  ;;  %vm200_vm5 = vweird.f32 %v2206_v19 }
 0x11b   :  { %v196_v48 = vsub.f32 1.0, %v195_v31  ;;  %v220_v7 = vadd.f32 0.18741608, %v219_v42  ;;  %v203_v52 = vand.u32 2147483647, %v2185_v17  ;;  %v99_v26 = vmul.f32 %v98_v59, %v2152_v16  ;;  %vm2243_vm8 = vmor %vm199_vm4, %vm200_vm5 }
 0x11c   :  { %v2208_v41 = vpop.eup %1366  ;;  %v364_v62 = vmul.f32 2.1237322e-06, %v2173_v58  ;;  %1368 = vrcp.f32 %v2221_v57  ;;  %vm239_vm6 = vweird.f32 %v2197_v32  ;;  %v205_v1 = vand.u32 2147483648, %v2185_v17 }
 0x11d   :  { %v235_v23 = vmul.f32 %v2208_v41, %v2197_v32  ;;  %v197_v13 = vmul.f32 %v2206_v19, %v196_v48  ;;  %v221_v37 = vmul.f32 %v220_v7, %v2125_v50  ;;  %vm240_vm7 = vweird.f32 %v2208_v41  ;;  %v306_v48 = vpop.xlane.xlu0 %305 }
 0x11e   :  { %v243_v43 = vand.u32 2147483647, %v2197_v32  ;;  %v245_v4 = vand.u32 2147483648, %v2197_v32  ;;  %v1144_v61 = vmul.f32 %v2010_v49, %v1140_v56  ;;  %v420_v30 = vadd.f32 0.112945676, %v419_v28  ;;  %vm2248_vm9 = vmor %vm239_vm6, %vm240_vm7 }
 0x11f   :  { %v236_v35 = vsub.f32 1.0, %v235_v23  ;;  %v198_v22 = vadd.f32 %v2206_v19, %v197_v13  ;;  %v182_v38 = vadd.f32 1.1283791, %v181_v54  ;;  %v100_v20 = vadd.f32 0.18741608, %v99_v26 }
 0x120   :  { %v365_v32 = vadd.f32 0.00028619796, %v364_v62  ;;  %1153 = vrot.lane.b32.xlu2 %v1144_v61, %s1401_s3  ;;  %v2254_v49 = vadd.f32 %v2080_v2, %v75_v21  ;;  %vm2256_vm10 = vcmp.eq.f32.partialorder %v203_v52, 8.507059e+37  ;;  %v222_v24 = vadd.f32 1.1283791, %v221_v37 }
 0x121   :  { %v237_v3 = vmul.f32 %v2208_v41, %v236_v35  ;;  %v381_v51 = vmul.f32 %v380_v8, %v2173_v58  ;;  %v2262_v9 = vadd.f32 %v2131_v6, %v297_v55  ;;  %v206_v39 = vor.u32 1.1754944e-38, %v205_v1 }
 0x122   :  { %vm2264_vm11 = vcmp.eq.f32.partialorder %v243_v43, 8.507059e+37  ;;  %v246_v31 = vor.u32 1.1754944e-38, %v245_v4  ;;  %v404_v23 = vmul.f32 2.1237322e-06, %v2190_v45  ;;  %v2269_v2 = vpop.eup %1368  ;;  %v202_v5 = vsel %vm2243_vm8, %v2206_v19, %v198_v22 }
 0x123   :  { %v238_v50 = vadd.f32 %v2208_v41, %v237_v3  ;;  %v421_v14 = vmul.f32 %v420_v30, %v2190_v45  ;;  %v2279_v42 = vmul.f32 0.70710677, %v2254_v49  ;;  %v101_v11 = vmul.f32 %v100_v20, %v2152_v16 }
 0x124   :  { %v366_v10 = vmul.f32 %v365_v32, %v2173_v58  ;;  %v2284_v53 = vmul.f32 0.70710677, %v2262_v9  ;;  %v183_v35 = vmul.f32 %v182_v38, %v2092_v60  ;;  %v223_v19 = vmul.f32 %v222_v24, %v2112_v46 }
 0x125   :  { %v242_v47 = vsel %vm2248_vm9, %v2208_v41, %v238_v50  ;;  %v382_v15 = vadd.f32 0.4994258, %v381_v51  ;;  %v131_v41 = vmul.f32 %v2279_v42, %v2279_v42  ;;  %v85_v29 = vmul.f32 0.5, %v2085_v40 }
 0x126   :  { %v207_v59 = vsel %vm2256_vm10, %v206_v39, %v202_v5  ;;  %v115_v16 = vmul.f32 %v2269_v2, %v2221_v57  ;;  %v247_v7 = vsel %vm2264_vm11, %v246_v31, %v242_v47  ;;  %v405_v56 = vadd.f32 0.00028619796, %v404_v23 }
 0x127   :  { %v422_v54 = vadd.f32 0.4994258, %v421_v14  ;;  %v2297_v60 = vmin.f32 %v131_v41, 16.0  ;;  %v2300_v46 = vadd.f32 %v2131_v6, %v306_v48  ;;  %v2302_v8 = vadd.f32 1.1283791, %v101_v11 }
 0x128   :  { %v86_v40 = vmul.f32 0.5, %v2103_v44  ;;  %v367_v55 = vadd.f32 0.0036580483, %v366_v10  ;;  %v322_v13 = vmul.f32 %v2284_v53, %v2284_v53  ;;  %v208_v3 = vmul.f32 %v207_v59, %v183_v35 }
 0x129   :  { %v248_v28 = vmul.f32 %v247_v7, %v223_v19  ;;  %v383_v52 = vmul.f32 %v382_v15, %v2173_v58  ;;  %v133_v26 = vmul.f32 2.1237322e-06, %v2297_v60  ;;  %v116_v62 = vsub.f32 1.0, %v115_v16 }
 0x12a   :  { %vm119_vm12 = vweird.f32 %v2221_v57  ;;  %v123_v6 = vand.u32 2147483647, %v2221_v57  ;;  %v144_v37 = vmul.f32 3.8918573e-05, %v2297_v60  ;;  %v2312_v21 = vmin.f32 %v322_v13, 16.0 }
 0x12b   :  { %v406_v44 = vmul.f32 %v405_v56, %v2190_v45  ;;  %v423_v1 = vmul.f32 %v422_v54, %v2190_v45  ;;  %v134_v43 = vadd.f32 0.00028619796, %v133_v26  ;;  %v2317_v4 = vmul.f32 0.70710677, %v2300_v46 }
 0x12c   :  { %v125_v61 = vand.u32 2147483648, %v2221_v57  ;;  %v368_v22 = vmul.f32 %v367_v55, %v2173_v58  ;;  %v145_v36 = vadd.f32 0.001143296, %v144_v37  ;;  %v335_v50 = vmul.f32 3.8918573e-05, %v2312_v21 }
 0x12d   :  { %v1295_v30 = vclamps-f32 %v208_v3, 1.0  ;;  %v1296_v38 = vclamps-f32 %v248_v28, 1.0  ;;  %v2322_v20 = vadd.f32 1.0, %v383_v52  ;;  %v135_v25 = vmul.f32 %v134_v43, %v2297_v60 }
 0x12e   :  { %v146_v32 = vmul.f32 %v145_v36, %v2297_v60  ;;  %v324_v17 = vmul.f32 2.1237322e-06, %v2312_v21  ;;  %v336_v24 = vadd.f32 0.001143296, %v335_v50  ;;  %v442_v51 = vmul.f32 %v2317_v4, %v2317_v4 }
 0x12f   :  { %v117_v39 = vmul.f32 %v2269_v2, %v116_v62  ;;  %v407_v0 = vadd.f32 0.0036580483, %v406_v44  ;;  %v2330_v31 = vadd.f32 1.0, %v423_v1  ;;  %v136_v23 = vadd.f32 0.0036580483, %v135_v25 }
 0x130   :  { %vm2332_vm13 = vcmp.eq.f32.partialorder %v123_v6, 8.507059e+37  ;;  %v147_v47 = vadd.f32 0.014752088, %v146_v32  ;;  %v325_v14 = vadd.f32 0.00028619796, %v324_v17  ;;  %v337_v11 = vmul.f32 %v336_v24, %v2312_v21 }
 0x131   :  { %v2337_v10 = vmin.f32 %v442_v51, 16.0  ;;  %v253_v48 = vadd.f32 1.0, %v1295_v30  ;;  %vm120_vm14 = vweird.f32 %v2269_v2  ;;  %v254_v35 = vadd.f32 1.0, %v1296_v38 }
 0x132   :  { %v137_v19 = vmul.f32 %v136_v23, %v2297_v60  ;;  %v148_v15 = vmul.f32 %v147_v47, %v2297_v60  ;;  %v326_v41 = vmul.f32 %v325_v14, %v2312_v21  ;;  %v338_v59 = vadd.f32 0.014752088, %v337_v11  ;;  %vm2353_vm15 = vmor %vm119_vm12, %vm120_vm14 }
 0x133   :  { %v444_v16 = vmul.f32 2.1237322e-06, %v2337_v10  ;;  %v118_v7 = vadd.f32 %v2269_v2, %v117_v39  ;;  %v408_v56 = vmul.f32 %v407_v0, %v2190_v45  ;;  %1370 = vrcp.f32 %v2330_v31 }
 0x134   :  { %v455_v54 = vmul.f32 3.8918573e-05, %v2337_v10  ;;  %v149_v55 = vadd.f32 0.112945676, %v148_v15  ;;  %v327_v13 = vadd.f32 0.0036580483, %v326_v41  ;;  %v339_v3 = vmul.f32 %v338_v59, %v2312_v21 }
 0x135   :  { %v445_v28 = vadd.f32 0.00028619796, %v444_v16  ;;  %v257_v52 = vmul.f32 %v253_v48, %v85_v29  ;;  %v258_v62 = vmul.f32 %v254_v35, %v86_v40  ;;  %1372 = vrcp.f32 %v2322_v20 }
 0x136   :  { %v456_v6 = vadd.f32 0.001143296, %v455_v54  ;;  %v138_v37 = vadd.f32 0.05243302, %v137_v19  ;;  %v150_v44 = vmul.f32 %v149_v55, %v2297_v60  ;;  %v328_v1 = vmul.f32 %v327_v13, %v2312_v21 }
 0x137   :  { %v340_v43 = vadd.f32 0.112945676, %v339_v3  ;;  %v126_v36 = vor.u32 1.1754944e-38, %v125_v61  ;;  %v409_v29 = vadd.f32 0.05243302, %v408_v56  ;;  %v446_v50 = vmul.f32 %v445_v28, %v2337_v10 }
 0x138   :  { %v457_v57 = vmul.f32 %v456_v6, %v2337_v10  ;;  %v122_v30 = vsel %vm2353_vm15, %v2269_v2, %v118_v7  ;;  %v369_v40 = vadd.f32 0.05243302, %v368_v22  ;;  %v151_v38 = vadd.f32 0.4994258, %v150_v44 }
 0x139   :  { %v341_v25 = vmul.f32 %v340_v43, %v2312_v21  ;;  %v2366_v32 = vpop.eup %1370  ;;  %v103_v17 = vmul.f32 %v2302_v8, %v2138_v34  ;;  %v329_v24 = vadd.f32 0.05243302, %v328_v1  ;;  %v447_v61 = vadd.f32 0.0036580483, %v446_v50 }
 0x13a   :  { %v458_v51 = vadd.f32 0.014752088, %v457_v57  ;;  %v139_v39 = vmul.f32 %v138_v37, %v2297_v60  ;;  %v152_v0 = vmul.f32 %v151_v38, %v2297_v60  ;;  %v260_v47 = vpack.c.bf16 %v258_v62, %v257_v52 }
 0x13b   :  { %v342_v23 = vadd.f32 0.4994258, %v341_v25  ;;  %v2372_v14 = vpop.eup %1372  ;;  %v127_v2 = vsel %vm2332_vm13, %v126_v36, %v122_v30  ;;  %v410_v22 = vmul.f32 %v409_v29, %v2190_v45  ;;  %v448_v11 = vmul.f32 %v447_v61, %v2337_v10 }
 0x13c   :  { %v459_v34 = vmul.f32 %v458_v51, %v2337_v10  ;;  %v426_v8 = vmul.f32 %v2366_v32, %v2330_v31  ;;  %v2381_v48 = vadd.f32 1.0, %v152_v0  ;;  %1298 = vmatmul.msk.bf16.vlgmr.msra.gmra.mxu3 %vm57_vm0, %v260_v47  ;;  %v14_v5 = vstv %s2530_s6 }
 0x13d   :  { %v343_v35 = vmul.f32 %v342_v23, %v2312_v21  ;;  %v330_v19 = vmul.f32 %v329_v24, %v2312_v21  ;;  %15 = vst [vmem:[#allocation2] sm:$0x1] %v14_v5  ;;  %v370_v41 = vmul.f32 %v369_v40, %v2173_v58  ;;  %v386_v59 = vmul.f32 %v2372_v14, %v2322_v20 }
 0x13e   :  { %v460_v15 = vadd.f32 0.112945676, %v459_v34  ;;  %v140_v16 = vadd.f32 0.18741608, %v139_v39  ;;  %1374 = vrcp.f32 %v2381_v48  ;;  %v128_v7 = vmul.f32 %v127_v2, %v103_v17 }
 0x13f   :  { %v2393_v56 = vadd.f32 1.0, %v343_v35  ;;  %v449_v54 = vadd.f32 0.05243302, %v448_v11  ;;  %v411_v13 = vadd.f32 0.18741608, %v410_v22  ;;  %v427_v3 = vsub.f32 1.0, %v426_v8 }
 0x140   :  { %v461_v55 = vmul.f32 %v460_v15, %v2337_v10  ;;  %v2397_v28 = vmul.f32 0.5, %v2121_v27  ;;  %v436_v52 = vand.u32 2147483648, %v2330_v31  ;;  %v331_v26 = vadd.f32 0.18741608, %v330_v19 }
 0x141   :  { %1376 = vrcp.f32 %v2393_v56  ;;  %v2401_v62 = vadd.f32 0.18741608, %v370_v41  ;;  %v387_v6 = vsub.f32 1.0, %v386_v59  ;;  %v141_v37 = vmul.f32 %v140_v16, %v2297_v60 }
 0x142   :  { %v462_v44 = vadd.f32 0.4994258, %v461_v55  ;;  %v1293_v1 = vclamps-f32 %v128_v7, 1.0  ;;  %vm430_vm1 = vweird.f32 %v2330_v31  ;;  %v2406_v43 = vmul.f32 0.5, %v2254_v49 }
 0x143   :  { %v450_v27 = vmul.f32 %v449_v54, %v2337_v10  ;;  %v412_v29 = vmul.f32 %v411_v13, %v2190_v45  ;;  %v428_v50 = vmul.f32 %v2366_v32, %v427_v3  ;;  %v434_v57 = vand.u32 2147483647, %v2330_v31 }
 0x144   :  { %v1375_v36 = vpop.eup %1374  ;;  %v463_v30 = vmul.f32 %v462_v44, %v2337_v10  ;;  %v437_v40 = vor.u32 1.1754944e-38, %v436_v52  ;;  %v165_v38 = vand.u32 2147483648, %v2381_v48  ;;  %v332_v25 = vmul.f32 %v331_v26, %v2312_v21 }
 0x145   :  { %v155_v60 = vmul.f32 %v1375_v36, %v2381_v48  ;;  %vm431_vm2 = vweird.f32 %v2366_v32  ;;  %v142_v49 = vadd.f32 1.1283791, %v141_v37  ;;  %vm159_vm3 = vweird.f32 %v2381_v48 }
 0x146   :  { %v2418_v17 = vadd.f32 1.0, %v463_v30  ;;  %vm160_vm4 = vweird.f32 %v1375_v36  ;;  %v163_v61 = vand.u32 2147483647, %v2381_v48  ;;  %v451_v51 = vadd.f32 0.18741608, %v450_v27  ;;  %vm2426_vm5 = vmor %vm430_vm1, %vm431_vm2 }
 0x147   :  { %v1377_v45 = vpop.eup %1376  ;;  %v156_v24 = vsub.f32 1.0, %v155_v60  ;;  %v413_v39 = vadd.f32 1.1283791, %v412_v29  ;;  %v429_v0 = vadd.f32 %v2366_v32, %v428_v50  ;;  %v166_v2 = vor.u32 1.1754944e-38, %v165_v38  ;;  %vm2433_vm6 = vmor %vm159_vm3, %vm160_vm4 }
 0x148   :  { %v346_v23 = vmul.f32 %v1377_v45, %v2393_v56  ;;  %1378 = vrcp.f32 %v2418_v17  ;;  %v333_v22 = vadd.f32 1.1283791, %v332_v25  ;;  %v356_v11 = vand.u32 2147483648, %v2393_v56 }
 0x149   :  { %v157_v47 = vmul.f32 %v1375_v36, %v156_v24  ;;  %vm350_vm7 = vweird.f32 %v2393_v56  ;;  %vm351_vm8 = vweird.f32 %v1377_v45  ;;  %v354_v31 = vand.u32 2147483647, %v2393_v56 }
 0x14a   :  { %v347_v8 = vsub.f32 1.0, %v346_v23  ;;  %vm390_vm9 = vweird.f32 %v2322_v20  ;;  %v143_v35 = vmul.f32 %v142_v49, %v2279_v42  ;;  %vm164_vm10 = vcmp.eq.f32.partialorder %v163_v61, 8.507059e+37  ;;  %vm2451_vm12 = vmor %vm350_vm7, %vm351_vm8 }
 0x14b   :  { %v158_v5 = vadd.f32 %v1375_v36, %v157_v47  ;;  %v452_v19 = vmul.f32 %v451_v51, %v2337_v10  ;;  %v388_v48 = vmul.f32 %v2372_v14, %v387_v6  ;;  %v433_v15 = vsel %vm2426_vm5, %v2366_v32, %v429_v0 }
 0x14c   :  { %vm435_vm11 = vcmp.eq.f32.partialorder %v434_v57, 8.507059e+37  ;;  %v348_v41 = vmul.f32 %v1377_v45, %v347_v8  ;;  %v251_v59 = vadd.f32 1.0, %v1293_v1  ;;  %v414_v16 = vmul.f32 %v413_v39, %v2165_v12 }
 0x14d   :  { %v162_v7 = vsel %vm2433_vm6, %v1375_v36, %v158_v5  ;;  %v357_v10 = vor.u32 1.1754944e-38, %v356_v11  ;;  %v334_v13 = vmul.f32 %v333_v22, %v2284_v53  ;;  %vm355_vm13 = vcmp.eq.f32.partialorder %v354_v31, 8.507059e+37  ;;  %v712_v22 = vpop.permute.xlu2 %711 }
 0x14e   :  { %v1379_v54 = vpop.eup %1378  ;;  %v167_v55 = vsel %vm164_vm10, %v166_v2, %v162_v7  ;;  %v349_v32 = vadd.f32 %v1377_v45, %v348_v41  ;;  %v438_v3 = vsel %vm435_vm11, %v437_v40, %v433_v15  ;;  %v453_v26 = vadd.f32 1.1283791, %v452_v19  ;;  %v1397_v41 = vld [vmem:[%s2528_s5] ss:$0 sm:$0xff] }
 0x14f   :  { %v168_v52 = vmul.f32 %v167_v55, %v143_v35  ;;  %v466_v12 = vmul.f32 %v1379_v54, %v2418_v17  ;;  %vm470_vm14 = vweird.f32 %v2418_v17  ;;  %v474_v56 = vand.u32 2147483647, %v2418_v17 }
 0x150   :  { %v353_v6 = vsel %vm2451_vm12, %v1377_v45, %v349_v32  ;;  %v476_v37 = vand.u32 2147483648, %v2418_v17  ;;  %vm471_vm15 = vweird.f32 %v1379_v54  ;;  %v372_v53 = vmul.f32 %v2401_v62, %v2173_v58 }
 0x151   :  { %v1294_v44 = vclamps-f32 %v168_v52, 1.0  ;;  %v358_v1 = vsel %vm355_vm13, %v357_v10, %v353_v6  ;;  %v467_v27 = vsub.f32 1.0, %v466_v12  ;;  %v394_v36 = vand.u32 2147483647, %v2322_v20  ;;  %vm2471_vm2 = vmor %vm470_vm14, %vm471_vm15 }
 0x152   :  { %v396_v29 = vand.u32 2147483648, %v2322_v20  ;;  %v359_v50 = vmul.f32 %v358_v1, %v334_v13  ;;  %v255_v57 = vmul.f32 %v251_v59, %v2397_v28  ;;  %vm391_vm1 = vweird.f32 %v2372_v14 }
 0x153   :  { %v252_v30 = vadd.f32 1.0, %v1294_v44  ;;  %v468_v40 = vmul.f32 %v1379_v54, %v467_v27  ;;  %v389_v60 = vadd.f32 %v2372_v14, %v388_v48  ;;  %v439_v38 = vmul.f32 %v438_v3, %v414_v16  ;;  %vm2481_vm4 = vmor %vm390_vm9, %vm391_vm1 }
 0x154   :  { %v1299_v25 = vclamps-f32 %v359_v50, 1.0  ;;  %v477_v58 = vor.u32 1.1754944e-38, %v476_v37  ;;  %v454_v28 = vmul.f32 %v453_v26, %v2317_v4  ;;  %vm475_vm3 = vcmp.eq.f32.partialorder %v474_v56, 8.507059e+37 }
 0x155   :  { %v256_v24 = vmul.f32 %v252_v30, %v2406_v43  ;;  %v469_v61 = vadd.f32 %v1379_v54, %v468_v40  ;;  %v373_v51 = vadd.f32 1.1283791, %v372_v53  ;;  %v314_v39 = vmul.f32 0.5, %v2262_v9 }
 0x156   :  { %v710_v62 = vpop.permute.xlu1 %709  ;;  %v482_v0 = vadd.f32 1.0, %v1299_v25  ;;  %v397_v21 = vor.u32 1.1754944e-38, %v396_v29  ;;  %v393_v47 = vsel %vm2481_vm4, %v2372_v14, %v389_v60  ;;  %vm395_vm5 = vcmp.eq.f32.partialorder %v394_v36, 8.507059e+37 }
 0x157   :  { %v473_v23 = vsel %vm2471_vm2, %v1379_v54, %v469_v61  ;;  %v259_v43 = vpack.c.bf16 %v256_v24, %v255_v57  ;;  %v1301_v2 = vclamps-f32 %v439_v38, 1.0  ;;  %v374_v11 = vmul.f32 %v373_v51, %v2149_v63  ;;  %v1337_v63 = vld [vmem:[#allocation2] ss:$0 sm:$0xff]  ;;  %v716_v54 = vpop.permute.xlu2 %715 }
 0x158   :  { %v714_v45 = vpop.permute.xlu0 %713  ;;  %v478_v4 = vsel %vm475_vm3, %v477_v58, %v473_v23  ;;  %v486_v9 = vmul.f32 %v482_v0, %v314_v39  ;;  %v398_v8 = vsel %vm395_vm5, %v397_v21, %v393_v47  ;;  %v316_v31 = vmul.f32 0.5, %v2156_v18 }
 0x159   :  { %v479_v20 = vmul.f32 %v478_v4, %v454_v28  ;;  %1297 = vmatmul.msk.bf16.vlgmr.msra.gmra.mxu1 %vm57_vm0, %v259_v43  ;;  %v484_v35 = vadd.f32 1.0, %v1301_v2  ;;  %v317_v5 = vmul.f32 0.5, %v2300_v46  ;;  %v399_v14 = vmul.f32 %v398_v8, %v374_v11 }
 0x15a   :  { %v493_v59 = vmul.f32 %v1397_v41, %v486_v9  ;;  %v315_v46 = vmul.f32 0.5, %v2134_v33  ;;  %v1402_v37 = vmov 0  }
 0x15b   :  { %v1302_v34 = vclamps-f32 %v479_v20, 1.0  ;;  %v488_v16 = vmul.f32 %v484_v35, %v316_v31  ;;  %v1300_v42 = vclamps-f32 %v399_v14, 1.0  ;;  %1332 = vset.pattern.permute.xlu1 %v1402_v37  ;;  %1331 = vset.pattern.permute.xlu2 %v1402_v37 }
 0x15c   :  { %v500_v10 = vadd.f32 %v1337_v63, %v493_v59  ;;  %1333 = vset.pattern.permute.xlu0 %v1402_v37 }
 0x15d   :  { %v485_v19 = vadd.f32 1.0, %v1302_v34  ;;  %v495_v13 = vmul.f32 %v1397_v41, %v488_v16  ;;  %v483_v32 = vadd.f32 1.0, %v1300_v42 }
 0x15e   :  { %v931_v48 = vpop.permute.xlu1 %930  ;;  %v721_v18 = vadd.f32 %v710_v62, %v500_v10 }
 0x15f   :  { %v489_v7 = vmul.f32 %v485_v19, %v317_v5  ;;  %v502_v6 = vadd.f32 %v1337_v63, %v495_v13  ;;  %v487_v44 = vmul.f32 %v483_v32, %v315_v46  ;;  %v935_v36 = vpop.permute.xlu2 %934 }
 0x160   :  { %v933_v15 = vpop.permute.xlu0 %932  ;;  %v942_v3 = vadd.f32 %v931_v48, %v721_v18 }
 0x161   :  { %v496_v55 = vmul.f32 %v1397_v41, %v489_v7  ;;  %v723_v1 = vadd.f32 %v714_v45, %v502_v6  ;;  %v494_v29 = vmul.f32 %v1397_v41, %v487_v44 }
 0x163   :  { %v503_v12 = vadd.f32 %v1337_v63, %v496_v55  ;;  %v944_v33 = vadd.f32 %v935_v36, %v723_v1  ;;  %v501_v25 = vadd.f32 %v1337_v63, %v494_v29  ;;  %v1338_v36 = vld [vmem:[%s2531_s7] ss:$0 sm:$0xff] }
 0x164   :  { %v1339_v29 = vld [vmem:[%s2532_s8] ss:$0 sm:$0xff] }
 0x165   :  { %v724_v53 = vadd.f32 %v716_v54, %v503_v12  ;;  %v722_v24 = vadd.f32 %v712_v22, %v501_v25 }
 0x166   :  { %v937_v52 = vpop.permute.xlu1 %936 }
 0x167   :  { %v945_v50 = vadd.f32 %v937_v52, %v724_v53  ;;  %v943_v45 = vadd.f32 %v933_v15, %v722_v24 }
 0x168   :  { %v1152_v26 = vpop.permute.xlu0 %1151 }
 0x169   :  { %v1163_v56 = vadd.f32 %v1152_v26, %v942_v3 }
 0x16b   :  { %v1315_v27 = vmul.f32 -1.442695, %v1163_v56 }
 0x16d   :  { %1380 = vpow2.f32 %v1315_v27 }
 0x173   :  { %v1381_v38 = vpop.eup %1380 }
 0x174   :  { %v1179_v62 = vadd.f32 1.0, %v1381_v38 }
 0x175   :  { %v1156_v57 = vpop.permute.xlu1 %1155 }
 0x176   :  { %v1165_v40 = vadd.f32 %v1156_v57, %v944_v33  ;;  %v1194_v47 = vand.u32 2147483648, %v1179_v62  ;;  %v1192_v20 = vand.u32 2147483647, %v1179_v62  ;;  %vm1188_vm7 = vweird.f32 %v1179_v62 }
 0x178   :  { %v1317_v49 = vmul.f32 -1.442695, %v1165_v40  ;;  %v1195_v9 = vor.u32 1.1754944e-38, %v1194_v47  ;;  %vm1193_vm9 = vcmp.eq.f32.partialorder %v1192_v20, 8.507059e+37  ;;  %v1398_v40 = vld [vmem:[%s2529_s2] ss:$0 sm:$0xff] }
 0x17a   :  { %1382 = vpow2.f32 %v1317_v49  ;;  %v1154_v28 = vpop.permute.xlu2 %1153 }
 0x17b   :  { %1384 = vrcp.f32 %v1179_v62  ;;  %v1164_v51 = vadd.f32 %v1154_v28, %v943_v45 }
 0x17d   :  { %v1316_v23 = vmul.f32 -1.442695, %v1164_v51 }
 0x17e   :  { %v1158_v30 = vpop.permute.xlu0 %1157 }
 0x17f   :  { %v1166_v60 = vadd.f32 %v1158_v30, %v945_v50 }
 0x180   :  { %v1383_v61 = vpop.eup %1382 }
 0x181   :  { %v1318_v58 = vmul.f32 -1.442695, %v1166_v60  ;;  %v1385_v17 = vpop.eup %1384  ;;  %v1181_v39 = vadd.f32 1.0, %v1383_v61 }
 0x182   :  { %v1184_v43 = vmul.f32 %v1385_v17, %v1179_v62  ;;  %vm1189_vm6 = vweird.f32 %v1385_v17 }
 0x183   :  { %1386 = vpow2.f32 %v1318_v58  ;;  %vm1190_vm8 = vmor %vm1188_vm7, %vm1189_vm6  ;;  %v1224_v14 = vand.u32 2147483648, %v1181_v39  ;;  %v1222_v59 = vand.u32 2147483647, %v1181_v39  ;;  %vm1218_vm11 = vweird.f32 %v1181_v39 }
 0x184   :  { %1388 = vrcp.f32 %v1181_v39  ;;  %v1185_v4 = vsub.f32 1.0, %v1184_v43 }
 0x185   :  { %1390 = vpow2.f32 %v1316_v23  ;;  %v1225_v54 = vor.u32 1.1754944e-38, %v1224_v14  ;;  %vm1223_vm14 = vcmp.eq.f32.partialorder %v1222_v59, 8.507059e+37 }
 0x186   :  { %v1186_v2 = vmul.f32 %v1385_v17, %v1185_v4 }
 0x188   :  { %v1187_v22 = vadd.f32 %v1385_v17, %v1186_v2 }
 0x189   :  { %v1387_v0 = vpop.eup %1386 }
 0x18a   :  { %v1182_v21 = vadd.f32 1.0, %v1387_v0  ;;  %v1389_v11 = vpop.eup %1388  ;;  %v1191_v8 = vsel %vm1190_vm8, %v1385_v17, %v1187_v22 }
 0x18b   :  { %v1391_v34 = vpop.eup %1390  ;;  %v1214_v31 = vmul.f32 %v1389_v11, %v1181_v39  ;;  %v1196_v19 = vsel %vm1193_vm9, %v1195_v9, %v1191_v8  ;;  %vm1219_vm10 = vweird.f32 %v1389_v11 }
 0x18c   :  { %1392 = vrcp.f32 %v1182_v21  ;;  %v1180_v5 = vadd.f32 1.0, %v1391_v34  ;;  %1246 = vperm.xlu2 %1331, %v1196_v19   ;;  %v1239_v7 = vand.u32 2147483648, %v1182_v21  ;;  %v1237_v10 = vand.u32 2147483647, %v1182_v21  ;;  %vm1220_vm13 = vmor %vm1218_vm11, %vm1219_vm10 }
 0x18d   :  { %v1215_v48 = vsub.f32 1.0, %v1214_v31  ;;  %vm1233_vm15 = vweird.f32 %v1182_v21 }
 0x18e   :  { %1394 = vrcp.f32 %v1180_v5  ;;  %v1240_v32 = vor.u32 1.1754944e-38, %v1239_v7  ;;  %vm1238_vm2 = vcmp.eq.f32.partialorder %v1237_v10, 8.507059e+37  ;;  %v1209_v6 = vand.u32 2147483648, %v1180_v5 }
 0x18f   :  { %v1216_v41 = vmul.f32 %v1389_v11, %v1215_v48  ;;  %v1207_v37 = vand.u32 2147483647, %v1180_v5  ;;  %vm1203_vm4 = vweird.f32 %v1180_v5 }
 0x190   :  { %v1210_v1 = vor.u32 1.1754944e-38, %v1209_v6 }
 0x191   :  { %v1217_v63 = vadd.f32 %v1389_v11, %v1216_v41  ;;  %vm1208_vm6 = vcmp.eq.f32.partialorder %v1207_v37, 8.507059e+37 }
 0x192   :  { %v1393_v35 = vpop.eup %1392 }
 0x193   :  { %v1229_v15 = vmul.f32 %v1393_v35, %v1182_v21  ;;  %vm1234_vm12 = vweird.f32 %v1393_v35  ;;  %v1221_v55 = vsel %vm1220_vm13, %v1389_v11, %v1217_v63 }
 0x194   :  { %v1395_v13 = vpop.eup %1394  ;;  %v1226_v46 = vsel %vm1223_vm14, %v1225_v54, %v1221_v55  ;;  %vm1235_vm1 = vmor %vm1233_vm15, %vm1234_vm12 }
 0x195   :  { %v1230_v16 = vsub.f32 1.0, %v1229_v15  ;;  %v1199_v3 = vmul.f32 %v1395_v13, %v1180_v5  ;;  %1256 = vperm.xlu0 %1333, %v1226_v46   ;;  %vm1204_vm3 = vweird.f32 %v1395_v13 }
 0x196   :  { %vm1205_vm5 = vmor %vm1203_vm4, %vm1204_vm3 }
 0x197   :  { %v1231_v42 = vmul.f32 %v1393_v35, %v1230_v16  ;;  %v1200_v12 = vsub.f32 1.0, %v1199_v3 }
 0x199   :  { %v1232_v18 = vadd.f32 %v1393_v35, %v1231_v42  ;;  %v1201_v56 = vmul.f32 %v1395_v13, %v1200_v12 }
 0x19b   :  { %v1236_v52 = vsel %vm1235_vm1, %v1393_v35, %v1232_v18  ;;  %v1202_v44 = vadd.f32 %v1395_v13, %v1201_v56 }
 0x19c   :  { %v1241_v26 = vsel %vm1238_vm2, %v1240_v32, %v1236_v52 }
 0x19d   :  { %1261 = vperm.xlu2 %1331, %v1241_v26   ;;  %v1206_v27 = vsel %vm1205_vm5, %v1395_v13, %v1202_v44 }
 0x19e   :  { %v1211_v53 = vsel %vm1208_vm6, %v1210_v1, %v1206_v27 }
 0x19f   :  { %1251 = vperm.xlu1 %1332, %v1211_v53  }
 0x1bf   :  { %v281_v50 = vpop.f32.mrf.mxu3 }
 0x1c0   :  { %v282_v17 = vadd.f32 %v1398_v40, %v281_v50 }
 0x1c7   :  { %v283_v49 = vpop.f32.mrf.mxu3 }
 0x1c8   :  { %v284_v24 = vadd.f32 %v1398_v40, %v283_v49 }
 0x1d6   :  { %v276_v30 = vpop.f32.mrf.mxu1 }
 0x1d7   :  { %v277_v60 = vadd.f32 %v1398_v40, %v276_v30 }
 0x1de   :  { %v278_v23 = vpop.f32.mrf.mxu1 }
 0x1df   :  { %v279_v4 = vadd.f32 %v1398_v40, %v278_v23 }
 0x1e6   :  { %v1247_v33 = vpop.permute.xlu2 %1246 }
 0x1e7   :  { %v1267_v57 = vmul.f32 %v1338_v36, %v1247_v33 }
 0x1e9   :  { %v1275_v38 = vadd.f32 %v1339_v29, %v1267_v57 }
 0x1eb   :  { %v1279_v25 = vmul.f32 %v1275_v38, %v277_v60 }
 0x1ed   :  { %1283 = vst.msk [vmem:[%s2533_s9] sm:$0xff] %vm57_vm0, %v1279_v25 }
 0x1f7   :  { %v1262_v58 = vpop.permute.xlu2 %1261 }
 0x1f8   :  { %v1270_v62 = vmul.f32 %v1338_v36, %v1262_v58 }
 0x1fa   :  { %v1278_v45 = vadd.f32 %v1339_v29, %v1270_v62 }
 0x1fc   :  { %v1282_v28 = vmul.f32 %v1278_v45, %v284_v24 }
 0x1fe   :  { %1286 = vst.msk [vmem:[%s2533_s9 + $0x18] sm:$0xff] %vm57_vm0, %v1282_v28 }
 0x207   :  { %v1257_v61 = vpop.permute.xlu0 %1256 }
 0x208   :  { %v1269_v51 = vmul.f32 %v1338_v36, %v1257_v61 }
 0x20a   :  { %v1277_v39 = vadd.f32 %v1339_v29, %v1269_v51 }
 0x20c   :  { %v1281_v0 = vmul.f32 %v1277_v39, %v282_v17 }
 0x20e   :  { %1285 = vst.msk [vmem:[%s2533_s9 + $0x10] sm:$0xff] %vm57_vm0, %v1281_v0 }
 0x211   :  { %v1252_v43 = vpop.permute.xlu1 %1251 }
 0x212   :  { %v1268_v21 = vmul.f32 %v1338_v36, %v1252_v43 }
 0x214   :  { %v1276_v47 = vadd.f32 %v1339_v29, %v1268_v21 }
 0x216   :  { %v1280_v2 = vmul.f32 %v1276_v47, %v279_v4 }
 0x218   :  { %1284 = vst.msk [vmem:[%s2533_s9 + $0x8] sm:$0xff] %vm57_vm0, %v1280_v2 }

// kernel: teacher_forward.10
= control target key start
LH: loop header
LB: loop body
LE: loop exit
PB: predicated region body
PF: predicated region fallthrough
CT: control target
= control target key end

     0   :  { %vm369_vm0 = vcmask 523264   ;;  %s929_s1 = inlined_call_operand.vmem [shape: bf16[576,64], index: 1, kind: input, shape index: {}]   ;;  %s930_s2 = inlined_call_operand.vmem [shape: f32[1,64], index: 2, kind: input, shape index: {}]   ;;  %s931_s0 = inlined_call_operand.vmem [shape: bf16[32,576], index: 0, kind: input, shape index: {}]   ;;  %s932_s3 = inlined_call_operand.vmem [shape: f32[32,64], index: 3, kind: output, shape index: {}]  }
   0x1   :  { %v686_v0 = vld [vmem:[%s929_s1 + $0x38] sm:$0xff]  ;;  %v685_v4 = vld [vmem:[%s929_s1 + $0x30] sm:$0xff]  ;;  %v684_v8 = vld [vmem:[%s929_s1 + $0x28] sm:$0xff] }
   0x2   :  { %v694_v1 = vld [vmem:[%s929_s1 + $0x78] sm:$0xff]  ;;  %376 = vmatpush.bf16.msra.mxu0 %v686_v0  ;;  %v693_v5 = vld [vmem:[%s929_s1 + $0x70] sm:$0xff]  ;;  %v692_v9 = vld [vmem:[%s929_s1 + $0x68] sm:$0xff] }
   0x3   :  { %v702_v2 = vld [vmem:[%s929_s1 + $0xb8] sm:$0xff]  ;;  %395 = vmatpush.bf16.msra.mxu1 %v694_v1  ;;  %v701_v6 = vld [vmem:[%s929_s1 + $0xb0] sm:$0xff]  ;;  %v700_v10 = vld [vmem:[%s929_s1 + $0xa8] sm:$0xff] }
   0x4   :  { %v710_v3 = vld [vmem:[%s929_s1 + $0xf8] sm:$0xff]  ;;  %414 = vmatpush.bf16.msra.mxu2 %v702_v2  ;;  %v709_v7 = vld [vmem:[%s929_s1 + $0xf0] sm:$0xff]  ;;  %v708_v11 = vld [vmem:[%s929_s1 + $0xe8] sm:$0xff] }
   0x5   :  { %433 = vmatpush.bf16.msra.mxu3 %v710_v3  ;;  %v683_v12 = vld [vmem:[%s929_s1 + $0x20] sm:$0xff]  ;;  %v682_v16 = vld [vmem:[%s929_s1 + $0x18] sm:$0xff]  ;;  %v681_v20 = vld [vmem:[%s929_s1 + $0x10] sm:$0xff] }
   0x6   :  { %377 = vmatpush.bf16.msra.mxu0 %v685_v4  ;;  %v691_v13 = vld [vmem:[%s929_s1 + $0x60] sm:$0xff]  ;;  %v690_v17 = vld [vmem:[%s929_s1 + $0x58] sm:$0xff]  ;;  %v689_v21 = vld [vmem:[%s929_s1 + $0x50] sm:$0xff] }
   0x7   :  { %396 = vmatpush.bf16.msra.mxu1 %v693_v5  ;;  %v699_v14 = vld [vmem:[%s929_s1 + $0xa0] sm:$0xff]  ;;  %v698_v18 = vld [vmem:[%s929_s1 + $0x98] sm:$0xff]  ;;  %v697_v22 = vld [vmem:[%s929_s1 + $0x90] sm:$0xff] }
   0x8   :  { %415 = vmatpush.bf16.msra.mxu2 %v701_v6  ;;  %v707_v15 = vld [vmem:[%s929_s1 + $0xe0] sm:$0xff]  ;;  %v706_v19 = vld [vmem:[%s929_s1 + $0xd8] sm:$0xff]  ;;  %v705_v23 = vld [vmem:[%s929_s1 + $0xd0] sm:$0xff] }
   0x9   :  { %434 = vmatpush.bf16.msra.mxu3 %v709_v7  ;;  %v680_v24 = vld [vmem:[%s929_s1 + $0x8] sm:$0xff]  ;;  %v679_v28 = vld [vmem:[%s929_s1] sm:$0xff]  ;;  %v671_v33 = vld [vmem:[%s931_s0 + $0x10] sm:$0xf0] }
   0xa   :  { %378 = vmatpush.bf16.msra.mxu0 %v684_v8  ;;  %v688_v25 = vld [vmem:[%s929_s1 + $0x48] sm:$0xff]  ;;  %v687_v29 = vld [vmem:[%s929_s1 + $0x40] sm:$0xff]  ;;  %v487_v35 = vld [vmem:[%s931_s0 + $0x14] sm:$0xf0] }
   0xb   :  { %397 = vmatpush.bf16.msra.mxu1 %v692_v9  ;;  %v696_v26 = vld [vmem:[%s929_s1 + $0x88] sm:$0xff]  ;;  %v695_v30 = vld [vmem:[%s929_s1 + $0x80] sm:$0xff]  ;;  %v672_v37 = vld [vmem:[%s931_s0 + $0x18] sm:$0xf0] }
   0xc   :  { %416 = vmatpush.bf16.msra.mxu2 %v700_v10  ;;  %v704_v27 = vld [vmem:[%s929_s1 + $0xc8] sm:$0xff]  ;;  %v703_v31 = vld [vmem:[%s929_s1 + $0xc0] sm:$0xff]  ;;  %v714_v40 = vld [vmem:[%s929_s1 + $0x118] sm:$0xff] }
   0xd   :  { %435 = vmatpush.bf16.msra.mxu3 %v708_v11  ;;  %v485_v32 = vld [vmem:[%s931_s0] sm:$0xf]  ;;  %v669_v34 = vld [vmem:[%s931_s0 + $0x4] sm:$0xf]  ;;  %v493_v36 = vld [vmem:[%s931_s0 + $0x8] sm:$0xf] }
   0xe   :  { %379 = vmatpush.bf16.msra.mxu0 %v683_v12  ;;  %v670_v38 = vld [vmem:[%s931_s0 + $0xc] sm:$0xf]  ;;  %v495_v39 = vld [vmem:[%s931_s0 + $0x1c] sm:$0xf0]  ;;  %v486_v41 = vor.u32 %v671_v33, %v485_v32  ;;  %v490_v42 = vor.u32 %v669_v34, %v487_v35  ;;  %v494_v43 = vor.u32 %v672_v37, %v493_v36  ;;  %v713_v45 = vld [vmem:[%s929_s1 + $0x110] sm:$0xff] }
   0xf   :  { %398 = vmatpush.bf16.msra.mxu1 %v691_v13  ;;  %v498_v44 = vor.u32 %v670_v38, %v495_v39  ;;  %v712_v46 = vld [vmem:[%s929_s1 + $0x108] sm:$0xff]  ;;  %v711_v47 = vld [vmem:[%s929_s1 + $0x100] sm:$0xff]  ;;  %v676_v49 = vld [vmem:[%s931_s0 + $0x38] sm:$0xf0] }
  0x10   :  { %417 = vmatpush.bf16.msra.mxu2 %v699_v14  ;;  %v505_v48 = vld [vmem:[%s931_s0 + $0x28] sm:$0xf]  ;;  %v674_v50 = vld [vmem:[%s931_s0 + $0x2c] sm:$0xf]  ;;  %v507_v51 = vld [vmem:[%s931_s0 + $0x3c] sm:$0xf0] }
  0x11   :  { %436 = vmatpush.bf16.msra.mxu3 %v707_v15  ;;  %v513_v52 = vld [vmem:[%s931_s0 + $0x30] sm:$0xf]  ;;  %v677_v53 = vld [vmem:[%s931_s0 + $0x40] sm:$0xf0]  ;;  %v675_v54 = vld [vmem:[%s931_s0 + $0x34] sm:$0xf]  ;;  %v506_v56 = vor.u32 %v676_v49, %v505_v48  ;;  %v510_v57 = vor.u32 %v674_v50, %v507_v51 }
  0x12   :  { %380 = vmatpush.bf16.msra.mxu0 %v682_v16  ;;  %v515_v55 = vld [vmem:[%s931_s0 + $0x44] sm:$0xf0]  ;;  %v514_v58 = vor.u32 %v677_v53, %v513_v52  ;;  %v501_v60 = vld [vmem:[%s931_s0 + $0x10] sm:$0xf]  ;;  %v673_v61 = vld [vmem:[%s931_s0 + $0x20] sm:$0xf0] }
  0x13   :  { %399 = vmatpush.bf16.msra.mxu1 %v690_v17  ;;  %v518_v59 = vor.u32 %v675_v54, %v515_v55  ;;  %v521_v62 = vld [vmem:[%s931_s0 + $0x38] sm:$0xf]  ;;  %v678_v63 = vld [vmem:[%s931_s0 + $0x48] sm:$0xf0]  ;;  %v502_v0 = vor.u32 %v673_v61, %v501_v60  ;;  %v719_v11 = vld [vmem:[%s930_s2] ss:$0 sm:$0xff] }
  0x14   :  { %418 = vmatpush.bf16.msra.mxu2 %v698_v18  ;;  %v522_v1 = vor.u32 %v678_v63, %v521_v62 }
  0x15   :  { %437 = vmatpush.bf16.msra.mxu3 %v706_v19 }
  0x16   :  { %381 = vmatpush.bf16.msra.mxu0 %v681_v20 }
  0x17   :  { %400 = vmatpush.bf16.msra.mxu1 %v689_v21 }
  0x18   :  { %419 = vmatpush.bf16.msra.mxu2 %v697_v22 }
  0x19   :  { %438 = vmatpush.bf16.msra.mxu3 %v705_v23 }
  0x1a   :  { %382 = vmatpush.bf16.msra.mxu0 %v680_v24 }
  0x1b   :  { %401 = vmatpush.bf16.msra.mxu1 %v688_v25 }
  0x1c   :  { %420 = vmatpush.bf16.msra.mxu2 %v696_v26 }
  0x1d   :  { %439 = vmatpush.bf16.msra.mxu3 %v704_v27 }
  0x1e   :  { %383 = vmatpush.bf16.msra.mxu0 %v679_v28 }
  0x1f   :  { %402 = vmatpush.bf16.msra.mxu1 %v687_v29 }
  0x20   :  { %421 = vmatpush.bf16.msra.mxu2 %v695_v30 }
  0x21   :  { %440 = vmatpush.bf16.msra.mxu3 %v703_v31  ;;  %384 = vmatmul.bf16.vlgmr.msra.gmra.mxu0 %v486_v41 }
  0x22   :  { %456 = vmatpush.bf16.msrb.mxu0 %v714_v40  ;;  %403 = vmatmul.bf16.vlgmr.msra.gmra.mxu1 %v490_v42 }
  0x23   :  { %715 = vmatpush.bf16.msrb.mxu1 %v714_v40  ;;  %422 = vmatmul.bf16.vlgmr.msra.gmra.mxu2 %v494_v43 }
  0x24   :  { %441 = vmatmul.bf16.vlgmr.msra.gmra.mxu3 %v498_v44 }
  0x26   :  { %457 = vmatpush.bf16.msrb.mxu0 %v713_v45 }
  0x27   :  { %716 = vmatpush.bf16.msrb.mxu1 %v713_v45 }
  0x2a   :  { %458 = vmatpush.bf16.msrb.mxu0 %v712_v46 }
  0x2b   :  { %717 = vmatpush.bf16.msrb.mxu1 %v712_v46 }
  0x2e   :  { %459 = vmatpush.bf16.msrb.mxu0 %v711_v47 }
  0x2f   :  { %718 = vmatpush.bf16.msrb.mxu1 %v711_v47 }
  0x31   :  { %389 = vmatmul.bf16.gmra.mxu0 %v506_v56 }
  0x32   :  { %408 = vmatmul.bf16.gmra.mxu1 %v510_v57 }
  0x33   :  { %427 = vmatmul.bf16.gmra.mxu2 %v514_v58 }
  0x34   :  { %446 = vmatmul.bf16.gmra.mxu3 %v518_v59 }
  0x41   :  { %667 = vmatmul.msk.bf16.vlgmr.msrb.gmra.mxu0 %vm369_vm0, %v502_v0 }
  0x42   :  { %668 = vmatmul.msk.bf16.vlgmr.msrb.gmra.mxu1 %vm369_vm0, %v522_v1 }
  0x9e   :  { %v385_v2 = vpop.f32.mrf.mxu0 }
  0x9f   :  { %v404_v3 = vpop.f32.mrf.mxu1  ;;  %v386_v13 = vadd.f32 %v719_v11, %v385_v2 }
  0xa1   :  { %v405_v18 = vadd.f32 %v404_v3, %v386_v13 }
  0xa6   :  { %v423_v4 = vpop.f32.mrf.mxu2  ;;  %v387_v6 = vpop.f32.mrf.mxu0 }
  0xa7   :  { %v442_v5 = vpop.f32.mrf.mxu3  ;;  %v406_v7 = vpop.f32.mrf.mxu1  ;;  %v424_v20 = vadd.f32 %v423_v4, %v405_v18  ;;  %v388_v23 = vadd.f32 %v719_v11, %v387_v6 }
  0xa9   :  { %v443_v25 = vadd.f32 %v442_v5, %v424_v20  ;;  %v407_v30 = vadd.f32 %v406_v7, %v388_v23 }
  0xae   :  { %v425_v8 = vpop.f32.mrf.mxu2  ;;  %v390_v9 = vpop.f32.mrf.mxu0 }
  0xaf   :  { %v409_v10 = vpop.f32.mrf.mxu1  ;;  %v444_v12 = vpop.f32.mrf.mxu3  ;;  %v391_v14 = vadd.f32 %v719_v11, %v390_v9  ;;  %v426_v34 = vadd.f32 %v425_v8, %v407_v30 }
  0xb1   :  { %v410_v19 = vadd.f32 %v409_v10, %v391_v14  ;;  %v445_v39 = vadd.f32 %v444_v12, %v426_v34 }
  0xb6   :  { %v428_v15 = vpop.f32.mrf.mxu2  ;;  %v392_v16 = vpop.f32.mrf.mxu0 }
  0xb7   :  { %v411_v17 = vpop.f32.mrf.mxu1  ;;  %v429_v21 = vadd.f32 %v428_v15, %v410_v19  ;;  %v447_v22 = vpop.f32.mrf.mxu3  ;;  %v393_v24 = vadd.f32 %v719_v11, %v392_v16 }
  0xb9   :  { %v448_v26 = vadd.f32 %v447_v22, %v429_v21  ;;  %v412_v31 = vadd.f32 %v411_v17, %v393_v24 }
  0xbe   :  { %v430_v27 = vpop.f32.mrf.mxu2  ;;  %v461_v28 = vpop.f32.mrf.mxu0 }
  0xbf   :  { %v466_v29 = vpop.f32.mrf.mxu1  ;;  %v462_v32 = vadd.f32 %v461_v28, %v443_v25  ;;  %v431_v35 = vadd.f32 %v430_v27, %v412_v31  ;;  %v449_v38 = vpop.f32.mrf.mxu3 }
  0xc0   :  { %v467_v33 = vadd.f32 %v466_v29, %v448_v26 }
  0xc1   :  { %v471_v36 = vmax.f32 %v462_v32, 0.0  ;;  %v450_v40 = vadd.f32 %v449_v38, %v431_v35 }
  0xc2   :  { %v473_v37 = vmax.f32 %v467_v33, 0.0 }
  0xc3   :  { %475 = vst.msk [vmem:[%s932_s3] sm:$0xff] %vm369_vm0, %v471_v36 }
  0xc4   :  { %477 = vst.msk [vmem:[%s932_s3 + $0x10] sm:$0xff] %vm369_vm0, %v473_v37 }
  0xc6   :  { %v463_v41 = vpop.f32.mrf.mxu0 }
  0xc7   :  { %v468_v42 = vpop.f32.mrf.mxu1  ;;  %v464_v43 = vadd.f32 %v463_v41, %v445_v39 }
  0xc8   :  { %v469_v44 = vadd.f32 %v468_v42, %v450_v40 }
  0xc9   :  { %v472_v45 = vmax.f32 %v464_v43, 0.0 }
  0xca   :  { %v474_v46 = vmax.f32 %v469_v44, 0.0 }
  0xcb   :  { %476 = vst.msk [vmem:[%s932_s3 + $0x8] sm:$0xff] %vm369_vm0, %v472_v45 }
  0xcc   :  { %478 = vst.msk [vmem:[%s932_s3 + $0x18] sm:$0xff] %vm369_vm0, %v474_v46 }

// kernel: teacher_forward.14
= control target key start
LH: loop header
LB: loop body
LE: loop exit
PB: predicated region body
PF: predicated region fallthrough
CT: control target
= control target key end

     0   :  { %vm372_vm0 = vcmask 523264   ;;  %s953_s1 = inlined_call_operand.vmem [shape: bf16[576,64], index: 1, kind: input, shape index: {}]   ;;  %s954_s2 = inlined_call_operand.vmem [shape: f32[1,64], index: 2, kind: input, shape index: {}]   ;;  %s955_s0 = inlined_call_operand.vmem [shape: bf16[32,576], index: 0, kind: input, shape index: {}]   ;;  %s956_s3 = inlined_call_operand.vmem [shape: f32[32,64], index: 3, kind: input, shape index: {}]   ;;  %s957_s4 = inlined_call_operand.vmem [shape: f32[32,64], index: 4, kind: output, shape index: {}]  }
   0x1   :  { %v693_v0 = vld [vmem:[%s953_s1 + $0x38] sm:$0xff]  ;;  %v692_v4 = vld [vmem:[%s953_s1 + $0x30] sm:$0xff]  ;;  %v691_v8 = vld [vmem:[%s953_s1 + $0x28] sm:$0xff] }
   0x2   :  { %v701_v1 = vld [vmem:[%s953_s1 + $0x78] sm:$0xff]  ;;  %379 = vmatpush.bf16.msra.mxu0 %v693_v0  ;;  %v700_v5 = vld [vmem:[%s953_s1 + $0x70] sm:$0xff]  ;;  %v699_v9 = vld [vmem:[%s953_s1 + $0x68] sm:$0xff] }
   0x3   :  { %v709_v2 = vld [vmem:[%s953_s1 + $0xb8] sm:$0xff]  ;;  %398 = vmatpush.bf16.msra.mxu1 %v701_v1  ;;  %v708_v6 = vld [vmem:[%s953_s1 + $0xb0] sm:$0xff]  ;;  %v707_v10 = vld [vmem:[%s953_s1 + $0xa8] sm:$0xff] }
   0x4   :  { %v717_v3 = vld [vmem:[%s953_s1 + $0xf8] sm:$0xff]  ;;  %417 = vmatpush.bf16.msra.mxu2 %v709_v2  ;;  %v716_v7 = vld [vmem:[%s953_s1 + $0xf0] sm:$0xff]  ;;  %v715_v11 = vld [vmem:[%s953_s1 + $0xe8] sm:$0xff] }
   0x5   :  { %436 = vmatpush.bf16.msra.mxu3 %v717_v3  ;;  %v690_v12 = vld [vmem:[%s953_s1 + $0x20] sm:$0xff]  ;;  %v689_v16 = vld [vmem:[%s953_s1 + $0x18] sm:$0xff]  ;;  %v688_v20 = vld [vmem:[%s953_s1 + $0x10] sm:$0xff] }
   0x6   :  { %380 = vmatpush.bf16.msra.mxu0 %v692_v4  ;;  %v698_v13 = vld [vmem:[%s953_s1 + $0x60] sm:$0xff]  ;;  %v697_v17 = vld [vmem:[%s953_s1 + $0x58] sm:$0xff]  ;;  %v696_v21 = vld [vmem:[%s953_s1 + $0x50] sm:$0xff] }
   0x7   :  { %399 = vmatpush.bf16.msra.mxu1 %v700_v5  ;;  %v706_v14 = vld [vmem:[%s953_s1 + $0xa0] sm:$0xff]  ;;  %v705_v18 = vld [vmem:[%s953_s1 + $0x98] sm:$0xff]  ;;  %v704_v22 = vld [vmem:[%s953_s1 + $0x90] sm:$0xff] }
   0x8   :  { %418 = vmatpush.bf16.msra.mxu2 %v708_v6  ;;  %v714_v15 = vld [vmem:[%s953_s1 + $0xe0] sm:$0xff]  ;;  %v713_v19 = vld [vmem:[%s953_s1 + $0xd8] sm:$0xff]  ;;  %v712_v23 = vld [vmem:[%s953_s1 + $0xd0] sm:$0xff] }
   0x9   :  { %437 = vmatpush.bf16.msra.mxu3 %v716_v7  ;;  %v687_v24 = vld [vmem:[%s953_s1 + $0x8] sm:$0xff]  ;;  %v686_v28 = vld [vmem:[%s953_s1] sm:$0xff]  ;;  %v678_v33 = vld [vmem:[%s955_s0 + $0x10] sm:$0xf0] }
   0xa   :  { %381 = vmatpush.bf16.msra.mxu0 %v691_v8  ;;  %v695_v25 = vld [vmem:[%s953_s1 + $0x48] sm:$0xff]  ;;  %v694_v29 = vld [vmem:[%s953_s1 + $0x40] sm:$0xff]  ;;  %v494_v35 = vld [vmem:[%s955_s0 + $0x14] sm:$0xf0] }
   0xb   :  { %400 = vmatpush.bf16.msra.mxu1 %v699_v9  ;;  %v703_v26 = vld [vmem:[%s953_s1 + $0x88] sm:$0xff]  ;;  %v702_v30 = vld [vmem:[%s953_s1 + $0x80] sm:$0xff]  ;;  %v679_v37 = vld [vmem:[%s955_s0 + $0x18] sm:$0xf0] }
   0xc   :  { %419 = vmatpush.bf16.msra.mxu2 %v707_v10  ;;  %v711_v27 = vld [vmem:[%s953_s1 + $0xc8] sm:$0xff]  ;;  %v710_v31 = vld [vmem:[%s953_s1 + $0xc0] sm:$0xff]  ;;  %v721_v40 = vld [vmem:[%s953_s1 + $0x118] sm:$0xff] }
   0xd   :  { %438 = vmatpush.bf16.msra.mxu3 %v715_v11  ;;  %v492_v32 = vld [vmem:[%s955_s0] sm:$0xf]  ;;  %v676_v34 = vld [vmem:[%s955_s0 + $0x4] sm:$0xf]  ;;  %v500_v36 = vld [vmem:[%s955_s0 + $0x8] sm:$0xf] }
   0xe   :  { %382 = vmatpush.bf16.msra.mxu0 %v690_v12  ;;  %v677_v38 = vld [vmem:[%s955_s0 + $0xc] sm:$0xf]  ;;  %v502_v39 = vld [vmem:[%s955_s0 + $0x1c] sm:$0xf0]  ;;  %v493_v41 = vor.u32 %v678_v33, %v492_v32  ;;  %v497_v42 = vor.u32 %v676_v34, %v494_v35  ;;  %v501_v43 = vor.u32 %v679_v37, %v500_v36  ;;  %v720_v45 = vld [vmem:[%s953_s1 + $0x110] sm:$0xff] }
   0xf   :  { %401 = vmatpush.bf16.msra.mxu1 %v698_v13  ;;  %v505_v44 = vor.u32 %v677_v38, %v502_v39  ;;  %v719_v46 = vld [vmem:[%s953_s1 + $0x108] sm:$0xff]  ;;  %v718_v47 = vld [vmem:[%s953_s1 + $0x100] sm:$0xff]  ;;  %v683_v49 = vld [vmem:[%s955_s0 + $0x38] sm:$0xf0] }
  0x10   :  { %420 = vmatpush.bf16.msra.mxu2 %v706_v14  ;;  %v512_v48 = vld [vmem:[%s955_s0 + $0x28] sm:$0xf]  ;;  %v681_v50 = vld [vmem:[%s955_s0 + $0x2c] sm:$0xf]  ;;  %v514_v51 = vld [vmem:[%s955_s0 + $0x3c] sm:$0xf0] }
  0x11   :  { %439 = vmatpush.bf16.msra.mxu3 %v714_v15  ;;  %v520_v52 = vld [vmem:[%s955_s0 + $0x30] sm:$0xf]  ;;  %v684_v53 = vld [vmem:[%s955_s0 + $0x40] sm:$0xf0]  ;;  %v682_v54 = vld [vmem:[%s955_s0 + $0x34] sm:$0xf]  ;;  %v513_v56 = vor.u32 %v683_v49, %v512_v48  ;;  %v517_v57 = vor.u32 %v681_v50, %v514_v51 }
  0x12   :  { %383 = vmatpush.bf16.msra.mxu0 %v689_v16  ;;  %v522_v55 = vld [vmem:[%s955_s0 + $0x44] sm:$0xf0]  ;;  %v521_v58 = vor.u32 %v684_v53, %v520_v52  ;;  %v508_v60 = vld [vmem:[%s955_s0 + $0x10] sm:$0xf]  ;;  %v680_v61 = vld [vmem:[%s955_s0 + $0x20] sm:$0xf0] }
  0x13   :  { %402 = vmatpush.bf16.msra.mxu1 %v697_v17  ;;  %v525_v59 = vor.u32 %v682_v54, %v522_v55  ;;  %v528_v62 = vld [vmem:[%s955_s0 + $0x38] sm:$0xf]  ;;  %v685_v63 = vld [vmem:[%s955_s0 + $0x48] sm:$0xf0]  ;;  %v509_v0 = vor.u32 %v680_v61, %v508_v60  ;;  %v726_v11 = vld [vmem:[%s954_s2] ss:$0 sm:$0xff] }
  0x14   :  { %421 = vmatpush.bf16.msra.mxu2 %v705_v18  ;;  %v529_v1 = vor.u32 %v685_v63, %v528_v62 }
  0x15   :  { %440 = vmatpush.bf16.msra.mxu3 %v713_v19 }
  0x16   :  { %384 = vmatpush.bf16.msra.mxu0 %v688_v20 }
  0x17   :  { %403 = vmatpush.bf16.msra.mxu1 %v696_v21 }
  0x18   :  { %422 = vmatpush.bf16.msra.mxu2 %v704_v22 }
  0x19   :  { %441 = vmatpush.bf16.msra.mxu3 %v712_v23 }
  0x1a   :  { %385 = vmatpush.bf16.msra.mxu0 %v687_v24 }
  0x1b   :  { %404 = vmatpush.bf16.msra.mxu1 %v695_v25 }
  0x1c   :  { %423 = vmatpush.bf16.msra.mxu2 %v703_v26 }
  0x1d   :  { %442 = vmatpush.bf16.msra.mxu3 %v711_v27 }
  0x1e   :  { %386 = vmatpush.bf16.msra.mxu0 %v686_v28 }
  0x1f   :  { %405 = vmatpush.bf16.msra.mxu1 %v694_v29  ;;  %v474_v29 = vld [vmem:[%s956_s3] sm:$0xff] }
  0x20   :  { %424 = vmatpush.bf16.msra.mxu2 %v702_v30 }
  0x21   :  { %443 = vmatpush.bf16.msra.mxu3 %v710_v31  ;;  %387 = vmatmul.bf16.vlgmr.msra.gmra.mxu0 %v493_v41  ;;  %v476_v31 = vld [vmem:[%s956_s3 + $0x10] sm:$0xff] }
  0x22   :  { %459 = vmatpush.bf16.msrb.mxu0 %v721_v40  ;;  %406 = vmatmul.bf16.vlgmr.msra.gmra.mxu1 %v497_v42 }
  0x23   :  { %722 = vmatpush.bf16.msrb.mxu1 %v721_v40  ;;  %425 = vmatmul.bf16.vlgmr.msra.gmra.mxu2 %v501_v43 }
  0x24   :  { %444 = vmatmul.bf16.vlgmr.msra.gmra.mxu3 %v505_v44  ;;  %v475_v44 = vld [vmem:[%s956_s3 + $0x8] sm:$0xff] }
  0x26   :  { %460 = vmatpush.bf16.msrb.mxu0 %v720_v45 }
  0x27   :  { %723 = vmatpush.bf16.msrb.mxu1 %v720_v45 }
  0x2a   :  { %461 = vmatpush.bf16.msrb.mxu0 %v719_v46 }
  0x2b   :  { %724 = vmatpush.bf16.msrb.mxu1 %v719_v46  ;;  %v477_v46 = vld [vmem:[%s956_s3 + $0x18] sm:$0xff] }
  0x2e   :  { %462 = vmatpush.bf16.msrb.mxu0 %v718_v47 }
  0x2f   :  { %725 = vmatpush.bf16.msrb.mxu1 %v718_v47 }
  0x31   :  { %392 = vmatmul.bf16.gmra.mxu0 %v513_v56 }
  0x32   :  { %411 = vmatmul.bf16.gmra.mxu1 %v517_v57 }
  0x33   :  { %430 = vmatmul.bf16.gmra.mxu2 %v521_v58 }
  0x34   :  { %449 = vmatmul.bf16.gmra.mxu3 %v525_v59 }
  0x41   :  { %674 = vmatmul.msk.bf16.vlgmr.msrb.gmra.mxu0 %vm372_vm0, %v509_v0 }
  0x42   :  { %675 = vmatmul.msk.bf16.vlgmr.msrb.gmra.mxu1 %vm372_vm0, %v529_v1 }
  0x9e   :  { %v388_v2 = vpop.f32.mrf.mxu0 }
  0x9f   :  { %v407_v3 = vpop.f32.mrf.mxu1  ;;  %v389_v13 = vadd.f32 %v726_v11, %v388_v2 }
  0xa1   :  { %v408_v18 = vadd.f32 %v407_v3, %v389_v13 }
  0xa6   :  { %v426_v4 = vpop.f32.mrf.mxu2  ;;  %v390_v6 = vpop.f32.mrf.mxu0 }
  0xa7   :  { %v445_v5 = vpop.f32.mrf.mxu3  ;;  %v409_v7 = vpop.f32.mrf.mxu1  ;;  %v427_v20 = vadd.f32 %v426_v4, %v408_v18  ;;  %v391_v23 = vadd.f32 %v726_v11, %v390_v6 }
  0xa9   :  { %v446_v25 = vadd.f32 %v445_v5, %v427_v20  ;;  %v410_v32 = vadd.f32 %v409_v7, %v391_v23 }
  0xae   :  { %v428_v8 = vpop.f32.mrf.mxu2  ;;  %v393_v9 = vpop.f32.mrf.mxu0 }
  0xaf   :  { %v412_v10 = vpop.f32.mrf.mxu1  ;;  %v447_v12 = vpop.f32.mrf.mxu3  ;;  %v394_v14 = vadd.f32 %v726_v11, %v393_v9  ;;  %v429_v36 = vadd.f32 %v428_v8, %v410_v32 }
  0xb1   :  { %v413_v19 = vadd.f32 %v412_v10, %v394_v14  ;;  %v448_v41 = vadd.f32 %v447_v12, %v429_v36 }
  0xb6   :  { %v431_v15 = vpop.f32.mrf.mxu2  ;;  %v395_v16 = vpop.f32.mrf.mxu0 }
  0xb7   :  { %v414_v17 = vpop.f32.mrf.mxu1  ;;  %v432_v21 = vadd.f32 %v431_v15, %v413_v19  ;;  %v450_v22 = vpop.f32.mrf.mxu3  ;;  %v396_v24 = vadd.f32 %v726_v11, %v395_v16 }
  0xb9   :  { %v451_v26 = vadd.f32 %v450_v22, %v432_v21  ;;  %v415_v33 = vadd.f32 %v414_v17, %v396_v24 }
  0xbe   :  { %v433_v27 = vpop.f32.mrf.mxu2  ;;  %v464_v28 = vpop.f32.mrf.mxu0 }
  0xbf   :  { %v469_v30 = vpop.f32.mrf.mxu1  ;;  %v465_v34 = vadd.f32 %v464_v28, %v446_v25  ;;  %v434_v37 = vadd.f32 %v433_v27, %v415_v33  ;;  %v452_v40 = vpop.f32.mrf.mxu3 }
  0xc0   :  { %v470_v35 = vadd.f32 %v469_v30, %v451_v26 }
  0xc1   :  { %v478_v38 = vadd.f32 %v474_v29, %v465_v34  ;;  %v453_v42 = vadd.f32 %v452_v40, %v434_v37 }
  0xc2   :  { %v480_v39 = vadd.f32 %v476_v31, %v470_v35 }
  0xc3   :  { %482 = vst.msk [vmem:[%s957_s4] sm:$0xff] %vm372_vm0, %v478_v38 }
  0xc4   :  { %484 = vst.msk [vmem:[%s957_s4 + $0x10] sm:$0xff] %vm372_vm0, %v480_v39 }
  0xc6   :  { %v466_v43 = vpop.f32.mrf.mxu0 }
  0xc7   :  { %v471_v45 = vpop.f32.mrf.mxu1  ;;  %v467_v47 = vadd.f32 %v466_v43, %v448_v41 }
  0xc8   :  { %v472_v48 = vadd.f32 %v471_v45, %v453_v42 }
  0xc9   :  { %v479_v49 = vadd.f32 %v475_v44, %v467_v47 }
  0xca   :  { %v481_v50 = vadd.f32 %v477_v46, %v472_v48 }
  0xcb   :  { %483 = vst.msk [vmem:[%s957_s4 + $0x8] sm:$0xff] %vm372_vm0, %v479_v49 }
  0xcc   :  { %485 = vst.msk [vmem:[%s957_s4 + $0x18] sm:$0xff] %vm372_vm0, %v481_v50 }

// kernel: teacher_forward.16
= control target key start
LH: loop header
LB: loop body
LE: loop exit
PB: predicated region body
PF: predicated region fallthrough
CT: control target
= control target key end

     0   :  { %vm555_vm0 = vcmask 523264   ;;  %s1771_s1 = inlined_call_operand.vmem [shape: bf16[576,64], index: 1, kind: input, shape index: {}]   ;;  %s1772_s2 = inlined_call_operand.vmem [shape: f32[1,64], index: 2, kind: input, shape index: {}]   ;;  %s1773_s0 = inlined_call_operand.vmem [shape: bf16[128,576], index: 0, kind: input, shape index: {}]   ;;  %s1774_s3 = inlined_call_operand.vmem [shape: f32[128,64], index: 3, kind: output, shape index: {}]  }
   0x1   :  { %v1220_v0 = vld [vmem:[%s1771_s1 + $0x38] sm:$0xff]  ;;  %v1219_v1 = vld [vmem:[%s1771_s1 + $0x30] sm:$0xff]  ;;  %v1218_v2 = vld [vmem:[%s1771_s1 + $0x28] sm:$0xff] }
   0x2   :  { %1249 = vmatpush.bf16.msra.mxu1 %v1220_v0  ;;  %1250 = vmatpush.bf16.msra.mxu2 %v1220_v0  ;;  %v1217_v3 = vld [vmem:[%s1771_s1 + $0x20] sm:$0xff]  ;;  %v1216_v4 = vld [vmem:[%s1771_s1 + $0x18] sm:$0xff]  ;;  %v1215_v5 = vld [vmem:[%s1771_s1 + $0x10] sm:$0xff] }
   0x3   :  { %1251 = vmatpush.bf16.msra.mxu3 %v1220_v0  ;;  %580 = vmatpush.bf16.msra.mxu0 %v1220_v0  ;;  %v1214_v6 = vld [vmem:[%s1771_s1 + $0x8] sm:$0xff]  ;;  %v1213_v7 = vld [vmem:[%s1771_s1] sm:$0xff]  ;;  %v903_v8 = vld [vmem:[%s1773_s0 + $0x50] sm:$0xf] }
   0x4   :  { %v1185_v9 = vld [vmem:[%s1773_s0 + $0x60] sm:$0xf0]  ;;  %v943_v10 = vld [vmem:[%s1773_s0 + $0xa0] sm:$0xf]  ;;  %v1195_v11 = vld [vmem:[%s1773_s0 + $0xb0] sm:$0xf0] }
   0x5   :  { %v983_v12 = vld [vmem:[%s1773_s0 + $0xf0] sm:$0xf]  ;;  %v1205_v13 = vld [vmem:[%s1773_s0 + $0x100] sm:$0xf0]  ;;  %v863_v14 = vld [vmem:[%s1773_s0] sm:$0xf]  ;;  %v904_v18 = vor.u32 %v1185_v9, %v903_v8  ;;  %v944_v19 = vor.u32 %v1195_v11, %v943_v10 }
   0x6   :  { %1252 = vmatpush.bf16.msra.mxu1 %v1219_v1  ;;  %1253 = vmatpush.bf16.msra.mxu2 %v1219_v1  ;;  %v1175_v15 = vld [vmem:[%s1773_s0 + $0x10] sm:$0xf0]  ;;  %v1236_v16 = vld [vmem:[%s1771_s1 + $0xb8] sm:$0xff]  ;;  %v984_v20 = vor.u32 %v1205_v13, %v983_v12  ;;  %v1234_v28 = vld [vmem:[%s1771_s1 + $0xa8] sm:$0xff] }
   0x7   :  { %1254 = vmatpush.bf16.msra.mxu3 %v1219_v1  ;;  %581 = vmatpush.bf16.msra.mxu0 %v1219_v1  ;;  %v1228_v17 = vld [vmem:[%s1771_s1 + $0x78] sm:$0xff]  ;;  %v864_v21 = vor.u32 %v1175_v15, %v863_v14  ;;  %v1235_v24 = vld [vmem:[%s1771_s1 + $0xb0] sm:$0xff]  ;;  %v1226_v29 = vld [vmem:[%s1771_s1 + $0x68] sm:$0xff] }
   0x8   :  { %v1244_v22 = vld [vmem:[%s1771_s1 + $0xf8] sm:$0xff]  ;;  %v1227_v25 = vld [vmem:[%s1771_s1 + $0x70] sm:$0xff]  ;;  %v1242_v30 = vld [vmem:[%s1771_s1 + $0xe8] sm:$0xff] }
   0x9   :  { %v1248_v23 = vld [vmem:[%s1771_s1 + $0x118] sm:$0xff]  ;;  %v1243_v26 = vld [vmem:[%s1771_s1 + $0xf0] sm:$0xff]  ;;  %v1246_v31 = vld [vmem:[%s1771_s1 + $0x108] sm:$0xff] }
   0xa   :  { %1255 = vmatpush.bf16.msra.mxu1 %v1218_v2  ;;  %1256 = vmatpush.bf16.msra.mxu2 %v1218_v2  ;;  %v1247_v27 = vld [vmem:[%s1771_s1 + $0x110] sm:$0xff]  ;;  %v1233_v32 = vld [vmem:[%s1771_s1 + $0xa0] sm:$0xff]  ;;  %v923_v35 = vld [vmem:[%s1773_s0 + $0x78] sm:$0xf] }
   0xb   :  { %1257 = vmatpush.bf16.msra.mxu3 %v1218_v2  ;;  %582 = vmatpush.bf16.msra.mxu0 %v1218_v2  ;;  %v1225_v33 = vld [vmem:[%s1771_s1 + $0x60] sm:$0xff]  ;;  %v1190_v36 = vld [vmem:[%s1773_s0 + $0x88] sm:$0xf0]  ;;  %v963_v37 = vld [vmem:[%s1773_s0 + $0xc8] sm:$0xf] }
   0xc   :  { %v1241_v34 = vld [vmem:[%s1771_s1 + $0xe0] sm:$0xff]  ;;  %v1200_v38 = vld [vmem:[%s1773_s0 + $0xd8] sm:$0xf0]  ;;  %v1003_v39 = vld [vmem:[%s1773_s0 + $0x118] sm:$0xf]  ;;  %v924_v46 = vor.u32 %v1190_v36, %v923_v35 }
   0xd   :  { %v1210_v40 = vld [vmem:[%s1773_s0 + $0x128] sm:$0xf0]  ;;  %v883_v41 = vld [vmem:[%s1773_s0 + $0x28] sm:$0xf]  ;;  %v1180_v42 = vld [vmem:[%s1773_s0 + $0x38] sm:$0xf0]  ;;  %v964_v47 = vor.u32 %v1200_v38, %v963_v37 }
   0xe   :  { %1258 = vmatpush.bf16.msra.mxu1 %v1217_v3  ;;  %1259 = vmatpush.bf16.msra.mxu2 %v1217_v3  ;;  %v1245_v43 = vld [vmem:[%s1771_s1 + $0x100] sm:$0xff]  ;;  %v1232_v44 = vld [vmem:[%s1771_s1 + $0x98] sm:$0xff]  ;;  %v1004_v48 = vor.u32 %v1210_v40, %v1003_v39  ;;  %v884_v49 = vor.u32 %v1180_v42, %v883_v41  ;;  %v1231_v51 = vld [vmem:[%s1771_s1 + $0x90] sm:$0xff] }
   0xf   :  { %1260 = vmatpush.bf16.msra.mxu3 %v1217_v3  ;;  %583 = vmatpush.bf16.msra.mxu0 %v1217_v3  ;;  %v1224_v45 = vld [vmem:[%s1771_s1 + $0x58] sm:$0xff]  ;;  %v1223_v52 = vld [vmem:[%s1771_s1 + $0x50] sm:$0xff]  ;;  %v1230_v54 = vld [vmem:[%s1771_s1 + $0x88] sm:$0xff] }
  0x10   :  { %v1240_v50 = vld [vmem:[%s1771_s1 + $0xd8] sm:$0xff]  ;;  %v1239_v53 = vld [vmem:[%s1771_s1 + $0xd0] sm:$0xff]  ;;  %v1222_v55 = vld [vmem:[%s1771_s1 + $0x48] sm:$0xff] }
  0x11   :  { %v1238_v56 = vld [vmem:[%s1771_s1 + $0xc8] sm:$0xff]  ;;  %v1229_v57 = vld [vmem:[%s1771_s1 + $0x80] sm:$0xff]  ;;  %v865_v61 = vld [vmem:[%s1773_s0 + $0x14] sm:$0xf0] }
  0x12   :  { %1261 = vmatpush.bf16.msra.mxu1 %v1216_v4  ;;  %1262 = vmatpush.bf16.msra.mxu2 %v1216_v4  ;;  %v1221_v58 = vld [vmem:[%s1771_s1 + $0x40] sm:$0xff]  ;;  %v871_v62 = vld [vmem:[%s1773_s0 + $0x8] sm:$0xf]  ;;  %v1176_v63 = vld [vmem:[%s1773_s0 + $0x18] sm:$0xf0] }
  0x13   :  { %1263 = vmatpush.bf16.msra.mxu3 %v1216_v4  ;;  %584 = vmatpush.bf16.msra.mxu0 %v1216_v4  ;;  %v1237_v59 = vld [vmem:[%s1771_s1 + $0xc0] sm:$0xff]  ;;  %v1174_v0 = vld [vmem:[%s1773_s0 + $0xc] sm:$0xf]  ;;  %v879_v2 = vld [vmem:[%s1773_s0 + $0x10] sm:$0xf] }
  0x14   :  { %v1173_v60 = vld [vmem:[%s1773_s0 + $0x4] sm:$0xf]  ;;  %v873_v1 = vld [vmem:[%s1773_s0 + $0x1c] sm:$0xf0]  ;;  %v1178_v8 = vld [vmem:[%s1773_s0 + $0x2c] sm:$0xf] }
  0x15   :  { %v1177_v3 = vld [vmem:[%s1773_s0 + $0x20] sm:$0xf0]  ;;  %v868_v4 = vor.u32 %v1173_v60, %v865_v61  ;;  %v885_v9 = vld [vmem:[%s1773_s0 + $0x3c] sm:$0xf0]  ;;  %v891_v10 = vld [vmem:[%s1773_s0 + $0x30] sm:$0xf] }
  0x16   :  { %1264 = vmatpush.bf16.msra.mxu1 %v1215_v5  ;;  %1265 = vmatpush.bf16.msra.mxu2 %v1215_v5  ;;  %v1181_v11 = vld [vmem:[%s1773_s0 + $0x40] sm:$0xf0]  ;;  %v1179_v12 = vld [vmem:[%s1773_s0 + $0x34] sm:$0xf]  ;;  %v893_v13 = vld [vmem:[%s1773_s0 + $0x44] sm:$0xf0] }
  0x17   :  { %1266 = vmatpush.bf16.msra.mxu3 %v1215_v5  ;;  %585 = vmatpush.bf16.msra.mxu0 %v1215_v5  ;;  %v872_v5 = vor.u32 %v1176_v63, %v871_v62  ;;  %v899_v14 = vld [vmem:[%s1773_s0 + $0x38] sm:$0xf]  ;;  %v1182_v15 = vld [vmem:[%s1773_s0 + $0x48] sm:$0xf0]  ;;  %v1191_v35 = vld [vmem:[%s1773_s0 + $0x90] sm:$0xf0] }
  0x18   :  { %v1189_v36 = vld [vmem:[%s1773_s0 + $0x84] sm:$0xf]  ;;  %v933_v37 = vld [vmem:[%s1773_s0 + $0x94] sm:$0xf0]  ;;  %v939_v38 = vld [vmem:[%s1773_s0 + $0x88] sm:$0xf] }
  0x19   :  { %v1192_v39 = vld [vmem:[%s1773_s0 + $0x98] sm:$0xf0]  ;;  %v936_v42 = vor.u32 %v1189_v36, %v933_v37  ;;  %v1199_v60 = vld [vmem:[%s1773_s0 + $0xd4] sm:$0xf]  ;;  %v973_v61 = vld [vmem:[%s1773_s0 + $0xe4] sm:$0xf0] }
  0x1a   :  { %1267 = vmatpush.bf16.msra.mxu1 %v1214_v6  ;;  %1268 = vmatpush.bf16.msra.mxu2 %v1214_v6  ;;  %v979_v62 = vld [vmem:[%s1773_s0 + $0xd8] sm:$0xf]  ;;  %v1202_v63 = vld [vmem:[%s1773_s0 + $0xe8] sm:$0xf0] }
  0x1b   :  { %1269 = vmatpush.bf16.msra.mxu3 %v1214_v6  ;;  %586 = vmatpush.bf16.msra.mxu0 %v1214_v6  ;;  %v876_v6 = vor.u32 %v1174_v0, %v873_v1 }
  0x1e   :  { %1270 = vmatpush.bf16.msra.mxu1 %v1213_v7  ;;  %1271 = vmatpush.bf16.msra.mxu2 %v1213_v7 }
  0x1f   :  { %1272 = vmatpush.bf16.msra.mxu3 %v1213_v7  ;;  %587 = vmatpush.bf16.msra.mxu0 %v1213_v7  ;;  %v880_v7 = vor.u32 %v1177_v3, %v879_v2  ;;  %v976_v2 = vor.u32 %v1199_v60, %v973_v61  ;;  %v980_v3 = vor.u32 %v1202_v63, %v979_v62 }
  0x21   :  { %598 = vmatmul.bf16.vlgmr.msra.gmra.mxu1 %v904_v18  ;;  %608 = vmatmul.bf16.vlgmr.msra.gmra.mxu2 %v944_v19  ;;  %v896_v18 = vor.u32 %v1179_v12, %v893_v13  ;;  %v900_v19 = vor.u32 %v1182_v15, %v899_v14 }
  0x22   :  { %678 = vmatpush.bf16.msrb.mxu2 %v1236_v16  ;;  %629 = vmatpush.bf16.msrb.mxu1 %v1228_v17  ;;  %v888_v16 = vor.u32 %v1178_v8, %v885_v9  ;;  %v892_v17 = vor.u32 %v1181_v11, %v891_v10  ;;  %v1204_v8 = vld [vmem:[%s1773_s0 + $0xfc] sm:$0xf]  ;;  %v993_v9 = vld [vmem:[%s1773_s0 + $0x10c] sm:$0xf0]  ;;  %v999_v10 = vld [vmem:[%s1773_s0 + $0x100] sm:$0xf] }
  0x23   :  { %618 = vmatmul.bf16.vlgmr.msra.gmra.mxu3 %v984_v20  ;;  %588 = vmatmul.bf16.vlgmr.msra.gmra.mxu0 %v864_v21  ;;  %v1183_v20 = vld [vmem:[%s1773_s0 + $0x54] sm:$0xf]  ;;  %v905_v21 = vld [vmem:[%s1773_s0 + $0x64] sm:$0xf0]  ;;  %v996_v15 = vor.u32 %v1204_v8, %v993_v9 }
  0x24   :  { %727 = vmatpush.bf16.msrb.mxu3 %v1244_v22  ;;  %780 = vmatpush.bf16.msrb.mxu0 %v1248_v23  ;;  %v911_v22 = vld [vmem:[%s1773_s0 + $0x58] sm:$0xf]  ;;  %v1186_v23 = vld [vmem:[%s1773_s0 + $0x68] sm:$0xf0]  ;;  %v1207_v11 = vld [vmem:[%s1773_s0 + $0x110] sm:$0xf0] }
  0x26   :  { %679 = vmatpush.bf16.msrb.mxu2 %v1235_v24  ;;  %630 = vmatpush.bf16.msrb.mxu1 %v1227_v25  ;;  %v1184_v24 = vld [vmem:[%s1773_s0 + $0x5c] sm:$0xf]  ;;  %v913_v25 = vld [vmem:[%s1773_s0 + $0x6c] sm:$0xf0] }
  0x28   :  { %728 = vmatpush.bf16.msrb.mxu3 %v1243_v26  ;;  %781 = vmatpush.bf16.msrb.mxu0 %v1247_v27  ;;  %v919_v26 = vld [vmem:[%s1773_s0 + $0x60] sm:$0xf]  ;;  %v1187_v27 = vld [vmem:[%s1773_s0 + $0x70] sm:$0xf0] }
  0x2a   :  { %680 = vmatpush.bf16.msrb.mxu2 %v1234_v28  ;;  %631 = vmatpush.bf16.msrb.mxu1 %v1226_v29  ;;  %v908_v28 = vor.u32 %v1183_v20, %v905_v21  ;;  %v912_v29 = vor.u32 %v1186_v23, %v911_v22 }
  0x2c   :  { %729 = vmatpush.bf16.msrb.mxu3 %v1242_v30  ;;  %782 = vmatpush.bf16.msrb.mxu0 %v1246_v31  ;;  %v916_v30 = vor.u32 %v1184_v24, %v913_v25  ;;  %v920_v31 = vor.u32 %v1187_v27, %v919_v26  ;;  %v1208_v25 = vld [vmem:[%s1773_s0 + $0x11c] sm:$0xf]  ;;  %v1005_v26 = vld [vmem:[%s1773_s0 + $0x12c] sm:$0xf0]  ;;  %v1011_v27 = vld [vmem:[%s1773_s0 + $0x120] sm:$0xf] }
  0x2d   :  { %v1008_v36 = vor.u32 %v1208_v25, %v1005_v26 }
  0x2e   :  { %681 = vmatpush.bf16.msrb.mxu2 %v1233_v32  ;;  %632 = vmatpush.bf16.msrb.mxu1 %v1225_v33  ;;  %v1188_v32 = vld [vmem:[%s1773_s0 + $0x7c] sm:$0xf]  ;;  %v925_v33 = vld [vmem:[%s1773_s0 + $0x8c] sm:$0xf0] }
  0x2f   :  { %v928_v40 = vor.u32 %v1188_v32, %v925_v33  ;;  %v1212_v32 = vld [vmem:[%s1773_s0 + $0x138] sm:$0xf0] }
  0x30   :  { %730 = vmatpush.bf16.msrb.mxu3 %v1241_v34  ;;  %783 = vmatpush.bf16.msrb.mxu0 %v1245_v43  ;;  %v931_v34 = vld [vmem:[%s1773_s0 + $0x80] sm:$0xf]  ;;  %v940_v43 = vor.u32 %v1192_v39, %v939_v38 }
  0x31   :  { %603 = vmatmul.bf16.gmra.mxu1 %v924_v46  ;;  %613 = vmatmul.bf16.gmra.mxu2 %v964_v47  ;;  %v932_v41 = vor.u32 %v1191_v35, %v931_v34  ;;  %v951_v46 = vld [vmem:[%s1773_s0 + $0xa8] sm:$0xf]  ;;  %v1196_v47 = vld [vmem:[%s1773_s0 + $0xb8] sm:$0xf0] }
  0x32   :  { %682 = vmatpush.bf16.msrb.mxu2 %v1232_v44  ;;  %633 = vmatpush.bf16.msrb.mxu1 %v1224_v45  ;;  %v1193_v44 = vld [vmem:[%s1773_s0 + $0xa4] sm:$0xf]  ;;  %v945_v45 = vld [vmem:[%s1773_s0 + $0xb4] sm:$0xf0] }
  0x33   :  { %623 = vmatmul.bf16.gmra.mxu3 %v1004_v48  ;;  %593 = vmatmul.bf16.gmra.mxu0 %v884_v49  ;;  %v1194_v48 = vld [vmem:[%s1773_s0 + $0xac] sm:$0xf]  ;;  %v953_v49 = vld [vmem:[%s1773_s0 + $0xbc] sm:$0xf0] }
  0x34   :  { %731 = vmatpush.bf16.msrb.mxu3 %v1240_v50  ;;  %v959_v50 = vld [vmem:[%s1773_s0 + $0xb0] sm:$0xf] }
  0x36   :  { %683 = vmatpush.bf16.msrb.mxu2 %v1231_v51  ;;  %634 = vmatpush.bf16.msrb.mxu1 %v1223_v52  ;;  %v1197_v51 = vld [vmem:[%s1773_s0 + $0xc0] sm:$0xf0]  ;;  %v948_v52 = vor.u32 %v1193_v44, %v945_v45 }
  0x38   :  { %732 = vmatpush.bf16.msrb.mxu3 %v1239_v53  ;;  %v952_v53 = vor.u32 %v1196_v47, %v951_v46 }
  0x3a   :  { %684 = vmatpush.bf16.msrb.mxu2 %v1230_v54  ;;  %635 = vmatpush.bf16.msrb.mxu1 %v1222_v55  ;;  %v956_v54 = vor.u32 %v1194_v48, %v953_v49  ;;  %v960_v55 = vor.u32 %v1197_v51, %v959_v50 }
  0x3c   :  { %733 = vmatpush.bf16.msrb.mxu3 %v1238_v56  ;;  %v1198_v56 = vld [vmem:[%s1773_s0 + $0xcc] sm:$0xf] }
  0x3e   :  { %685 = vmatpush.bf16.msrb.mxu2 %v1229_v57  ;;  %636 = vmatpush.bf16.msrb.mxu1 %v1221_v58  ;;  %v965_v57 = vld [vmem:[%s1773_s0 + $0xdc] sm:$0xf0]  ;;  %v971_v58 = vld [vmem:[%s1773_s0 + $0xd0] sm:$0xf] }
  0x3f   :  { %v968_v0 = vor.u32 %v1198_v56, %v965_v57 }
  0x40   :  { %734 = vmatpush.bf16.msrb.mxu3 %v1237_v59  ;;  %v1201_v59 = vld [vmem:[%s1773_s0 + $0xe0] sm:$0xf0] }
  0x41   :  { %637 = vmatmul.bf16.vlgmr.msrb.gmra.mxu1 %v868_v4  ;;  %686 = vmatmul.bf16.vlgmr.msrb.gmra.mxu2 %v872_v5  ;;  %v972_v1 = vor.u32 %v1201_v59, %v971_v58  ;;  %v1203_v4 = vld [vmem:[%s1773_s0 + $0xf4] sm:$0xf]  ;;  %v985_v5 = vld [vmem:[%s1773_s0 + $0x104] sm:$0xf0] }
  0x42   :  { %v988_v12 = vor.u32 %v1203_v4, %v985_v5 }
  0x43   :  { %735 = vmatmul.bf16.vlgmr.msrb.gmra.mxu3 %v876_v6  ;;  %1165 = vmatmul.msk.bf16.vlgmr.msrb.gmra.mxu0 %vm555_vm0, %v880_v7  ;;  %v991_v6 = vld [vmem:[%s1773_s0 + $0xf8] sm:$0xf]  ;;  %v1206_v7 = vld [vmem:[%s1773_s0 + $0x108] sm:$0xf0] }
  0x44   :  { %v992_v13 = vor.u32 %v1206_v7, %v991_v6 }
  0x51   :  { %642 = vmatmul.bf16.gmra.mxu1 %v888_v16  ;;  %691 = vmatmul.bf16.gmra.mxu2 %v892_v17  ;;  %v1000_v16 = vor.u32 %v1207_v11, %v999_v10 }
  0x53   :  { %740 = vmatmul.bf16.gmra.mxu3 %v896_v18  ;;  %1166 = vmatmul.msk.bf16.gmra.mxu0 %vm555_vm0, %v900_v19  ;;  %v1630_v18 = vld [vmem:[%s1772_s2] ss:$0 sm:$0xff] }
  0x61   :  { %647 = vmatmul.bf16.gmra.mxu1 %v908_v28  ;;  %696 = vmatmul.bf16.gmra.mxu2 %v912_v29  ;;  %v1211_v28 = vld [vmem:[%s1773_s0 + $0x130] sm:$0xf0]  ;;  %v1209_v29 = vld [vmem:[%s1773_s0 + $0x124] sm:$0xf] }
  0x62   :  { %v1012_v37 = vor.u32 %v1211_v28, %v1011_v27 }
  0x63   :  { %745 = vmatmul.bf16.gmra.mxu3 %v916_v30  ;;  %1167 = vmatmul.msk.bf16.gmra.mxu0 %vm555_vm0, %v920_v31  ;;  %v1013_v30 = vld [vmem:[%s1773_s0 + $0x134] sm:$0xf0]  ;;  %v1019_v31 = vld [vmem:[%s1773_s0 + $0x128] sm:$0xf] }
  0x71   :  { %652 = vmatmul.bf16.gmra.mxu1 %v928_v40  ;;  %701 = vmatmul.bf16.gmra.mxu2 %v932_v41  ;;  %v1016_v40 = vor.u32 %v1209_v29, %v1013_v30  ;;  %v1020_v41 = vor.u32 %v1212_v32, %v1019_v31 }
  0x73   :  { %750 = vmatmul.bf16.gmra.mxu3 %v936_v42  ;;  %1168 = vmatmul.msk.bf16.gmra.mxu0 %vm555_vm0, %v940_v43 }
  0x81   :  { %657 = vmatmul.bf16.gmra.mxu1 %v948_v52  ;;  %706 = vmatmul.bf16.gmra.mxu2 %v952_v53 }
  0x83   :  { %755 = vmatmul.bf16.gmra.mxu3 %v956_v54  ;;  %1169 = vmatmul.msk.bf16.gmra.mxu0 %vm555_vm0, %v960_v55 }
  0x91   :  { %662 = vmatmul.bf16.gmra.mxu1 %v968_v0  ;;  %711 = vmatmul.bf16.gmra.mxu2 %v972_v1 }
  0x93   :  { %760 = vmatmul.bf16.gmra.mxu3 %v976_v2  ;;  %1170 = vmatmul.msk.bf16.gmra.mxu0 %vm555_vm0, %v980_v3 }
  0x9e   :  { %v1624_v14 = vpop.f32.mrf.mxu1 }
  0xa0   :  { %v589_v17 = vpop.f32.mrf.mxu0 }
  0xa1   :  { %667 = vmatmul.bf16.gmra.mxu1 %v988_v12  ;;  %716 = vmatmul.bf16.gmra.mxu2 %v992_v13  ;;  %v590_v55 = vadd.f32 %v1630_v18, %v589_v17 }
  0xa3   :  { %765 = vmatmul.bf16.gmra.mxu3 %v996_v15  ;;  %1171 = vmatmul.msk.bf16.gmra.mxu0 %vm555_vm0, %v1000_v16 }
  0xa4   :  { %v609_v19 = vpop.f32.mrf.mxu2 }
  0xa5   :  { %v1633_v20 = vadd.f32 %v1630_v18, %v609_v19 }
  0xa6   :  { %v619_v21 = vpop.f32.mrf.mxu3  ;;  %v1638_v23 = vpop.f32.mrf.mxu1 }
  0xa7   :  { %v1636_v22 = vadd.f32 %v1630_v18, %v619_v21 }
  0xa8   :  { %v591_v24 = vpop.f32.mrf.mxu0 }
  0xa9   :  { %v592_v63 = vadd.f32 %v1630_v18, %v591_v24 }
  0xac   :  { %v611_v33 = vpop.f32.mrf.mxu2 }
  0xad   :  { %v1665_v34 = vadd.f32 %v1630_v18, %v611_v33 }
  0xae   :  { %v621_v35 = vpop.f32.mrf.mxu3  ;;  %v1670_v39 = vpop.f32.mrf.mxu1 }
  0xaf   :  { %v1668_v38 = vadd.f32 %v1630_v18, %v621_v35  ;;  %v600_v35 = vadd.f32 %v1630_v18, %v1624_v14 }
  0xb0   :  { %v594_v42 = vpop.f32.mrf.mxu0 }
  0xb1   :  { %672 = vmatmul.bf16.gmra.mxu1 %v1008_v36  ;;  %721 = vmatmul.bf16.gmra.mxu2 %v1012_v37  ;;  %v595_v9 = vadd.f32 %v1630_v18, %v594_v42 }
  0xb3   :  { %770 = vmatmul.bf16.gmra.mxu3 %v1016_v40  ;;  %1172 = vmatmul.msk.bf16.gmra.mxu0 %vm555_vm0, %v1020_v41 }
  0xb4   :  { %v614_v43 = vpop.f32.mrf.mxu2 }
  0xb5   :  { %v1674_v44 = vadd.f32 %v1630_v18, %v614_v43 }
  0xb6   :  { %v624_v45 = vpop.f32.mrf.mxu3  ;;  %v1679_v47 = vpop.f32.mrf.mxu1 }
  0xb7   :  { %v1677_v46 = vadd.f32 %v1630_v18, %v624_v45 }
  0xb8   :  { %v596_v48 = vpop.f32.mrf.mxu0 }
  0xb9   :  { %v597_v24 = vadd.f32 %v1630_v18, %v596_v48 }
  0xbc   :  { %v616_v49 = vpop.f32.mrf.mxu2 }
  0xbd   :  { %v1682_v50 = vadd.f32 %v1630_v18, %v616_v49 }
  0xbe   :  { %v626_v51 = vpop.f32.mrf.mxu3  ;;  %v638_v53 = vpop.f32.mrf.mxu1 }
  0xbf   :  { %v1685_v52 = vadd.f32 %v1630_v18, %v626_v51  ;;  %v639_v56 = vadd.f32 %v638_v53, %v590_v55  ;;  %v602_v51 = vadd.f32 %v1630_v18, %v1638_v23 }
  0xc0   :  { %v785_v54 = vpop.f32.mrf.mxu0 }
  0xc4   :  { %v687_v57 = vpop.f32.mrf.mxu2 }
  0xc5   :  { %v688_v58 = vadd.f32 %v687_v57, %v639_v56 }
  0xc6   :  { %v736_v59 = vpop.f32.mrf.mxu3  ;;  %v640_v60 = vpop.f32.mrf.mxu1 }
  0xc7   :  { %v737_v61 = vadd.f32 %v736_v59, %v688_v58  ;;  %v641_v2 = vadd.f32 %v640_v60, %v592_v63 }
  0xc8   :  { %v787_v62 = vpop.f32.mrf.mxu0 }
  0xc9   :  { %v786_v0 = vadd.f32 %v785_v54, %v737_v61  ;;  %v605_v61 = vadd.f32 %v1630_v18, %v1670_v39 }
  0xcb   :  { %v825_v1 = vmax.f32 %v786_v0, 0.0 }
  0xcc   :  { %v689_v3 = vpop.f32.mrf.mxu2 }
  0xcd   :  { %841 = vst.msk [vmem:[%s1774_s3] sm:$0xff] %vm555_vm0, %v825_v1  ;;  %v690_v4 = vadd.f32 %v689_v3, %v641_v2 }
  0xce   :  { %v738_v5 = vpop.f32.mrf.mxu3  ;;  %v643_v6 = vpop.f32.mrf.mxu1 }
  0xcf   :  { %v739_v7 = vadd.f32 %v738_v5, %v690_v4  ;;  %v644_v12 = vadd.f32 %v643_v6, %v595_v9  ;;  %v607_v6 = vadd.f32 %v1630_v18, %v1679_v47 }
  0xd0   :  { %v790_v8 = vpop.f32.mrf.mxu0 }
  0xd1   :  { %v788_v10 = vadd.f32 %v787_v62, %v739_v7 }
  0xd3   :  { %v826_v11 = vmax.f32 %v788_v10, 0.0 }
  0xd4   :  { %v692_v13 = vpop.f32.mrf.mxu2 }
  0xd5   :  { %842 = vst.msk [vmem:[%s1774_s3 + $0x8] sm:$0xff] %vm555_vm0, %v826_v11  ;;  %v693_v15 = vadd.f32 %v692_v13, %v644_v12 }
  0xd6   :  { %v741_v16 = vpop.f32.mrf.mxu3  ;;  %v645_v17 = vpop.f32.mrf.mxu1 }
  0xd7   :  { %v742_v19 = vadd.f32 %v741_v16, %v693_v15  ;;  %v646_v27 = vadd.f32 %v645_v17, %v597_v24 }
  0xd8   :  { %v792_v21 = vpop.f32.mrf.mxu0 }
  0xd9   :  { %v791_v25 = vadd.f32 %v790_v8, %v742_v19 }
  0xdb   :  { %v827_v26 = vmax.f32 %v791_v25, 0.0 }
  0xdc   :  { %v694_v28 = vpop.f32.mrf.mxu2 }
  0xdd   :  { %843 = vst.msk [vmem:[%s1774_s3 + $0x10] sm:$0xff] %vm555_vm0, %v827_v26  ;;  %v695_v29 = vadd.f32 %v694_v28, %v646_v27 }
  0xde   :  { %v743_v30 = vpop.f32.mrf.mxu3  ;;  %v648_v31 = vpop.f32.mrf.mxu1 }
  0xdf   :  { %v744_v32 = vadd.f32 %v743_v30, %v695_v29  ;;  %v649_v40 = vadd.f32 %v648_v31, %v600_v35 }
  0xe0   :  { %v795_v33 = vpop.f32.mrf.mxu0 }
  0xe1   :  { %v793_v36 = vadd.f32 %v792_v21, %v744_v32 }
  0xe3   :  { %v828_v37 = vmax.f32 %v793_v36, 0.0 }
  0xe4   :  { %v697_v41 = vpop.f32.mrf.mxu2 }
  0xe5   :  { %844 = vst.msk [vmem:[%s1774_s3 + $0x18] sm:$0xff] %vm555_vm0, %v828_v37  ;;  %v698_v42 = vadd.f32 %v697_v41, %v649_v40 }
  0xe6   :  { %v746_v43 = vpop.f32.mrf.mxu3  ;;  %v650_v45 = vpop.f32.mrf.mxu1 }
  0xe7   :  { %v747_v48 = vadd.f32 %v746_v43, %v698_v42  ;;  %v651_v14 = vadd.f32 %v650_v45, %v602_v51 }
  0xe8   :  { %v797_v49 = vpop.f32.mrf.mxu0 }
  0xe9   :  { %v796_v53 = vadd.f32 %v795_v33, %v747_v48 }
  0xeb   :  { %v829_v54 = vmax.f32 %v796_v53, 0.0 }
  0xec   :  { %v699_v55 = vpop.f32.mrf.mxu2 }
  0xed   :  { %845 = vst.msk [vmem:[%s1774_s3 + $0x20] sm:$0xff] %vm555_vm0, %v829_v54  ;;  %v700_v56 = vadd.f32 %v699_v55, %v651_v14 }
  0xee   :  { %v748_v57 = vpop.f32.mrf.mxu3  ;;  %v653_v58 = vpop.f32.mrf.mxu1 }
  0xef   :  { %v749_v59 = vadd.f32 %v748_v57, %v700_v56  ;;  %v654_v23 = vadd.f32 %v653_v58, %v605_v61 }
  0xf0   :  { %v800_v60 = vpop.f32.mrf.mxu0 }
  0xf1   :  { %v798_v62 = vadd.f32 %v797_v49, %v749_v59 }
  0xf3   :  { %v830_v63 = vmax.f32 %v798_v62, 0.0 }
  0xf4   :  { %v702_v0 = vpop.f32.mrf.mxu2 }
  0xf5   :  { %846 = vst.msk [vmem:[%s1774_s3 + $0x28] sm:$0xff] %vm555_vm0, %v830_v63  ;;  %v703_v1 = vadd.f32 %v702_v0, %v654_v23 }
  0xf6   :  { %v751_v2 = vpop.f32.mrf.mxu3  ;;  %v655_v3 = vpop.f32.mrf.mxu1 }
  0xf7   :  { %v752_v4 = vadd.f32 %v751_v2, %v703_v1  ;;  %v656_v39 = vadd.f32 %v655_v3, %v607_v6 }
  0xf8   :  { %v802_v5 = vpop.f32.mrf.mxu0 }
  0xf9   :  { %v801_v7 = vadd.f32 %v800_v60, %v752_v4 }
  0xfb   :  { %v831_v8 = vmax.f32 %v801_v7, 0.0 }
  0xfc   :  { %v704_v9 = vpop.f32.mrf.mxu2 }
  0xfd   :  { %847 = vst.msk [vmem:[%s1774_s3 + $0x30] sm:$0xff] %vm555_vm0, %v831_v8  ;;  %v705_v10 = vadd.f32 %v704_v9, %v656_v39 }
  0xfe   :  { %v753_v11 = vpop.f32.mrf.mxu3  ;;  %v658_v12 = vpop.f32.mrf.mxu1 }
  0xff   :  { %v754_v13 = vadd.f32 %v753_v11, %v705_v10  ;;  %v659_v19 = vadd.f32 %v658_v12, %v1633_v20 }
 0x100   :  { %v805_v15 = vpop.f32.mrf.mxu0 }
 0x101   :  { %v803_v16 = vadd.f32 %v802_v5, %v754_v13 }
 0x103   :  { %v832_v17 = vmax.f32 %v803_v16, 0.0 }
 0x104   :  { %v707_v21 = vpop.f32.mrf.mxu2 }
 0x105   :  { %848 = vst.msk [vmem:[%s1774_s3 + $0x38] sm:$0xff] %vm555_vm0, %v832_v17  ;;  %v708_v18 = vadd.f32 %v707_v21, %v659_v19 }
 0x106   :  { %v756_v47 = vpop.f32.mrf.mxu3  ;;  %v660_v24 = vpop.f32.mrf.mxu1 }
 0x107   :  { %v757_v25 = vadd.f32 %v756_v47, %v708_v18  ;;  %v661_v29 = vadd.f32 %v660_v24, %v1665_v34 }
 0x108   :  { %v807_v26 = vpop.f32.mrf.mxu0 }
 0x109   :  { %v806_v27 = vadd.f32 %v805_v15, %v757_v25 }
 0x10b   :  { %v833_v28 = vmax.f32 %v806_v27, 0.0 }
 0x10c   :  { %v709_v30 = vpop.f32.mrf.mxu2 }
 0x10d   :  { %849 = vst.msk [vmem:[%s1774_s3 + $0x40] sm:$0xff] %vm555_vm0, %v833_v28  ;;  %v710_v20 = vadd.f32 %v709_v30, %v661_v29 }
 0x10e   :  { %v758_v31 = vpop.f32.mrf.mxu3  ;;  %v663_v32 = vpop.f32.mrf.mxu1 }
 0x10f   :  { %v759_v33 = vadd.f32 %v758_v31, %v710_v20  ;;  %v664_v40 = vadd.f32 %v663_v32, %v1674_v44 }
 0x110   :  { %v810_v35 = vpop.f32.mrf.mxu0 }
 0x111   :  { %v808_v36 = vadd.f32 %v807_v26, %v759_v33 }
 0x113   :  { %v834_v37 = vmax.f32 %v808_v36, 0.0 }
 0x114   :  { %v712_v41 = vpop.f32.mrf.mxu2 }
 0x115   :  { %850 = vst.msk [vmem:[%s1774_s3 + $0x48] sm:$0xff] %vm555_vm0, %v834_v37  ;;  %v713_v34 = vadd.f32 %v712_v41, %v664_v40 }
 0x116   :  { %v761_v42 = vpop.f32.mrf.mxu3  ;;  %v665_v43 = vpop.f32.mrf.mxu1 }
 0x117   :  { %v762_v45 = vadd.f32 %v761_v42, %v713_v34  ;;  %v666_v53 = vadd.f32 %v665_v43, %v1682_v50 }
 0x118   :  { %v812_v48 = vpop.f32.mrf.mxu0 }
 0x119   :  { %v811_v49 = vadd.f32 %v810_v35, %v762_v45 }
 0x11b   :  { %v835_v51 = vmax.f32 %v811_v49, 0.0 }
 0x11c   :  { %v714_v54 = vpop.f32.mrf.mxu2 }
 0x11d   :  { %851 = vst.msk [vmem:[%s1774_s3 + $0x50] sm:$0xff] %vm555_vm0, %v835_v51  ;;  %v715_v44 = vadd.f32 %v714_v54, %v666_v53 }
 0x11e   :  { %v763_v14 = vpop.f32.mrf.mxu3  ;;  %v668_v55 = vpop.f32.mrf.mxu1 }
 0x11f   :  { %v764_v56 = vadd.f32 %v763_v14, %v715_v44  ;;  %v669_v60 = vadd.f32 %v668_v55, %v1636_v22 }
 0x120   :  { %v815_v58 = vpop.f32.mrf.mxu0 }
 0x121   :  { %v813_v57 = vadd.f32 %v812_v48, %v764_v56 }
 0x123   :  { %v836_v59 = vmax.f32 %v813_v57, 0.0 }
 0x124   :  { %v717_v61 = vpop.f32.mrf.mxu2 }
 0x125   :  { %852 = vst.msk [vmem:[%s1774_s3 + $0x58] sm:$0xff] %vm555_vm0, %v836_v59  ;;  %v718_v50 = vadd.f32 %v717_v61, %v669_v60 }
 0x126   :  { %v766_v62 = vpop.f32.mrf.mxu3  ;;  %v670_v63 = vpop.f32.mrf.mxu1 }
 0x127   :  { %v767_v23 = vadd.f32 %v766_v62, %v718_v50  ;;  %v671_v2 = vadd.f32 %v670_v63, %v1668_v38 }
 0x128   :  { %v817_v3 = vpop.f32.mrf.mxu0 }
 0x129   :  { %v816_v0 = vadd.f32 %v815_v58, %v767_v23 }
 0x12b   :  { %v837_v1 = vmax.f32 %v816_v0, 0.0 }
 0x12c   :  { %v719_v4 = vpop.f32.mrf.mxu2 }
 0x12d   :  { %853 = vst.msk [vmem:[%s1774_s3 + $0x60] sm:$0xff] %vm555_vm0, %v837_v1  ;;  %v720_v22 = vadd.f32 %v719_v4, %v671_v2 }
 0x12e   :  { %v768_v5 = vpop.f32.mrf.mxu3  ;;  %v673_v6 = vpop.f32.mrf.mxu1 }
 0x12f   :  { %v769_v7 = vadd.f32 %v768_v5, %v720_v22  ;;  %v674_v9 = vadd.f32 %v673_v6, %v1677_v46 }
 0x130   :  { %v820_v12 = vpop.f32.mrf.mxu0 }
 0x131   :  { %v818_v8 = vadd.f32 %v817_v3, %v769_v7 }
 0x133   :  { %v838_v39 = vmax.f32 %v818_v8, 0.0 }
 0x134   :  { %v722_v10 = vpop.f32.mrf.mxu2 }
 0x135   :  { %854 = vst.msk [vmem:[%s1774_s3 + $0x68] sm:$0xff] %vm555_vm0, %v838_v39  ;;  %v723_v38 = vadd.f32 %v722_v10, %v674_v9 }
 0x136   :  { %v771_v11 = vpop.f32.mrf.mxu3  ;;  %v675_v15 = vpop.f32.mrf.mxu1 }
 0x137   :  { %v772_v13 = vadd.f32 %v771_v11, %v723_v38  ;;  %v676_v19 = vadd.f32 %v675_v15, %v1685_v52 }
 0x138   :  { %v822_v24 = vpop.f32.mrf.mxu0 }
 0x139   :  { %v821_v16 = vadd.f32 %v820_v12, %v772_v13 }
 0x13b   :  { %v839_v17 = vmax.f32 %v821_v16, 0.0 }
 0x13c   :  { %v724_v21 = vpop.f32.mrf.mxu2 }
 0x13d   :  { %855 = vst.msk [vmem:[%s1774_s3 + $0x70] sm:$0xff] %vm555_vm0, %v839_v17  ;;  %v725_v46 = vadd.f32 %v724_v21, %v676_v19 }
 0x13e   :  { %v773_v18 = vpop.f32.mrf.mxu3 }
 0x13f   :  { %v774_v47 = vadd.f32 %v773_v18, %v725_v46 }
 0x141   :  { %v823_v25 = vadd.f32 %v822_v24, %v774_v47 }
 0x143   :  { %v840_v26 = vmax.f32 %v823_v25, 0.0 }
 0x145   :  { %856 = vst.msk [vmem:[%s1774_s3 + $0x78] sm:$0xff] %vm555_vm0, %v840_v26 }

// kernel: teacher_forward.17
= control target key start
LH: loop header
LB: loop body
LE: loop exit
PB: predicated region body
PF: predicated region fallthrough
CT: control target
= control target key end

     0   :  { %s2314_s12 = smov 0   ;;  %s2820_s0 = inlined_call_operand.vmem [shape: bf16[512,576], index: 0, kind: input, shape index: {}]   ;;  %s2821_s1 = inlined_call_operand.vmem [shape: bf16[576,3], index: 1, kind: input, shape index: {}]   ;;  %s2822_s2 = inlined_call_operand.vmem [shape: f32[1,3], index: 2, kind: input, shape index: {}]   ;;  %s2823_s3 = inlined_call_operand.vmem [shape: f32[512,3], index: 3, kind: output, shape index: {}]  }
   0x1 LB: > { %s1581_s13 = sadd.s32 4294967295, %s2292_s12   ;;  %p1585_p0 = scmp.ge.s32.totalorder %s2292_s12, 1  ;;  %s2292_s12 = sphi %s2314_s12, %s13_s12  }
   0x2   : > { %p139_p1 = scmp.lt.s32.totalorder %s2292_s12, 3 }
   0x4   : > { %p140_p2 = pnand %p1585_p0, %p139_p1 }
   0x5   : > { %s1586_s20 = sshll.u32 (!%p140_p2), %s1581_s13, 5 }
   0x6   : > { %143 = sbr.rel (%p140_p2) target bundleno = 501 (0x1f5), region = 32  ;;  %p165_p3 = scmp.lt.s32.totalorder (!%p140_p2), %s1586_s20, 63 }
   0xb   : > { %v2159_v0 = vld [vmem:[%s2821_s1 + $0x38] sm:$0xff]  ;;  %v2158_v1 = vld [vmem:[%s2821_s1 + $0x30] sm:$0xff]  ;;  %v2157_v2 = vld [vmem:[%s2821_s1 + $0x28] sm:$0xff]  ;;  %s2825_s20 = smov (!%p165_p3, %s1586_s20), 63  ;;  %vm966_vm0 = vcmask 523264   ;;  %vm1492_vm1 = vcmask 23552  }
   0xc   : > { %2188 = vmatpush.bf16.msra.mxu1 %v2159_v0  ;;  %2189 = vmatpush.bf16.msra.mxu2 %v2159_v0  ;;  %v2156_v3 = vld [vmem:[%s2821_s1 + $0x20] sm:$0xff]  ;;  %v2155_v4 = vld [vmem:[%s2821_s1 + $0x18] sm:$0xff]  ;;  %v2154_v5 = vld [vmem:[%s2821_s1 + $0x10] sm:$0xff]  ;;  %s2212_s27 = smul.u32 20, %s2825_s20  ;;  %s1589_s19 = sshll.u32 %s2825_s20, 3 }
   0xd   : > { %2190 = vmatpush.bf16.msra.mxu3 %v2159_v0  ;;  %1015 = vmatpush.bf16.msra.mxu0 %v2159_v0  ;;  %v2153_v6 = vld [vmem:[%s2821_s1 + $0x8] sm:$0xff]  ;;  %v2152_v7 = vld [vmem:[%s2821_s1] sm:$0xff]  ;;  %v2175_v16 = vld [vmem:[%s2821_s1 + $0xb8] sm:$0xff]  ;;  %s2660_s23 = scalar_lea.vmem %s2823_s3, %s1589_s19 }
   0xe   : > { %s2349_s5 = scalar_lea.vmem %s2820_s0, %s2212_s27  ;;  %v2183_v17 = vld [vmem:[%s2821_s1 + $0xf8] sm:$0xff]  ;;  %v2174_v24 = vld [vmem:[%s2821_s1 + $0xb0] sm:$0xff]  ;;  %v2173_v28 = vld [vmem:[%s2821_s1 + $0xa8] sm:$0xff] }
   0xf   : > { %v1672_v8 = vld [vmem:[%s2349_s5 + $0xa0] sm:$0xf]  ;;  %v2094_v9 = vld [vmem:[%s2349_s5 + $0xb0] sm:$0xf0]  ;;  %v2167_v22 = vld [vmem:[%s2821_s1 + $0x78] sm:$0xff] }
  0x10   : > { %2191 = vmatpush.bf16.msra.mxu1 %v2158_v1  ;;  %2192 = vmatpush.bf16.msra.mxu2 %v2158_v1  ;;  %v1752_v10 = vld [vmem:[%s2349_s5 + $0x140] sm:$0xf]  ;;  %v2114_v11 = vld [vmem:[%s2349_s5 + $0x150] sm:$0xf0]  ;;  %v1673_v18 = vor.u32 %v2094_v9, %v1672_v8  ;;  %v2187_v23 = vld [vmem:[%s2821_s1 + $0x118] sm:$0xff] }
  0x11   : > { %2193 = vmatpush.bf16.msra.mxu3 %v2158_v1  ;;  %1016 = vmatpush.bf16.msra.mxu0 %v2158_v1  ;;  %v1832_v12 = vld [vmem:[%s2349_s5 + $0x1e0] sm:$0xf]  ;;  %v2134_v13 = vld [vmem:[%s2349_s5 + $0x1f0] sm:$0xf0]  ;;  %v1753_v19 = vor.u32 %v2114_v11, %v1752_v10  ;;  %v2181_v29 = vld [vmem:[%s2821_s1 + $0xe8] sm:$0xff] }
  0x12   : > { %v1592_v14 = vld [vmem:[%s2349_s5] sm:$0xf]  ;;  %v2074_v15 = vld [vmem:[%s2349_s5 + $0x10] sm:$0xf0]  ;;  %v1833_v20 = vor.u32 %v2134_v13, %v1832_v12  ;;  %v2165_v30 = vld [vmem:[%s2821_s1 + $0x68] sm:$0xff] }
  0x13   : > { %v1593_v21 = vor.u32 %v2074_v15, %v1592_v14  ;;  %v2182_v25 = vld [vmem:[%s2821_s1 + $0xf0] sm:$0xff]  ;;  %v2185_v31 = vld [vmem:[%s2821_s1 + $0x108] sm:$0xff]  ;;  %v2172_v32 = vld [vmem:[%s2821_s1 + $0xa0] sm:$0xff] }
  0x14   : > { %2194 = vmatpush.bf16.msra.mxu1 %v2157_v2  ;;  %2195 = vmatpush.bf16.msra.mxu2 %v2157_v2  ;;  %v2166_v26 = vld [vmem:[%s2821_s1 + $0x70] sm:$0xff]  ;;  %v2180_v33 = vld [vmem:[%s2821_s1 + $0xe0] sm:$0xff]  ;;  %v1692_v34 = vld [vmem:[%s2349_s5 + $0xc8] sm:$0xf] }
  0x15   : > { %2196 = vmatpush.bf16.msra.mxu3 %v2157_v2  ;;  %1017 = vmatpush.bf16.msra.mxu0 %v2157_v2  ;;  %v2186_v27 = vld [vmem:[%s2821_s1 + $0x110] sm:$0xff]  ;;  %v2099_v35 = vld [vmem:[%s2349_s5 + $0xd8] sm:$0xf0]  ;;  %v1772_v36 = vld [vmem:[%s2349_s5 + $0x168] sm:$0xf] }
  0x16   : > { %v2119_v37 = vld [vmem:[%s2349_s5 + $0x178] sm:$0xf0]  ;;  %v1852_v38 = vld [vmem:[%s2349_s5 + $0x208] sm:$0xf]  ;;  %v2164_v42 = vld [vmem:[%s2821_s1 + $0x60] sm:$0xff]  ;;  %v1693_v45 = vor.u32 %v2099_v35, %v1692_v34 }
  0x17   : > { %v2139_v39 = vld [vmem:[%s2349_s5 + $0x218] sm:$0xf0]  ;;  %v1612_v40 = vld [vmem:[%s2349_s5 + $0x28] sm:$0xf]  ;;  %v1773_v46 = vor.u32 %v2119_v37, %v1772_v36  ;;  %v2170_v50 = vld [vmem:[%s2821_s1 + $0x90] sm:$0xff] }
  0x18   : > { %2197 = vmatpush.bf16.msra.mxu1 %v2156_v3  ;;  %2198 = vmatpush.bf16.msra.mxu2 %v2156_v3  ;;  %v2079_v41 = vld [vmem:[%s2349_s5 + $0x38] sm:$0xf0]  ;;  %v1853_v47 = vor.u32 %v2139_v39, %v1852_v38  ;;  %v2178_v51 = vld [vmem:[%s2821_s1 + $0xd0] sm:$0xff]  ;;  %v2184_v53 = vld [vmem:[%s2821_s1 + $0x100] sm:$0xff] }
  0x19   : > { %2199 = vmatpush.bf16.msra.mxu3 %v2156_v3  ;;  %1018 = vmatpush.bf16.msra.mxu0 %v2156_v3  ;;  %v2171_v43 = vld [vmem:[%s2821_s1 + $0x98] sm:$0xff]  ;;  %v1613_v48 = vor.u32 %v2079_v41, %v1612_v40  ;;  %v2162_v52 = vld [vmem:[%s2821_s1 + $0x50] sm:$0xff]  ;;  %v2169_v54 = vld [vmem:[%s2821_s1 + $0x88] sm:$0xff] }
  0x1a   : > { %v2179_v44 = vld [vmem:[%s2821_s1 + $0xd8] sm:$0xff]  ;;  %v2177_v55 = vld [vmem:[%s2821_s1 + $0xc8] sm:$0xff]  ;;  %v2168_v57 = vld [vmem:[%s2821_s1 + $0x80] sm:$0xff] }
  0x1b   : > { %v2163_v49 = vld [vmem:[%s2821_s1 + $0x58] sm:$0xff]  ;;  %v2161_v56 = vld [vmem:[%s2821_s1 + $0x48] sm:$0xff]  ;;  %v2176_v58 = vld [vmem:[%s2821_s1 + $0xc0] sm:$0xff] }
  0x1c   : > { %2200 = vmatpush.bf16.msra.mxu1 %v2155_v4  ;;  %2201 = vmatpush.bf16.msra.mxu2 %v2155_v4  ;;  %v1712_v59 = vld [vmem:[%s2349_s5 + $0xf0] sm:$0xf]  ;;  %v2104_v60 = vld [vmem:[%s2349_s5 + $0x100] sm:$0xf0]  ;;  %v1732_v8 = vld [vmem:[%s2349_s5 + $0x118] sm:$0xf] }
  0x1d   : > { %2202 = vmatpush.bf16.msra.mxu3 %v2155_v4  ;;  %1019 = vmatpush.bf16.msra.mxu0 %v2155_v4  ;;  %v1792_v61 = vld [vmem:[%s2349_s5 + $0x190] sm:$0xf]  ;;  %v2124_v62 = vld [vmem:[%s2349_s5 + $0x1a0] sm:$0xf0]  ;;  %v1713_v4 = vor.u32 %v2104_v60, %v1712_v59  ;;  %v2109_v9 = vld [vmem:[%s2349_s5 + $0x128] sm:$0xf0] }
  0x1e   : > { %v1872_v63 = vld [vmem:[%s2349_s5 + $0x230] sm:$0xf]  ;;  %v2144_v0 = vld [vmem:[%s2349_s5 + $0x240] sm:$0xf0]  ;;  %v1812_v10 = vld [vmem:[%s2349_s5 + $0x1b8] sm:$0xf] }
  0x1f   : > { %v1632_v1 = vld [vmem:[%s2349_s5 + $0x50] sm:$0xf]  ;;  %v2084_v2 = vld [vmem:[%s2349_s5 + $0x60] sm:$0xf0]  ;;  %v2129_v11 = vld [vmem:[%s2349_s5 + $0x1c8] sm:$0xf0] }
  0x20   : > { %2203 = vmatpush.bf16.msra.mxu1 %v2154_v5  ;;  %2204 = vmatpush.bf16.msra.mxu2 %v2154_v5  ;;  %v2160_v3 = vld [vmem:[%s2821_s1 + $0x40] sm:$0xff]  ;;  %v1892_v12 = vld [vmem:[%s2349_s5 + $0x258] sm:$0xf]  ;;  %v2149_v13 = vld [vmem:[%s2349_s5 + $0x268] sm:$0xf0] }
  0x21   : > { %2205 = vmatpush.bf16.msra.mxu3 %v2154_v5  ;;  %1020 = vmatpush.bf16.msra.mxu0 %v2154_v5  ;;  %v1793_v5 = vor.u32 %v2124_v62, %v1792_v61  ;;  %v1652_v14 = vld [vmem:[%s2349_s5 + $0x78] sm:$0xf]  ;;  %v2089_v15 = vld [vmem:[%s2349_s5 + $0x88] sm:$0xf0]  ;;  %v1620_v34 = vld [vmem:[%s2349_s5 + $0x30] sm:$0xf] }
  0x22   : > { %v2080_v35 = vld [vmem:[%s2349_s5 + $0x40] sm:$0xf0]  ;;  %v2078_v36 = vld [vmem:[%s2349_s5 + $0x34] sm:$0xf]  ;;  %v1622_v37 = vld [vmem:[%s2349_s5 + $0x44] sm:$0xf0] }
  0x23   : > { %v1628_v38 = vld [vmem:[%s2349_s5 + $0x38] sm:$0xf]  ;;  %v2081_v39 = vld [vmem:[%s2349_s5 + $0x48] sm:$0xf0]  ;;  %v1621_v41 = vor.u32 %v2080_v35, %v1620_v34  ;;  %v2090_v59 = vld [vmem:[%s2349_s5 + $0x90] sm:$0xf0] }
  0x24   : > { %2206 = vmatpush.bf16.msra.mxu1 %v2153_v6  ;;  %2207 = vmatpush.bf16.msra.mxu2 %v2153_v6  ;;  %v2088_v60 = vld [vmem:[%s2349_s5 + $0x84] sm:$0xf]  ;;  %v1662_v61 = vld [vmem:[%s2349_s5 + $0x94] sm:$0xf0]  ;;  %v1668_v62 = vld [vmem:[%s2349_s5 + $0x88] sm:$0xf] }
  0x25   : > { %2208 = vmatpush.bf16.msra.mxu3 %v2153_v6  ;;  %1021 = vmatpush.bf16.msra.mxu0 %v2153_v6  ;;  %v1873_v6 = vor.u32 %v2144_v0, %v1872_v63  ;;  %v2091_v63 = vld [vmem:[%s2349_s5 + $0x98] sm:$0xf0]  ;;  %v2101_v34 = vld [vmem:[%s2349_s5 + $0xe8] sm:$0xf0] }
  0x28   : > { %2209 = vmatpush.bf16.msra.mxu1 %v2152_v7  ;;  %2210 = vmatpush.bf16.msra.mxu2 %v2152_v7 }
  0x29   : > { %2211 = vmatpush.bf16.msra.mxu3 %v2152_v7  ;;  %1022 = vmatpush.bf16.msra.mxu0 %v2152_v7  ;;  %v1633_v7 = vor.u32 %v2084_v2, %v1632_v1  ;;  %v1665_v2 = vor.u32 %v2088_v60, %v1662_v61  ;;  %v2106_v60 = vld [vmem:[%s2349_s5 + $0x110] sm:$0xf0] }
  0x2b   : > { %1043 = vmatmul.bf16.vlgmr.msra.gmra.mxu1 %v1673_v18  ;;  %1063 = vmatmul.bf16.vlgmr.msra.gmra.mxu2 %v1753_v19  ;;  %v1893_v18 = vor.u32 %v2149_v13, %v1892_v12  ;;  %v1653_v19 = vor.u32 %v2089_v15, %v1652_v14  ;;  %v2096_v12 = vld [vmem:[%s2349_s5 + $0xc0] sm:$0xf0] }
  0x2c   : > { %1193 = vmatpush.bf16.msrb.mxu2 %v2175_v16  ;;  %1083 = vmatmul.bf16.vlgmr.msra.gmra.mxu3 %v1833_v20  ;;  %v1733_v16 = vor.u32 %v2109_v9, %v1732_v8  ;;  %v2072_v20 = vld [vmem:[%s2349_s5 + $0x4] sm:$0xf]  ;;  %v2095_v8 = vld [vmem:[%s2349_s5 + $0xb8] sm:$0xf0]  ;;  %v2093_v9 = vld [vmem:[%s2349_s5 + $0xac] sm:$0xf] }
  0x2d   : > { %1282 = vmatpush.bf16.msrb.mxu3 %v2183_v17  ;;  %1023 = vmatmul.bf16.vlgmr.msra.gmra.mxu0 %v1593_v21  ;;  %v1813_v17 = vor.u32 %v2129_v11, %v1812_v10  ;;  %v1594_v21 = vld [vmem:[%s2349_s5 + $0x14] sm:$0xf0]  ;;  %v1682_v10 = vld [vmem:[%s2349_s5 + $0xbc] sm:$0xf0]  ;;  %v1688_v11 = vld [vmem:[%s2349_s5 + $0xb0] sm:$0xf] }
  0x2e   : > { %1104 = vmatpush.bf16.msrb.mxu1 %v2167_v22  ;;  %1375 = vmatpush.bf16.msrb.mxu0 %v2187_v23  ;;  %v1600_v22 = vld [vmem:[%s2349_s5 + $0x8] sm:$0xf]  ;;  %v2075_v23 = vld [vmem:[%s2349_s5 + $0x18] sm:$0xf0] }
  0x30   : > { %1194 = vmatpush.bf16.msrb.mxu2 %v2174_v24  ;;  %v2073_v24 = vld [vmem:[%s2349_s5 + $0xc] sm:$0xf] }
  0x31   : > { %1283 = vmatpush.bf16.msrb.mxu3 %v2182_v25  ;;  %v1602_v25 = vld [vmem:[%s2349_s5 + $0x1c] sm:$0xf0] }
  0x32   : > { %1105 = vmatpush.bf16.msrb.mxu1 %v2166_v26  ;;  %1376 = vmatpush.bf16.msrb.mxu0 %v2186_v27  ;;  %v1608_v26 = vld [vmem:[%s2349_s5 + $0x10] sm:$0xf]  ;;  %v2076_v27 = vld [vmem:[%s2349_s5 + $0x20] sm:$0xf0] }
  0x34   : > { %1195 = vmatpush.bf16.msrb.mxu2 %v2173_v28  ;;  %v1597_v28 = vor.u32 %v2072_v20, %v1594_v21 }
  0x35   : > { %1284 = vmatpush.bf16.msrb.mxu3 %v2181_v29  ;;  %v1601_v29 = vor.u32 %v2075_v23, %v1600_v22 }
  0x36   : > { %1106 = vmatpush.bf16.msrb.mxu1 %v2165_v30  ;;  %1377 = vmatpush.bf16.msrb.mxu0 %v2185_v31  ;;  %v1605_v30 = vor.u32 %v2073_v24, %v1602_v25  ;;  %v1609_v31 = vor.u32 %v2076_v27, %v1608_v26  ;;  %v2097_v27 = vld [vmem:[%s2349_s5 + $0xcc] sm:$0xf] }
  0x38   : > { %1196 = vmatpush.bf16.msrb.mxu2 %v2172_v32  ;;  %v2077_v32 = vld [vmem:[%s2349_s5 + $0x2c] sm:$0xf] }
  0x39   : > { %1285 = vmatpush.bf16.msrb.mxu3 %v2180_v33  ;;  %v1614_v33 = vld [vmem:[%s2349_s5 + $0x3c] sm:$0xf0] }
  0x3a   : > { %1107 = vmatpush.bf16.msrb.mxu1 %v2164_v42  ;;  %1378 = vmatpush.bf16.msrb.mxu0 %v2184_v53  ;;  %v1617_v40 = vor.u32 %v2077_v32, %v1614_v33  ;;  %v1625_v42 = vor.u32 %v2078_v36, %v1622_v37  ;;  %v1702_v32 = vld [vmem:[%s2349_s5 + $0xe4] sm:$0xf0]  ;;  %v1708_v33 = vld [vmem:[%s2349_s5 + $0xd8] sm:$0xf] }
  0x3b   : > { %1048 = vmatmul.bf16.gmra.mxu1 %v1693_v45  ;;  %1068 = vmatmul.bf16.gmra.mxu2 %v1773_v46  ;;  %v1634_v45 = vld [vmem:[%s2349_s5 + $0x64] sm:$0xf0]  ;;  %v1640_v46 = vld [vmem:[%s2349_s5 + $0x58] sm:$0xf] }
  0x3c   : > { %1197 = vmatpush.bf16.msrb.mxu2 %v2171_v43  ;;  %1088 = vmatmul.bf16.gmra.mxu3 %v1853_v47  ;;  %v1629_v43 = vor.u32 %v2081_v39, %v1628_v38  ;;  %v2085_v47 = vld [vmem:[%s2349_s5 + $0x68] sm:$0xf0] }
  0x3d   : > { %1286 = vmatpush.bf16.msrb.mxu3 %v2179_v44  ;;  %1028 = vmatmul.bf16.gmra.mxu0 %v1613_v48  ;;  %v2082_v44 = vld [vmem:[%s2349_s5 + $0x54] sm:$0xf]  ;;  %v2083_v48 = vld [vmem:[%s2349_s5 + $0x5c] sm:$0xf]  ;;  %v1641_v53 = vor.u32 %v2085_v47, %v1640_v46 }
  0x3e   : > { %1108 = vmatpush.bf16.msrb.mxu1 %v2163_v49  ;;  %v1642_v49 = vld [vmem:[%s2349_s5 + $0x6c] sm:$0xf0] }
  0x40   : > { %1198 = vmatpush.bf16.msrb.mxu2 %v2170_v50  ;;  %v1648_v50 = vld [vmem:[%s2349_s5 + $0x60] sm:$0xf] }
  0x41   : > { %1287 = vmatpush.bf16.msrb.mxu3 %v2178_v51  ;;  %v2086_v51 = vld [vmem:[%s2349_s5 + $0x70] sm:$0xf0] }
  0x42   : > { %1109 = vmatpush.bf16.msrb.mxu1 %v2162_v52  ;;  %v1637_v52 = vor.u32 %v2082_v44, %v1634_v45 }
  0x44   : > { %1199 = vmatpush.bf16.msrb.mxu2 %v2169_v54  ;;  %v1645_v54 = vor.u32 %v2083_v48, %v1642_v49 }
  0x45   : > { %1288 = vmatpush.bf16.msrb.mxu3 %v2177_v55  ;;  %v1649_v55 = vor.u32 %v2086_v51, %v1648_v50 }
  0x46   : > { %1110 = vmatpush.bf16.msrb.mxu1 %v2161_v56  ;;  %v2087_v56 = vld [vmem:[%s2349_s5 + $0x7c] sm:$0xf] }
  0x48   : > { %1200 = vmatpush.bf16.msrb.mxu2 %v2168_v57  ;;  %v1654_v57 = vld [vmem:[%s2349_s5 + $0x8c] sm:$0xf0] }
  0x49   : > { %1289 = vmatpush.bf16.msrb.mxu3 %v2176_v58  ;;  %v1660_v58 = vld [vmem:[%s2349_s5 + $0x80] sm:$0xf]  ;;  %v1657_v0 = vor.u32 %v2087_v56, %v1654_v57  ;;  %v2105_v56 = vld [vmem:[%s2349_s5 + $0x108] sm:$0xf0]  ;;  %v2103_v57 = vld [vmem:[%s2349_s5 + $0xfc] sm:$0xf] }
  0x4a   : > { %1111 = vmatpush.bf16.msrb.mxu1 %v2160_v3  ;;  %v1661_v1 = vor.u32 %v2090_v59, %v1660_v58  ;;  %v1669_v3 = vor.u32 %v2091_v63, %v1668_v62  ;;  %v1722_v58 = vld [vmem:[%s2349_s5 + $0x10c] sm:$0xf0]  ;;  %v1728_v59 = vld [vmem:[%s2349_s5 + $0x100] sm:$0xf] }
  0x4b   : > { %1053 = vmatmul.bf16.gmra.mxu1 %v1713_v4  ;;  %1073 = vmatmul.bf16.gmra.mxu2 %v1793_v5  ;;  %v2509_v4 = vld [vmem:[%s2822_s2] ss:$0 sm:$0xff]  ;;  %v2092_v5 = vld [vmem:[%s2349_s5 + $0xa4] sm:$0xf] }
  0x4c   : > { %1093 = vmatmul.bf16.gmra.mxu3 %v1873_v6  ;;  %v1674_v6 = vld [vmem:[%s2349_s5 + $0xb4] sm:$0xf0] }
  0x4d   : > { %1033 = vmatmul.bf16.gmra.mxu0 %v1633_v7  ;;  %v1680_v7 = vld [vmem:[%s2349_s5 + $0xa8] sm:$0xf]  ;;  %v1677_v13 = vor.u32 %v2092_v5, %v1674_v6  ;;  %v1725_v5 = vor.u32 %v2103_v57, %v1722_v58  ;;  %v1729_v6 = vor.u32 %v2106_v60, %v1728_v59  ;;  %v1754_v57 = vld [vmem:[%s2349_s5 + $0x154] sm:$0xf0]  ;;  %v2115_v59 = vld [vmem:[%s2349_s5 + $0x158] sm:$0xf0] }
  0x4e   : > { %v1681_v14 = vor.u32 %v2095_v8, %v1680_v7  ;;  %v1760_v58 = vld [vmem:[%s2349_s5 + $0x148] sm:$0xf]  ;;  %v2113_v60 = vld [vmem:[%s2349_s5 + $0x14c] sm:$0xf] }
  0x5b   : > { %1058 = vmatmul.bf16.gmra.mxu1 %v1733_v16  ;;  %1078 = vmatmul.bf16.gmra.mxu2 %v1813_v17  ;;  %v1685_v16 = vor.u32 %v2093_v9, %v1682_v10  ;;  %v1689_v17 = vor.u32 %v2096_v12, %v1688_v11 }
  0x5c   : > { %1098 = vmatmul.bf16.gmra.mxu3 %v1893_v18 }
  0x5d   : > { %1038 = vmatmul.bf16.gmra.mxu0 %v1653_v19 }
  0x6b   : > { %1112 = vmatmul.bf16.vlgmr.msrb.gmra.mxu1 %v1597_v28  ;;  %1201 = vmatmul.bf16.vlgmr.msrb.gmra.mxu2 %v1601_v29  ;;  %v1694_v28 = vld [vmem:[%s2349_s5 + $0xdc] sm:$0xf0]  ;;  %v1700_v29 = vld [vmem:[%s2349_s5 + $0xd0] sm:$0xf] }
  0x6c   : > { %1290 = vmatmul.bf16.vlgmr.msrb.gmra.mxu3 %v1605_v30  ;;  %v2100_v30 = vld [vmem:[%s2349_s5 + $0xe0] sm:$0xf0]  ;;  %v1697_v38 = vor.u32 %v2097_v27, %v1694_v28  ;;  %v1742_v27 = vld [vmem:[%s2349_s5 + $0x134] sm:$0xf0]  ;;  %v1748_v28 = vld [vmem:[%s2349_s5 + $0x128] sm:$0xf] }
  0x6d   : > { %2054 = vmatmul.msk.bf16.vlgmr.msrb.gmra.mxu0 %vm966_vm0, %v1609_v31  ;;  %v2098_v31 = vld [vmem:[%s2349_s5 + $0xd4] sm:$0xf]  ;;  %v1701_v39 = vor.u32 %v2100_v30, %v1700_v29  ;;  %v2111_v29 = vld [vmem:[%s2349_s5 + $0x138] sm:$0xf0] }
  0x7b   : > { %1117 = vmatmul.bf16.gmra.mxu1 %v1617_v40  ;;  %1206 = vmatmul.bf16.gmra.mxu2 %v1621_v41 }
  0x7c   : > { %1295 = vmatmul.bf16.gmra.mxu3 %v1625_v42  ;;  %v1705_v42 = vor.u32 %v2098_v31, %v1702_v32 }
  0x7d   : > { %2055 = vmatmul.msk.bf16.gmra.mxu0 %vm966_vm0, %v1629_v43  ;;  %v1709_v43 = vor.u32 %v2101_v34, %v1708_v33 }
  0x8b   : > { %1122 = vmatmul.bf16.gmra.mxu1 %v1637_v52  ;;  %1211 = vmatmul.bf16.gmra.mxu2 %v1641_v53  ;;  %v2102_v53 = vld [vmem:[%s2349_s5 + $0xf4] sm:$0xf] }
  0x8c   : > { %1300 = vmatmul.bf16.gmra.mxu3 %v1645_v54  ;;  %v1714_v54 = vld [vmem:[%s2349_s5 + $0x104] sm:$0xf0] }
  0x8d   : > { %2056 = vmatmul.msk.bf16.gmra.mxu0 %vm966_vm0, %v1649_v55  ;;  %v1720_v55 = vld [vmem:[%s2349_s5 + $0xf8] sm:$0xf] }
  0x9b   : > { %1127 = vmatmul.bf16.gmra.mxu1 %v1657_v0  ;;  %1216 = vmatmul.bf16.gmra.mxu2 %v1661_v1  ;;  %v1717_v0 = vor.u32 %v2102_v53, %v1714_v54  ;;  %v1721_v1 = vor.u32 %v2105_v56, %v1720_v55  ;;  %v2112_v56 = vld [vmem:[%s2349_s5 + $0x144] sm:$0xf] }
  0x9c   : > { %1305 = vmatmul.bf16.gmra.mxu3 %v1665_v2 }
  0x9d   : > { %2057 = vmatmul.msk.bf16.gmra.mxu0 %vm966_vm0, %v1669_v3 }
  0xa8   : > { %v1044_v15 = vpop.f32.mrf.mxu1 }
  0xa9   : > { %v2520_v18 = vadd.f32 %v2509_v4, %v1044_v15 }
  0xaa   : > { %v2522_v19 = vpop.f32.mrf.mxu0 }
  0xab   : > { %1132 = vmatmul.bf16.gmra.mxu1 %v1677_v13  ;;  %1221 = vmatmul.bf16.gmra.mxu2 %v1681_v14 }
  0xac   : > { %1310 = vmatmul.bf16.gmra.mxu3 %v1685_v16  ;;  %v2107_v16 = vld [vmem:[%s2349_s5 + $0x11c] sm:$0xf] }
  0xad   : > { %2058 = vmatmul.msk.bf16.gmra.mxu0 %vm966_vm0, %v1689_v17  ;;  %v1734_v17 = vld [vmem:[%s2349_s5 + $0x12c] sm:$0xf0] }
  0xae   : > { %v1064_v20 = vpop.f32.mrf.mxu2  ;;  %v1737_v33 = vor.u32 %v2107_v16, %v1734_v17 }
  0xaf   : > { %v2526_v21 = vadd.f32 %v2509_v4, %v1064_v20  ;;  %v1084_v22 = vpop.f32.mrf.mxu3  ;;  %v1740_v20 = vld [vmem:[%s2349_s5 + $0x120] sm:$0xf] }
  0xb0   : > { %v2529_v23 = vadd.f32 %v2509_v4, %v1084_v22  ;;  %v1046_v24 = vpop.f32.mrf.mxu1  ;;  %v2110_v22 = vld [vmem:[%s2349_s5 + $0x130] sm:$0xf0] }
  0xb1   : > { %v2532_v25 = vadd.f32 %v2509_v4, %v1046_v24  ;;  %v2108_v24 = vld [vmem:[%s2349_s5 + $0x124] sm:$0xf]  ;;  %v1741_v34 = vor.u32 %v2110_v22, %v1740_v20  ;;  %v1025_v22 = vadd.f32 %v2509_v4, %v2522_v19 }
  0xb2   : > { %v2534_v26 = vpop.f32.mrf.mxu0 }
  0xb3   : > { %v1027_v19 = vadd.f32 %v2509_v4, %v2534_v26 }
  0xb6   : > { %v1066_v35 = vpop.f32.mrf.mxu2 }
  0xb7   : > { %v2545_v36 = vadd.f32 %v2509_v4, %v1066_v35  ;;  %v1086_v37 = vpop.f32.mrf.mxu3 }
  0xb8   : > { %v2548_v40 = vadd.f32 %v2509_v4, %v1086_v37  ;;  %v1049_v41 = vpop.f32.mrf.mxu1 }
  0xb9   : > { %v2551_v44 = vadd.f32 %v2509_v4, %v1049_v41 }
  0xba   : > { %v2553_v45 = vpop.f32.mrf.mxu0 }
  0xbb   : > { %1137 = vmatmul.bf16.gmra.mxu1 %v1697_v38  ;;  %1226 = vmatmul.bf16.gmra.mxu2 %v1701_v39  ;;  %v1745_v38 = vor.u32 %v2108_v24, %v1742_v27  ;;  %v1749_v39 = vor.u32 %v2111_v29, %v1748_v28 }
  0xbc   : > { %1315 = vmatmul.bf16.gmra.mxu3 %v1705_v42 }
  0xbd   : > { %2059 = vmatmul.msk.bf16.gmra.mxu0 %vm966_vm0, %v1709_v43 }
  0xbe   : > { %v1069_v46 = vpop.f32.mrf.mxu2 }
  0xbf   : > { %v2557_v47 = vadd.f32 %v2509_v4, %v1069_v46  ;;  %v1089_v48 = vpop.f32.mrf.mxu3 }
  0xc0   : > { %v2560_v49 = vadd.f32 %v2509_v4, %v1089_v48  ;;  %v1051_v50 = vpop.f32.mrf.mxu1 }
  0xc1   : > { %v2563_v51 = vadd.f32 %v2509_v4, %v1051_v50 }
  0xc2   : > { %v2565_v52 = vpop.f32.mrf.mxu0 }
  0xc6   : > { %v1071_v61 = vpop.f32.mrf.mxu2 }
  0xc7   : > { %v2576_v62 = vadd.f32 %v2509_v4, %v1071_v61  ;;  %v1091_v63 = vpop.f32.mrf.mxu3  ;;  %v1762_v61 = vld [vmem:[%s2349_s5 + $0x15c] sm:$0xf0] }
  0xc8   : > { %v2579_v2 = vadd.f32 %v2509_v4, %v1091_v63  ;;  %v1054_v3 = vpop.f32.mrf.mxu1  ;;  %v1768_v63 = vld [vmem:[%s2349_s5 + $0x150] sm:$0xf]  ;;  %v1765_v16 = vor.u32 %v2113_v60, %v1762_v61 }
  0xc9   : > { %v2582_v7 = vadd.f32 %v2509_v4, %v1054_v3 }
  0xca   : > { %v2584_v8 = vpop.f32.mrf.mxu0 }
  0xcb   : > { %1142 = vmatmul.bf16.gmra.mxu1 %v1717_v0  ;;  %1231 = vmatmul.bf16.gmra.mxu2 %v1721_v1  ;;  %v2116_v0 = vld [vmem:[%s2349_s5 + $0x160] sm:$0xf0] }
  0xcc   : > { %1320 = vmatmul.bf16.gmra.mxu3 %v1725_v5  ;;  %v1769_v17 = vor.u32 %v2116_v0, %v1768_v63 }
  0xcd   : > { %2060 = vmatmul.msk.bf16.gmra.mxu0 %vm966_vm0, %v1729_v6  ;;  %v1757_v6 = vor.u32 %v2112_v56, %v1754_v57  ;;  %v1782_v56 = vld [vmem:[%s2349_s5 + $0x184] sm:$0xf0]  ;;  %v1788_v57 = vld [vmem:[%s2349_s5 + $0x178] sm:$0xf] }
  0xce   : > { %v1074_v9 = vpop.f32.mrf.mxu2 }
  0xcf   : > { %v2588_v10 = vadd.f32 %v2509_v4, %v1074_v9  ;;  %v1094_v11 = vpop.f32.mrf.mxu3  ;;  %v1761_v9 = vor.u32 %v2115_v59, %v1760_v58  ;;  %v2121_v58 = vld [vmem:[%s2349_s5 + $0x188] sm:$0xf0] }
  0xd0   : > { %v2591_v12 = vadd.f32 %v2509_v4, %v1094_v11  ;;  %v1056_v13 = vpop.f32.mrf.mxu1  ;;  %v1789_v26 = vor.u32 %v2121_v58, %v1788_v57 }
  0xd1   : > { %v2594_v14 = vadd.f32 %v2509_v4, %v1056_v13 }
  0xd2   : > { %v2596_v15 = vpop.f32.mrf.mxu0 }
  0xd6   : > { %v1076_v30 = vpop.f32.mrf.mxu2 }
  0xd7   : > { %v2607_v31 = vadd.f32 %v2509_v4, %v1076_v30  ;;  %v1096_v32 = vpop.f32.mrf.mxu3 }
  0xd8   : > { %v2610_v35 = vadd.f32 %v2509_v4, %v1096_v32  ;;  %v1059_v37 = vpop.f32.mrf.mxu1 }
  0xd9   : > { %v2613_v41 = vadd.f32 %v2509_v4, %v1059_v37  ;;  %v2117_v37 = vld [vmem:[%s2349_s5 + $0x16c] sm:$0xf] }
  0xda   : > { %v2615_v42 = vpop.f32.mrf.mxu0 }
  0xdb   : > { %1147 = vmatmul.bf16.gmra.mxu1 %v1737_v33  ;;  %1236 = vmatmul.bf16.gmra.mxu2 %v1741_v34 }
  0xdc   : > { %1325 = vmatmul.bf16.gmra.mxu3 %v1745_v38  ;;  %v1774_v38 = vld [vmem:[%s2349_s5 + $0x17c] sm:$0xf0] }
  0xdd   : > { %2061 = vmatmul.msk.bf16.gmra.mxu0 %vm966_vm0, %v1749_v39  ;;  %v1780_v39 = vld [vmem:[%s2349_s5 + $0x170] sm:$0xf]  ;;  %v1777_v63 = vor.u32 %v2117_v37, %v1774_v38  ;;  %v1800_v37 = vld [vmem:[%s2349_s5 + $0x198] sm:$0xf]  ;;  %v2125_v38 = vld [vmem:[%s2349_s5 + $0x1a8] sm:$0xf0] }
  0xde   : > { %v1079_v43 = vpop.f32.mrf.mxu2 }
  0xdf   : > { %v2619_v46 = vadd.f32 %v2509_v4, %v1079_v43  ;;  %v1099_v48 = vpop.f32.mrf.mxu3  ;;  %v2120_v43 = vld [vmem:[%s2349_s5 + $0x180] sm:$0xf0] }
  0xe0   : > { %v2622_v50 = vadd.f32 %v2509_v4, %v1099_v48  ;;  %v1061_v53 = vpop.f32.mrf.mxu1  ;;  %v2118_v48 = vld [vmem:[%s2349_s5 + $0x174] sm:$0xf]  ;;  %v1781_v0 = vor.u32 %v2120_v43, %v1780_v39  ;;  %v2123_v39 = vld [vmem:[%s2349_s5 + $0x19c] sm:$0xf] }
  0xe1   : > { %v2625_v54 = vadd.f32 %v2509_v4, %v1061_v53 }
  0xe2   : > { %v2627_v55 = vpop.f32.mrf.mxu0 }
  0xe6   : > { %v1081_v1 = vpop.f32.mrf.mxu2 }
  0xe7   : > { %v2638_v3 = vadd.f32 %v2509_v4, %v1081_v1  ;;  %v1101_v5 = vpop.f32.mrf.mxu3 }
  0xe8   : > { %v2641_v11 = vadd.f32 %v2509_v4, %v1101_v5  ;;  %v1113_v13 = vpop.f32.mrf.mxu1  ;;  %v1785_v5 = vor.u32 %v2118_v48, %v1782_v56  ;;  %v1802_v48 = vld [vmem:[%s2349_s5 + $0x1ac] sm:$0xf0]  ;;  %v2126_v56 = vld [vmem:[%s2349_s5 + $0x1b0] sm:$0xf0] }
  0xe9   : > { %v1114_v24 = vadd.f32 %v1113_v13, %v1025_v22 }
  0xea   : > { %v1380_v20 = vpop.f32.mrf.mxu0 }
  0xeb   : > { %1152 = vmatmul.bf16.gmra.mxu1 %v1757_v6  ;;  %1241 = vmatmul.bf16.gmra.mxu2 %v1761_v9 }
  0xec   : > { %1330 = vmatmul.bf16.gmra.mxu3 %v1765_v16  ;;  %v1030_v16 = vadd.f32 %v2509_v4, %v2553_v45 }
  0xed   : > { %2062 = vmatmul.msk.bf16.gmra.mxu0 %vm966_vm0, %v1769_v17 }
  0xee   : > { %v1202_v27 = vpop.f32.mrf.mxu2 }
  0xef   : > { %v1203_v28 = vadd.f32 %v1202_v27, %v1114_v24  ;;  %v1291_v29 = vpop.f32.mrf.mxu3 }
  0xf0   : > { %v1115_v30 = vpop.f32.mrf.mxu1 }
  0xf1   : > { %v1292_v32 = vadd.f32 %v1291_v29, %v1203_v28  ;;  %v1116_v53 = vadd.f32 %v1115_v30, %v1027_v19  ;;  %v2122_v19 = vld [vmem:[%s2349_s5 + $0x194] sm:$0xf] }
  0xf2   : > { %v1382_v33 = vpop.f32.mrf.mxu0 }
  0xf3   : > { %v1381_v34 = vadd.f32 %v1380_v20, %v1292_v32  ;;  %v1032_v32 = vadd.f32 %v2509_v4, %v2565_v52 }
  0xf5   : > { %2222 = vtanh.f32 %v1381_v34  ;;  %v1794_v34 = vld [vmem:[%s2349_s5 + $0x1a4] sm:$0xf0] }
  0xf6   : > { %v1204_v59 = vpop.f32.mrf.mxu2 }
  0xf7   : > { %v1205_v60 = vadd.f32 %v1204_v59, %v1116_v53  ;;  %v1293_v61 = vpop.f32.mrf.mxu3  ;;  %v1808_v53 = vld [vmem:[%s2349_s5 + $0x1a0] sm:$0xf] }
  0xf8   : > { %v1118_v1 = vpop.f32.mrf.mxu1 }
  0xf9   : > { %v1294_v6 = vadd.f32 %v1293_v61, %v1205_v60  ;;  %v1119_v20 = vadd.f32 %v1118_v1, %v1030_v16  ;;  %v1797_v60 = vor.u32 %v2122_v19, %v1794_v34  ;;  %v1801_v61 = vor.u32 %v2125_v38, %v1800_v37  ;;  %v2128_v19 = vld [vmem:[%s2349_s5 + $0x1c4] sm:$0xf]  ;;  %v1822_v37 = vld [vmem:[%s2349_s5 + $0x1d4] sm:$0xf0]  ;;  %v1828_v38 = vld [vmem:[%s2349_s5 + $0x1c8] sm:$0xf] }
  0xfa   : > { %v1385_v9 = vpop.f32.mrf.mxu0 }
  0xfb   : > { %v2223_v13 = vpop.eup %2222  ;;  %v1383_v17 = vadd.f32 %v1382_v33, %v1294_v6  ;;  %1157 = vmatmul.bf16.gmra.mxu1 %v1777_v63  ;;  %1246 = vmatmul.bf16.gmra.mxu2 %v1781_v0  ;;  %v1805_v63 = vor.u32 %v2123_v39, %v1802_v48  ;;  %v1809_v0 = vor.u32 %v2126_v56, %v1808_v53  ;;  %v2131_v39 = vld [vmem:[%s2349_s5 + $0x1d8] sm:$0xf0] }
  0xfc   : > { %1493 = vst.msk [vmem:[%s2660_s23] sm:$0xff] %vm1492_vm1, %v2223_v13  ;;  %1335 = vmatmul.bf16.gmra.mxu3 %v1785_v5  ;;  %v1035_v6 = vadd.f32 %v2509_v4, %v2584_v8 }
  0xfd   : > { %2063 = vmatmul.msk.bf16.gmra.mxu0 %vm966_vm0, %v1789_v26  ;;  %2224 = vtanh.f32 %v1383_v17 }
  0xfe   : > { %v1207_v22 = vpop.f32.mrf.mxu2 }
  0xff   : > { %v1208_v24 = vadd.f32 %v1207_v22, %v1119_v20  ;;  %v1296_v45 = vpop.f32.mrf.mxu3 }
 0x100   : > { %v1120_v27 = vpop.f32.mrf.mxu1 }
 0x101   : > { %v1297_v28 = vadd.f32 %v1296_v45, %v1208_v24  ;;  %v1121_v43 = vadd.f32 %v1120_v27, %v1032_v32  ;;  %v1037_v27 = vadd.f32 %v2509_v4, %v2596_v15  ;;  %v1820_v32 = vld [vmem:[%s2349_s5 + $0x1c0] sm:$0xf] }
 0x102   : > { %v1387_v29 = vpop.f32.mrf.mxu0 }
 0x103   : > { %v2225_v30 = vpop.eup %2224  ;;  %v1386_v33 = vadd.f32 %v1385_v9, %v1297_v28 }
 0x104   : > { %1494 = vst.msk [vmem:[%s2660_s23 + $0x8] sm:$0xff] %vm1492_vm1, %v2225_v30  ;;  %v1814_v30 = vld [vmem:[%s2349_s5 + $0x1cc] sm:$0xf0] }
 0x105   : > { %2226 = vtanh.f32 %v1386_v33  ;;  %v2130_v33 = vld [vmem:[%s2349_s5 + $0x1d0] sm:$0xf0] }
 0x106   : > { %v1209_v57 = vpop.f32.mrf.mxu2 }
 0x107   : > { %v1210_v58 = vadd.f32 %v1209_v57, %v1121_v43  ;;  %v1298_v59 = vpop.f32.mrf.mxu3  ;;  %v1821_v57 = vor.u32 %v2130_v33, %v1820_v32  ;;  %v2136_v32 = vld [vmem:[%s2349_s5 + $0x200] sm:$0xf0] }
 0x108   : > { %v1123_v52 = vpop.f32.mrf.mxu1 }
 0x109   : > { %v1299_v1 = vadd.f32 %v1298_v59, %v1210_v58  ;;  %v1124_v13 = vadd.f32 %v1123_v52, %v1035_v6  ;;  %v1825_v58 = vor.u32 %v2128_v19, %v1822_v37  ;;  %v1829_v59 = vor.u32 %v2131_v39, %v1828_v38 }
 0x10a   : > { %v1390_v5 = vpop.f32.mrf.mxu0 }
 0x10b   : > { %v2227_v26 = vpop.eup %2226  ;;  %v1388_v9 = vadd.f32 %v1387_v29, %v1299_v1  ;;  %1162 = vmatmul.bf16.gmra.mxu1 %v1797_v60  ;;  %1251 = vmatmul.bf16.gmra.mxu2 %v1801_v61  ;;  %v2127_v29 = vld [vmem:[%s2349_s5 + $0x1bc] sm:$0xf] }
 0x10c   : > { %1495 = vst.msk [vmem:[%s2660_s23 + $0x10] sm:$0xff] %vm1492_vm1, %v2227_v26  ;;  %1340 = vmatmul.bf16.gmra.mxu3 %v1805_v63  ;;  %v1817_v56 = vor.u32 %v2127_v29, %v1814_v30  ;;  %v1040_v63 = vadd.f32 %v2509_v4, %v2615_v42  ;;  %v1842_v29 = vld [vmem:[%s2349_s5 + $0x1fc] sm:$0xf0]  ;;  %v1848_v30 = vld [vmem:[%s2349_s5 + $0x1f0] sm:$0xf] }
 0x10d   : > { %2064 = vmatmul.msk.bf16.gmra.mxu0 %vm966_vm0, %v1809_v0  ;;  %2228 = vtanh.f32 %v1388_v9  ;;  %v1849_v39 = vor.u32 %v2136_v32, %v1848_v30 }
 0x10e   : > { %v1212_v16 = vpop.f32.mrf.mxu2 }
 0x10f   : > { %v1213_v17 = vadd.f32 %v1212_v16, %v1124_v13  ;;  %v1301_v8 = vpop.f32.mrf.mxu3 }
 0x110   : > { %v1125_v20 = vpop.f32.mrf.mxu1 }
 0x111   : > { %v1302_v22 = vadd.f32 %v1301_v8, %v1213_v17  ;;  %v1126_v34 = vadd.f32 %v1125_v20, %v1037_v27  ;;  %v1042_v17 = vadd.f32 %v2509_v4, %v2627_v55  ;;  %v2132_v20 = vld [vmem:[%s2349_s5 + $0x1e4] sm:$0xf]  ;;  %v2133_v27 = vld [vmem:[%s2349_s5 + $0x1ec] sm:$0xf] }
 0x112   : > { %v1392_v24 = vpop.f32.mrf.mxu0  ;;  %v1845_v55 = vor.u32 %v2133_v27, %v1842_v29 }
 0x113   : > { %v2229_v45 = vpop.eup %2228  ;;  %v1391_v28 = vadd.f32 %v1390_v5, %v1302_v22  ;;  %v1834_v22 = vld [vmem:[%s2349_s5 + $0x1f4] sm:$0xf0] }
 0x114   : > { %1496 = vst.msk [vmem:[%s2660_s23 + $0x18] sm:$0xff] %vm1492_vm1, %v2229_v45  ;;  %v2135_v45 = vld [vmem:[%s2349_s5 + $0x1f8] sm:$0xf0]  ;;  %v1837_v37 = vor.u32 %v2132_v20, %v1834_v22 }
 0x115   : > { %2230 = vtanh.f32 %v1391_v28 }
 0x116   : > { %v1214_v43 = vpop.f32.mrf.mxu2 }
 0x117   : > { %v1215_v48 = vadd.f32 %v1214_v43, %v1126_v34  ;;  %v1303_v53 = vpop.f32.mrf.mxu3 }
 0x118   : > { %v1128_v15 = vpop.f32.mrf.mxu1 }
 0x119   : > { %v1304_v60 = vadd.f32 %v1303_v53, %v1215_v48  ;;  %v1129_v1 = vadd.f32 %v1128_v15, %v1040_v63 }
 0x11a   : > { %v1395_v61 = vpop.f32.mrf.mxu0 }
 0x11b   : > { %v2231_v52 = vpop.eup %2230  ;;  %v1393_v0 = vadd.f32 %v1392_v24, %v1304_v60  ;;  %1167 = vmatmul.bf16.gmra.mxu1 %v1817_v56  ;;  %1256 = vmatmul.bf16.gmra.mxu2 %v1821_v57  ;;  %v1840_v24 = vld [vmem:[%s2349_s5 + $0x1e8] sm:$0xf] }
 0x11c   : > { %1497 = vst.msk [vmem:[%s2660_s23 + $0x20] sm:$0xff] %vm1492_vm1, %v2231_v52  ;;  %1345 = vmatmul.bf16.gmra.mxu3 %v1825_v58  ;;  %v1841_v38 = vor.u32 %v2135_v45, %v1840_v24 }
 0x11d   : > { %2065 = vmatmul.msk.bf16.gmra.mxu0 %vm966_vm0, %v1829_v59  ;;  %2232 = vtanh.f32 %v1393_v0 }
 0x11e   : > { %v1217_v5 = vpop.f32.mrf.mxu2 }
 0x11f   : > { %v1218_v26 = vadd.f32 %v1217_v5, %v1129_v1  ;;  %v1306_v42 = vpop.f32.mrf.mxu3  ;;  %v2137_v1 = vld [vmem:[%s2349_s5 + $0x20c] sm:$0xf]  ;;  %v1854_v5 = vld [vmem:[%s2349_s5 + $0x21c] sm:$0xf0] }
 0x120   : > { %v1130_v6 = vpop.f32.mrf.mxu1  ;;  %v1857_v22 = vor.u32 %v2137_v1, %v1854_v5 }
 0x121   : > { %v1307_v9 = vadd.f32 %v1306_v42, %v1218_v26  ;;  %v1131_v28 = vadd.f32 %v1130_v6, %v1042_v17  ;;  %v1860_v26 = vld [vmem:[%s2349_s5 + $0x210] sm:$0xf]  ;;  %v2140_v42 = vld [vmem:[%s2349_s5 + $0x220] sm:$0xf0]  ;;  %v2138_v6 = vld [vmem:[%s2349_s5 + $0x214] sm:$0xf] }
 0x122   : > { %v1397_v13 = vpop.f32.mrf.mxu0  ;;  %v1861_v24 = vor.u32 %v2140_v42, %v1860_v26 }
 0x123   : > { %v2233_v16 = vpop.eup %2232  ;;  %v1396_v8 = vadd.f32 %v1395_v61, %v1307_v9  ;;  %v1862_v9 = vld [vmem:[%s2349_s5 + $0x224] sm:$0xf0] }
 0x124   : > { %1498 = vst.msk [vmem:[%s2660_s23 + $0x28] sm:$0xff] %vm1492_vm1, %v2233_v16  ;;  %v2141_v16 = vld [vmem:[%s2349_s5 + $0x228] sm:$0xf0]  ;;  %v1865_v27 = vor.u32 %v2138_v6, %v1862_v9 }
 0x125   : > { %2234 = vtanh.f32 %v1396_v8 }
 0x126   : > { %v1219_v33 = vpop.f32.mrf.mxu2 }
 0x127   : > { %v1220_v19 = vadd.f32 %v1219_v33, %v1131_v28  ;;  %v1308_v34 = vpop.f32.mrf.mxu3 }
 0x128   : > { %v1133_v4 = vpop.f32.mrf.mxu1 }
 0x129   : > { %v1309_v43 = vadd.f32 %v1308_v34, %v1220_v19  ;;  %v1134_v57 = vadd.f32 %v1133_v4, %v2520_v18 }
 0x12a   : > { %v1400_v48 = vpop.f32.mrf.mxu0 }
 0x12b   : > { %v2235_v53 = vpop.eup %2234  ;;  %v1398_v56 = vadd.f32 %v1397_v13, %v1309_v43  ;;  %1172 = vmatmul.bf16.gmra.mxu1 %v1837_v37  ;;  %1261 = vmatmul.bf16.gmra.mxu2 %v1841_v38  ;;  %v1868_v13 = vld [vmem:[%s2349_s5 + $0x218] sm:$0xf] }
 0x12c   : > { %1499 = vst.msk [vmem:[%s2660_s23 + $0x30] sm:$0xff] %vm1492_vm1, %v2235_v53  ;;  %1350 = vmatmul.bf16.gmra.mxu3 %v1845_v55  ;;  %v1869_v28 = vor.u32 %v2141_v16, %v1868_v13  ;;  %v1874_v53 = vld [vmem:[%s2349_s5 + $0x244] sm:$0xf0] }
 0x12d   : > { %2066 = vmatmul.msk.bf16.gmra.mxu0 %vm966_vm0, %v1849_v39  ;;  %2236 = vtanh.f32 %v1398_v56  ;;  %v1880_v56 = vld [vmem:[%s2349_s5 + $0x238] sm:$0xf] }
 0x12e   : > { %v1222_v15 = vpop.f32.mrf.mxu2 }
 0x12f   : > { %v1223_v58 = vadd.f32 %v1222_v15, %v1134_v57  ;;  %v1311_v59 = vpop.f32.mrf.mxu3  ;;  %v2145_v57 = vld [vmem:[%s2349_s5 + $0x248] sm:$0xf0]  ;;  %v2143_v15 = vld [vmem:[%s2349_s5 + $0x23c] sm:$0xf] }
 0x130   : > { %v1135_v60 = vpop.f32.mrf.mxu1  ;;  %v1881_v1 = vor.u32 %v2145_v57, %v1880_v56 }
 0x131   : > { %v1312_v61 = vadd.f32 %v1311_v59, %v1223_v58  ;;  %v1136_v18 = vadd.f32 %v1135_v60, %v2532_v25  ;;  %v1882_v58 = vld [vmem:[%s2349_s5 + $0x24c] sm:$0xf0]  ;;  %v1888_v59 = vld [vmem:[%s2349_s5 + $0x240] sm:$0xf]  ;;  %v2146_v60 = vld [vmem:[%s2349_s5 + $0x250] sm:$0xf0] }
 0x132   : > { %v1402_v52 = vpop.f32.mrf.mxu0  ;;  %v1885_v26 = vor.u32 %v2143_v15, %v1882_v58  ;;  %v1889_v42 = vor.u32 %v2146_v60, %v1888_v59 }
 0x133   : > { %v2237_v63 = vpop.eup %2236  ;;  %v1401_v0 = vadd.f32 %v1400_v48, %v1312_v61  ;;  %v2142_v48 = vld [vmem:[%s2349_s5 + $0x234] sm:$0xf] }
 0x134   : > { %1500 = vst.msk [vmem:[%s2660_s23 + $0x38] sm:$0xff] %vm1492_vm1, %v2237_v63 }
 0x135   : > { %2238 = vtanh.f32 %v1401_v0  ;;  %v1877_v0 = vor.u32 %v2142_v48, %v1874_v53 }
 0x136   : > { %v1224_v17 = vpop.f32.mrf.mxu2 }
 0x137   : > { %v1225_v8 = vadd.f32 %v1224_v17, %v1136_v18  ;;  %v1313_v20 = vpop.f32.mrf.mxu3 }
 0x138   : > { %v1138_v45 = vpop.f32.mrf.mxu1 }
 0x139   : > { %v1314_v29 = vadd.f32 %v1313_v20, %v1225_v8  ;;  %v1139_v25 = vadd.f32 %v1138_v45, %v2551_v44 }
 0x13a   : > { %v1405_v30 = vpop.f32.mrf.mxu0 }
 0x13b   : > { %v2239_v32 = vpop.eup %2238  ;;  %v1403_v33 = vadd.f32 %v1402_v52, %v1314_v29  ;;  %1177 = vmatmul.bf16.gmra.mxu1 %v1857_v22  ;;  %1266 = vmatmul.bf16.gmra.mxu2 %v1861_v24  ;;  %v1894_v29 = vld [vmem:[%s2349_s5 + $0x26c] sm:$0xf0] }
 0x13c   : > { %1501 = vst.msk [vmem:[%s2660_s23 + $0x40] sm:$0xff] %vm1492_vm1, %v2239_v32  ;;  %1355 = vmatmul.bf16.gmra.mxu3 %v1865_v27  ;;  %v2150_v32 = vld [vmem:[%s2349_s5 + $0x270] sm:$0xf0] }
 0x13d   : > { %2067 = vmatmul.msk.bf16.gmra.mxu0 %vm966_vm0, %v1869_v28  ;;  %2240 = vtanh.f32 %v1403_v33  ;;  %v2147_v28 = vld [vmem:[%s2349_s5 + $0x25c] sm:$0xf]  ;;  %v2148_v33 = vld [vmem:[%s2349_s5 + $0x264] sm:$0xf] }
 0x13e   : > { %v1227_v19 = vpop.f32.mrf.mxu2 }
 0x13f   : > { %v1228_v34 = vadd.f32 %v1227_v19, %v1139_v25  ;;  %v1316_v37 = vpop.f32.mrf.mxu3  ;;  %v1902_v25 = vld [vmem:[%s2349_s5 + $0x274] sm:$0xf0]  ;;  %v1908_v19 = vld [vmem:[%s2349_s5 + $0x268] sm:$0xf] }
 0x140   : > { %v1140_v38 = vpop.f32.mrf.mxu1  ;;  %v1905_v48 = vor.u32 %v2148_v33, %v1902_v25 }
 0x141   : > { %v1317_v4 = vadd.f32 %v1316_v37, %v1228_v34  ;;  %v1141_v44 = vadd.f32 %v1140_v38, %v2563_v51  ;;  %v2151_v34 = vld [vmem:[%s2349_s5 + $0x278] sm:$0xf0] }
 0x142   : > { %v1407_v55 = vpop.f32.mrf.mxu0  ;;  %v1909_v53 = vor.u32 %v2151_v34, %v1908_v19 }
 0x143   : > { %v2241_v39 = vpop.eup %2240  ;;  %v1406_v43 = vadd.f32 %v1405_v30, %v1317_v4  ;;  %v1900_v30 = vld [vmem:[%s2349_s5 + $0x260] sm:$0xf] }
 0x144   : > { %1502 = vst.msk [vmem:[%s2660_s23 + $0x48] sm:$0xff] %vm1492_vm1, %v2241_v39  ;;  %v1901_v39 = vor.u32 %v2150_v32, %v1900_v30 }
 0x145   : > { %2242 = vtanh.f32 %v1406_v43 }
 0x146   : > { %v1229_v61 = vpop.f32.mrf.mxu2 }
 0x147   : > { %v1230_v52 = vadd.f32 %v1229_v61, %v1141_v44  ;;  %v1318_v63 = vpop.f32.mrf.mxu3 }
 0x148   : > { %v1143_v5 = vpop.f32.mrf.mxu1 }
 0x149   : > { %v1319_v6 = vadd.f32 %v1318_v63, %v1230_v52  ;;  %v1144_v51 = vadd.f32 %v1143_v5, %v2582_v7 }
 0x14a   : > { %v1410_v18 = vpop.f32.mrf.mxu0 }
 0x14b   : > { %v2243_v9 = vpop.eup %2242  ;;  %v1408_v13 = vadd.f32 %v1407_v55, %v1319_v6  ;;  %1182 = vmatmul.bf16.gmra.mxu1 %v1877_v0  ;;  %1271 = vmatmul.bf16.gmra.mxu2 %v1881_v1  ;;  %v1897_v55 = vor.u32 %v2147_v28, %v1894_v29 }
 0x14c   : > { %1503 = vst.msk [vmem:[%s2660_s23 + $0x50] sm:$0xff] %vm1492_vm1, %v2243_v9  ;;  %1360 = vmatmul.bf16.gmra.mxu3 %v1885_v26 }
 0x14d   : > { %2068 = vmatmul.msk.bf16.gmra.mxu0 %vm966_vm0, %v1889_v42  ;;  %2244 = vtanh.f32 %v1408_v13 }
 0x14e   : > { %v1232_v16 = vpop.f32.mrf.mxu2 }
 0x14f   : > { %v1233_v17 = vadd.f32 %v1232_v16, %v1144_v51  ;;  %v1321_v8 = vpop.f32.mrf.mxu3 }
 0x150   : > { %v1145_v20 = vpop.f32.mrf.mxu1 }
 0x151   : > { %v1322_v22 = vadd.f32 %v1321_v8, %v1233_v17  ;;  %v1146_v7 = vadd.f32 %v1145_v20, %v2594_v14 }
 0x152   : > { %v1412_v24 = vpop.f32.mrf.mxu0 }
 0x153   : > { %v2245_v45 = vpop.eup %2244  ;;  %v1411_v27 = vadd.f32 %v1410_v18, %v1322_v22 }
 0x154   : > { %1504 = vst.msk [vmem:[%s2660_s23 + $0x58] sm:$0xff] %vm1492_vm1, %v2245_v45 }
 0x155   : > { %2246 = vtanh.f32 %v1411_v27 }
 0x156   : > { %v1234_v37 = vpop.f32.mrf.mxu2 }
 0x157   : > { %v1235_v38 = vadd.f32 %v1234_v37, %v1146_v7  ;;  %v1323_v4 = vpop.f32.mrf.mxu3 }
 0x158   : > { %v1148_v43 = vpop.f32.mrf.mxu1 }
 0x159   : > { %v1324_v56 = vadd.f32 %v1323_v4, %v1235_v38  ;;  %v1149_v14 = vadd.f32 %v1148_v43, %v2613_v41 }
 0x15a   : > { %v1415_v57 = vpop.f32.mrf.mxu0 }
 0x15b   : > { %v2247_v15 = vpop.eup %2246  ;;  %v1413_v44 = vadd.f32 %v1412_v24, %v1324_v56  ;;  %1187 = vmatmul.bf16.gmra.mxu1 %v1897_v55  ;;  %1276 = vmatmul.bf16.gmra.mxu2 %v1901_v39 }
 0x15c   : > { %1505 = vst.msk [vmem:[%s2660_s23 + $0x60] sm:$0xff] %vm1492_vm1, %v2247_v15  ;;  %1365 = vmatmul.bf16.gmra.mxu3 %v1905_v48 }
 0x15d   : > { %2069 = vmatmul.msk.bf16.gmra.mxu0 %vm966_vm0, %v1909_v53  ;;  %2248 = vtanh.f32 %v1413_v44 }
 0x15e   : > { %v1237_v58 = vpop.f32.mrf.mxu2 }
 0x15f   : > { %v1238_v59 = vadd.f32 %v1237_v58, %v1149_v14  ;;  %v1326_v60 = vpop.f32.mrf.mxu3 }
 0x160   : > { %v1150_v61 = vpop.f32.mrf.mxu1 }
 0x161   : > { %v1327_v52 = vadd.f32 %v1326_v60, %v1238_v59  ;;  %v1151_v5 = vadd.f32 %v1150_v61, %v2625_v54 }
 0x162   : > { %v1417_v63 = vpop.f32.mrf.mxu0 }
 0x163   : > { %v2249_v0 = vpop.eup %2248  ;;  %v1416_v1 = vadd.f32 %v1415_v57, %v1327_v52 }
 0x164   : > { %1506 = vst.msk [vmem:[%s2660_s23 + $0x68] sm:$0xff] %vm1492_vm1, %v2249_v0 }
 0x165   : > { %2250 = vtanh.f32 %v1416_v1 }
 0x166   : > { %v1239_v26 = vpop.f32.mrf.mxu2 }
 0x167   : > { %v1240_v42 = vadd.f32 %v1239_v26, %v1151_v5  ;;  %v1328_v6 = vpop.f32.mrf.mxu3 }
 0x168   : > { %v1153_v18 = vpop.f32.mrf.mxu1 }
 0x169   : > { %v1329_v41 = vadd.f32 %v1328_v6, %v1240_v42  ;;  %v1154_v16 = vadd.f32 %v1153_v18, %v2526_v21 }
 0x16a   : > { %v1420_v9 = vpop.f32.mrf.mxu0 }
 0x16b   : > { %v2251_v13 = vpop.eup %2250  ;;  %v1418_v51 = vadd.f32 %v1417_v63, %v1329_v41 }
 0x16c   : > { %1507 = vst.msk [vmem:[%s2660_s23 + $0x70] sm:$0xff] %vm1492_vm1, %v2251_v13 }
 0x16d   : > { %2252 = vtanh.f32 %v1418_v51 }
 0x16e   : > { %v1242_v17 = vpop.f32.mrf.mxu2 }
 0x16f   : > { %v1243_v8 = vadd.f32 %v1242_v17, %v1154_v16  ;;  %v1331_v20 = vpop.f32.mrf.mxu3 }
 0x170   : > { %v1155_v22 = vpop.f32.mrf.mxu1 }
 0x171   : > { %v1332_v54 = vadd.f32 %v1331_v20, %v1243_v8  ;;  %v1156_v28 = vadd.f32 %v1155_v22, %v2545_v36 }
 0x172   : > { %v1422_v24 = vpop.f32.mrf.mxu0 }
 0x173   : > { %v2253_v45 = vpop.eup %2252  ;;  %v1421_v27 = vadd.f32 %v1420_v9, %v1332_v54 }
 0x174   : > { %1508 = vst.msk [vmem:[%s2660_s23 + $0x78] sm:$0xff] %vm1492_vm1, %v2253_v45 }
 0x175   : > { %2254 = vtanh.f32 %v1421_v27 }
 0x176   : > { %v1244_v29 = vpop.f32.mrf.mxu2 }
 0x177   : > { %v1245_v30 = vadd.f32 %v1244_v29, %v1156_v28  ;;  %v1333_v32 = vpop.f32.mrf.mxu3 }
 0x178   : > { %v1158_v33 = vpop.f32.mrf.mxu1 }
 0x179   : > { %v1334_v21 = vadd.f32 %v1333_v32, %v1245_v30  ;;  %v1159_v34 = vadd.f32 %v1158_v33, %v2557_v47 }
 0x17a   : > { %v1425_v7 = vpop.f32.mrf.mxu0 }
 0x17b   : > { %v2255_v25 = vpop.eup %2254  ;;  %v1423_v19 = vadd.f32 %v1422_v24, %v1334_v21 }
 0x17c   : > { %1509 = vst.msk [vmem:[%s2660_s23 + $0x80] sm:$0xff] %vm1492_vm1, %v2255_v25 }
 0x17d   : > { %2256 = vtanh.f32 %v1423_v19 }
 0x17e   : > { %v1247_v37 = vpop.f32.mrf.mxu2 }
 0x17f   : > { %v1248_v38 = vadd.f32 %v1247_v37, %v1159_v34  ;;  %v1336_v4 = vpop.f32.mrf.mxu3 }
 0x180   : > { %v1160_v55 = vpop.f32.mrf.mxu1 }
 0x181   : > { %v1337_v36 = vadd.f32 %v1336_v4, %v1248_v38  ;;  %v1161_v53 = vadd.f32 %v1160_v55, %v2576_v62 }
 0x182   : > { %v1427_v39 = vpop.f32.mrf.mxu0 }
 0x183   : > { %v2257_v43 = vpop.eup %2256  ;;  %v1426_v48 = vadd.f32 %v1425_v7, %v1337_v36 }
 0x184   : > { %1510 = vst.msk [vmem:[%s2660_s23 + $0x88] sm:$0xff] %vm1492_vm1, %v2257_v43 }
 0x185   : > { %2258 = vtanh.f32 %v1426_v48 }
 0x186   : > { %v1249_v56 = vpop.f32.mrf.mxu2 }
 0x187   : > { %v1250_v57 = vadd.f32 %v1249_v56, %v1161_v53  ;;  %v1338_v15 = vpop.f32.mrf.mxu3 }
 0x188   : > { %v1163_v44 = vpop.f32.mrf.mxu1 }
 0x189   : > { %v1339_v47 = vadd.f32 %v1338_v15, %v1250_v57  ;;  %v1164_v60 = vadd.f32 %v1163_v44, %v2588_v10 }
 0x18a   : > { %v1430_v14 = vpop.f32.mrf.mxu0 }
 0x18b   : > { %v2259_v58 = vpop.eup %2258  ;;  %v1428_v59 = vadd.f32 %v1427_v39, %v1339_v47 }
 0x18c   : > { %1511 = vst.msk [vmem:[%s2660_s23 + $0x90] sm:$0xff] %vm1492_vm1, %v2259_v58 }
 0x18d   : > { %2260 = vtanh.f32 %v1428_v59 }
 0x18e   : > { %v1252_v61 = vpop.f32.mrf.mxu2 }
 0x18f   : > { %v1253_v52 = vadd.f32 %v1252_v61, %v1164_v60  ;;  %v1341_v63 = vpop.f32.mrf.mxu3 }
 0x190   : > { %v1165_v0 = vpop.f32.mrf.mxu1 }
 0x191   : > { %v1342_v62 = vadd.f32 %v1341_v63, %v1253_v52  ;;  %v1166_v42 = vadd.f32 %v1165_v0, %v2607_v31 }
 0x192   : > { %v1432_v1 = vpop.f32.mrf.mxu0 }
 0x193   : > { %v2261_v5 = vpop.eup %2260  ;;  %v1431_v26 = vadd.f32 %v1430_v14, %v1342_v62 }
 0x194   : > { %1512 = vst.msk [vmem:[%s2660_s23 + $0x98] sm:$0xff] %vm1492_vm1, %v2261_v5 }
 0x195   : > { %2262 = vtanh.f32 %v1431_v26 }
 0x196   : > { %v1254_v6 = vpop.f32.mrf.mxu2 }
 0x197   : > { %v1255_v18 = vadd.f32 %v1254_v6, %v1166_v42  ;;  %v1343_v41 = vpop.f32.mrf.mxu3 }
 0x198   : > { %v1168_v9 = vpop.f32.mrf.mxu1 }
 0x199   : > { %v1344_v10 = vadd.f32 %v1343_v41, %v1255_v18  ;;  %v1169_v17 = vadd.f32 %v1168_v9, %v2619_v46 }
 0x19a   : > { %v1435_v13 = vpop.f32.mrf.mxu0 }
 0x19b   : > { %v2263_v51 = vpop.eup %2262  ;;  %v1433_v16 = vadd.f32 %v1432_v1, %v1344_v10 }
 0x19c   : > { %1513 = vst.msk [vmem:[%s2660_s23 + $0xa0] sm:$0xff] %vm1492_vm1, %v2263_v51 }
 0x19d   : > { %2264 = vtanh.f32 %v1433_v16 }
 0x19e   : > { %v1257_v8 = vpop.f32.mrf.mxu2 }
 0x19f   : > { %v1258_v20 = vadd.f32 %v1257_v8, %v1169_v17  ;;  %v1346_v22 = vpop.f32.mrf.mxu3 }
 0x1a0   : > { %v1170_v54 = vpop.f32.mrf.mxu1 }
 0x1a1   : > { %v1347_v31 = vadd.f32 %v1346_v22, %v1258_v20  ;;  %v1171_v28 = vadd.f32 %v1170_v54, %v2638_v3 }
 0x1a2   : > { %v1437_v24 = vpop.f32.mrf.mxu0 }
 0x1a3   : > { %v2265_v45 = vpop.eup %2264  ;;  %v1436_v27 = vadd.f32 %v1435_v13, %v1347_v31 }
 0x1a4   : > { %1514 = vst.msk [vmem:[%s2660_s23 + $0xa8] sm:$0xff] %vm1492_vm1, %v2265_v45 }
 0x1a5   : > { %2266 = vtanh.f32 %v1436_v27 }
 0x1a6   : > { %v1259_v29 = vpop.f32.mrf.mxu2 }
 0x1a7   : > { %v1260_v30 = vadd.f32 %v1259_v29, %v1171_v28  ;;  %v1348_v32 = vpop.f32.mrf.mxu3 }
 0x1a8   : > { %v1173_v33 = vpop.f32.mrf.mxu1 }
 0x1a9   : > { %v1349_v46 = vadd.f32 %v1348_v32, %v1260_v30  ;;  %v1174_v19 = vadd.f32 %v1173_v33, %v2529_v23 }
 0x1aa   : > { %v1440_v21 = vpop.f32.mrf.mxu0 }
 0x1ab   : > { %v2267_v7 = vpop.eup %2266  ;;  %v1438_v25 = vadd.f32 %v1437_v24, %v1349_v46 }
 0x1ac   : > { %1515 = vst.msk [vmem:[%s2660_s23 + $0xb0] sm:$0xff] %vm1492_vm1, %v2267_v7 }
 0x1ad   : > { %2268 = vtanh.f32 %v1438_v25 }
 0x1ae   : > { %v1262_v34 = vpop.f32.mrf.mxu2 }
 0x1af   : > { %v1263_v37 = vadd.f32 %v1262_v34, %v1174_v19  ;;  %v1351_v38 = vpop.f32.mrf.mxu3 }
 0x1b0   : > { %v1175_v4 = vpop.f32.mrf.mxu1 }
 0x1b1   : > { %v1352_v3 = vadd.f32 %v1351_v38, %v1263_v37  ;;  %v1176_v43 = vadd.f32 %v1175_v4, %v2548_v40 }
 0x1b2   : > { %v1442_v55 = vpop.f32.mrf.mxu0 }
 0x1b3   : > { %v2269_v36 = vpop.eup %2268  ;;  %v1441_v39 = vadd.f32 %v1440_v21, %v1352_v3 }
 0x1b4   : > { %1516 = vst.msk [vmem:[%s2660_s23 + $0xb8] sm:$0xff] %vm1492_vm1, %v2269_v36 }
 0x1b5   : > { %2270 = vtanh.f32 %v1441_v39 }
 0x1b6   : > { %v1264_v48 = vpop.f32.mrf.mxu2 }
 0x1b7   : > { %v1265_v53 = vadd.f32 %v1264_v48, %v1176_v43  ;;  %v1353_v56 = vpop.f32.mrf.mxu3 }
 0x1b8   : > { %v1178_v57 = vpop.f32.mrf.mxu1 }
 0x1b9   : > { %v1354_v23 = vadd.f32 %v1353_v56, %v1265_v53  ;;  %v1179_v14 = vadd.f32 %v1178_v57, %v2560_v49 }
 0x1ba   : > { %v1445_v15 = vpop.f32.mrf.mxu0 }
 0x1bb   : > { %v2271_v44 = vpop.eup %2270  ;;  %v1443_v47 = vadd.f32 %v1442_v55, %v1354_v23 }
 0x1bc   : > { %1517 = vst.msk [vmem:[%s2660_s23 + $0xc0] sm:$0xff] %vm1492_vm1, %v2271_v44 }
 0x1bd   : > { %2272 = vtanh.f32 %v1443_v47 }
 0x1be   : > { %v1267_v58 = vpop.f32.mrf.mxu2 }
 0x1bf   : > { %v1268_v59 = vadd.f32 %v1267_v58, %v1179_v14  ;;  %v1356_v60 = vpop.f32.mrf.mxu3 }
 0x1c0   : > { %v1180_v61 = vpop.f32.mrf.mxu1 }
 0x1c1   : > { %v1357_v40 = vadd.f32 %v1356_v60, %v1268_v59  ;;  %v1181_v62 = vadd.f32 %v1180_v61, %v2579_v2 }
 0x1c2   : > { %v1447_v52 = vpop.f32.mrf.mxu0 }
 0x1c3   : > { %v2273_v63 = vpop.eup %2272  ;;  %v1446_v0 = vadd.f32 %v1445_v15, %v1357_v40 }
 0x1c4   : > { %1518 = vst.msk [vmem:[%s2660_s23 + $0xc8] sm:$0xff] %vm1492_vm1, %v2273_v63 }
 0x1c5   : > { %2274 = vtanh.f32 %v1446_v0 }
 0x1c6   : > { %v1269_v1 = vpop.f32.mrf.mxu2 }
 0x1c7   : > { %v1270_v5 = vadd.f32 %v1269_v1, %v1181_v62  ;;  %v1358_v26 = vpop.f32.mrf.mxu3 }
 0x1c8   : > { %v1183_v42 = vpop.f32.mrf.mxu1 }
 0x1c9   : > { %v1359_v49 = vadd.f32 %v1358_v26, %v1270_v5  ;;  %v1184_v9 = vadd.f32 %v1183_v42, %v2591_v12 }
 0x1ca   : > { %v1450_v41 = vpop.f32.mrf.mxu0 }
 0x1cb   : > { %v2275_v6 = vpop.eup %2274  ;;  %v1448_v18 = vadd.f32 %v1447_v52, %v1359_v49 }
 0x1cc   : > { %1519 = vst.msk [vmem:[%s2660_s23 + $0xd0] sm:$0xff] %vm1492_vm1, %v2275_v6 }
 0x1cd   : > { %2276 = vtanh.f32 %v1448_v18 }
 0x1ce   : > { %v1272_v10 = vpop.f32.mrf.mxu2 }
 0x1cf   : > { %v1273_v13 = vadd.f32 %v1272_v10, %v1184_v9  ;;  %v1361_v51 = vpop.f32.mrf.mxu3 }
 0x1d0   : > { %v1185_v16 = vpop.f32.mrf.mxu1 }
 0x1d1   : > { %v1362_v2 = vadd.f32 %v1361_v51, %v1273_v13  ;;  %v1186_v20 = vadd.f32 %v1185_v16, %v2610_v35 }
 0x1d2   : > { %v1452_v22 = vpop.f32.mrf.mxu0 }
 0x1d3   : > { %v2277_v17 = vpop.eup %2276  ;;  %v1451_v8 = vadd.f32 %v1450_v41, %v1362_v2 }
 0x1d4   : > { %1520 = vst.msk [vmem:[%s2660_s23 + $0xd8] sm:$0xff] %vm1492_vm1, %v2277_v17 }
 0x1d5   : > { %2278 = vtanh.f32 %v1451_v8 }
 0x1d6   : > { %v1274_v54 = vpop.f32.mrf.mxu2 }
 0x1d7   : > { %v1275_v31 = vadd.f32 %v1274_v54, %v1186_v20  ;;  %v1363_v24 = vpop.f32.mrf.mxu3 }
 0x1d8   : > { %v1188_v45 = vpop.f32.mrf.mxu1 }
 0x1d9   : > { %v1364_v12 = vadd.f32 %v1363_v24, %v1275_v31  ;;  %v1189_v29 = vadd.f32 %v1188_v45, %v2622_v50 }
 0x1da   : > { %v1455_v46 = vpop.f32.mrf.mxu0 }
 0x1db   : > { %v2279_v27 = vpop.eup %2278  ;;  %v1453_v28 = vadd.f32 %v1452_v22, %v1364_v12 }
 0x1dc   : > { %1521 = vst.msk [vmem:[%s2660_s23 + $0xe0] sm:$0xff] %vm1492_vm1, %v2279_v27 }
 0x1dd   : > { %2280 = vtanh.f32 %v1453_v28 }
 0x1de   : > { %v1277_v30 = vpop.f32.mrf.mxu2 }
 0x1df   : > { %v1278_v32 = vadd.f32 %v1277_v30, %v1189_v29  ;;  %v1366_v33 = vpop.f32.mrf.mxu3 }
 0x1e0   : > { %v1190_v21 = vpop.f32.mrf.mxu1 }
 0x1e1   : > { %v1367_v35 = vadd.f32 %v1366_v33, %v1278_v32  ;;  %v1191_v19 = vadd.f32 %v1190_v21, %v2641_v11 }
 0x1e2   : > { %v1457_v50 = vpop.f32.mrf.mxu0 }
 0x1e3   : > { %v2281_v7 = vpop.eup %2280  ;;  %v1456_v25 = vadd.f32 %v1455_v46, %v1367_v35 }
 0x1e4   : > { %1522 = vst.msk [vmem:[%s2660_s23 + $0xe8] sm:$0xff] %vm1492_vm1, %v2281_v7 }
 0x1e5   : > { %2282 = vtanh.f32 %v1456_v25 }
 0x1e6   : > { %v1279_v34 = vpop.f32.mrf.mxu2 }
 0x1e7   : > { %v1280_v37 = vadd.f32 %v1279_v34, %v1191_v19  ;;  %v1368_v38 = vpop.f32.mrf.mxu3 }
 0x1e9   : > { %v1369_v4 = vadd.f32 %v1368_v38, %v1280_v37 }
 0x1eb   : > { %v2283_v3 = vpop.eup %2282  ;;  %v1458_v55 = vadd.f32 %v1457_v50, %v1369_v4 }
 0x1ec   : > { %1523 = vst.msk [vmem:[%s2660_s23 + $0xf0] sm:$0xff] %vm1492_vm1, %v2283_v3 }
 0x1ed   : > { %2284 = vtanh.f32 %v1458_v55 }
 0x1f3   : > { %v2285_v36 = vpop.eup %2284 }
 0x1f4   : > { %1524 = vst.msk [vmem:[%s2660_s23 + $0xf8] sm:$0xff] %vm1492_vm1, %v2285_v36 }
 0x1f5 PF: > { %s13_s12 = sadd.s32 1, %s2292_s12  }
 0x1f6   : > { %p10_p4 = scmp.ge.s32.totalorder %s13_s12, 4  }
 0x1f8   :  { %12 = sbr.rel (!%p10_p4) target bundleno = 1 (0x1), region = 62 }

</bundles_post_ra>
